<compile_context>
chip_gen: v6e
topology: v6e:2x2x1
jax: 0.10.0
libtpu: 0.0.40
codegen_flags: <defaults>
</compile_context>

<pallas_src>
import jax
import jax.numpy as jnp
from jax.experimental import pallas as pl
from jax.experimental.pallas import tpu as pltpu

# ----------------------------- configuration --------------------------------
D_MODEL = 32
D_FF = 64
N_HEADS = 4
D_HEAD = 8            # d_model = n_heads * d_head
N_ENC_LAYERS = 2
N_DEC_LAYERS = 2
SRC_LEN = 8
TGT_LEN = 8
PRED_LEN = 2
SRC_SIZE = 4
TGT_SIZE = 4
BATCH = 2
LN_EPS = 1e-5
NEG_INF = -1e30       # large finite negative (exp underflows to exactly 0)


# ------------------------------- fused kernel --------------------------------
def _transformer_kernel(
    src_ref, tgt_ref,
    src_pos_ref, tgt_pos_ref,
    src_w_ref, src_b_ref, tgt_w_ref, tgt_b_ref,
    enc_wqkv_ref, enc_wo_ref, enc_ln_ref,
    enc_fw1_ref, enc_fb1_ref, enc_fw2_ref, enc_fb2_ref,
    dec_wqkv_ref, dec_wo_self_ref,
    dec_wq_c_ref, dec_wkv_c_ref, dec_wo_c_ref, dec_ln_ref,
    dec_fw1_ref, dec_fb1_ref, dec_fw2_ref, dec_fb2_ref,
    proj_w_ref, proj_b_ref,
    out_ref,
):
    f32 = jnp.float32
    inv_sqrt_dh = 1.0 / (float(D_HEAD) ** 0.5)

    def matmul(a, b):
        return jnp.dot(a, b, preferred_element_type=f32)

    def layer_norm(x, g, b):
        # one-pass mean / variance (E[x^2] - E[x]^2)
        mean = jnp.mean(x, axis=-1, keepdims=True)
        meansq = jnp.mean(x * x, axis=-1, keepdims=True)
        var = meansq - mean * mean
        return (x - mean) * jax.lax.rsqrt(var + LN_EPS) * g + b

    def softmax(s):
        s = s - jnp.max(s, axis=-1, keepdims=True)
        p = jnp.exp(s)
        return p * pl.reciprocal(jnp.sum(p, axis=-1, keepdims=True), approx=True)

    def attn_core(q, k, v, wo, mask):
        # q: [Lq, D] (pre-scaled), k/v: [Lk, D], wo: [D, D]
        out = jnp.zeros((q.shape[0], D_MODEL), f32)
        for h in range(N_HEADS):
            sl = slice(h * D_HEAD, (h + 1) * D_HEAD)
            # contract last dims directly (no k.T / no transpose)
            s = jax.lax.dot_general(
                q[:, sl], k[:, sl], (((1,), (1,)), ((), ())),
                preferred_element_type=f32)
            if mask is not None:
                s = s + mask
            p = softmax(s)
            ctx_h = matmul(p, v[:, sl])                 # [Lq, d_head]
            out = out + matmul(ctx_h, wo[sl, :])        # == concat(ctx) @ wo
        return out

    def self_mha(x, wqkv, wo, mask):
        qkv = matmul(x, wqkv)                           # [L, 3D] fused projection
        q = qkv[:, :D_MODEL] * inv_sqrt_dh
        k = qkv[:, D_MODEL:2 * D_MODEL]
        v = qkv[:, 2 * D_MODEL:]
        return attn_core(q, k, v, wo, mask)

    def cross_mha(x_q, x_kv, wq, wkv, wo, mask):
        q = matmul(x_q, wq) * inv_sqrt_dh
        kv = matmul(x_kv, wkv)                          # [Lk, 2D] fused K/V projection
        k = kv[:, :D_MODEL]
        v = kv[:, D_MODEL:]
        return attn_core(q, k, v, wo, mask)

    def ffn(x, w1, b1, w2, b2):
        h = jnp.maximum(matmul(x, w1) + b1, 0.0)
        return matmul(h, w2) + b2

    # decoder self-attention mask (pt == 0): last PRED_LEN key columns masked
    col = jax.lax.broadcasted_iota(jnp.int32, (TGT_LEN, TGT_LEN), 1)
    dec_self_mask = jnp.where(col >= TGT_LEN - PRED_LEN, f32(NEG_INF), f32(0.0))

    # ---------------- input projections + positional embeddings --------------
    src = src_ref[0]                                    # [SRC_LEN, SRC_SIZE]
    tgt = tgt_ref[0]                                    # [TGT_LEN, TGT_SIZE]
    enc_x = matmul(src, src_w_ref[...]) + src_b_ref[...] + src_pos_ref[...]
    dec_x = matmul(tgt, tgt_w_ref[...]) + tgt_b_ref[...] + tgt_pos_ref[...]

    # -------------------------------- encoder --------------------------------
    for l in range(N_ENC_LAYERS):
        ln = enc_ln_ref[l]                              # [4, D] : g1,b1,g2,b2
        attn = self_mha(enc_x, enc_wqkv_ref[l], enc_wo_ref[l], None)
        x1 = layer_norm(attn + enc_x, ln[0:1, :], ln[1:2, :])
        f = ffn(x1, enc_fw1_ref[l], enc_fb1_ref[l], enc_fw2_ref[l], enc_fb2_ref[l])
        # TODO(synk): dropout is identity (inference semantics).
        enc_x = layer_norm(f + x1, ln[2:3, :], ln[3:4, :])

    # -------------------------------- decoder --------------------------------
    for l in range(N_DEC_LAYERS):
        ln = dec_ln_ref[l]                              # [6, D] : g1,b1,g2,b2,g3,b3
        self_attn = self_mha(dec_x, dec_wqkv_ref[l], dec_wo_self_ref[l], dec_self_mask)
        x1 = layer_norm(self_attn + dec_x, ln[0:1, :], ln[1:2, :])
        cross = cross_mha(x1, enc_x, dec_wq_c_ref[l], dec_wkv_c_ref[l],
                          dec_wo_c_ref[l], None)
        x2 = layer_norm(cross + x1, ln[2:3, :], ln[3:4, :])
        f = ffn(x2, dec_fw1_ref[l], dec_fb1_ref[l], dec_fw2_ref[l], dec_fb2_ref[l])
        # TODO(synk): dropout is identity (inference semantics).
        dec_x = layer_norm(f + x2, ln[4:5, :], ln[5:6, :])

    # ------------------------------ output head ------------------------------
    out_ref[0] = matmul(dec_x, proj_w_ref[...]) + proj_b_ref[...]


# ------------------------------ kernel wrapper --------------------------------
def _full_spec(shape):
    zeros = (0,) * len(shape)
    return pl.BlockSpec(shape, lambda b, z=zeros: z)


def transformer_forward(params, src, tgt):
    B = src.shape[0]
    args = [
        src, tgt,
        params["src_pos_emb"], params["tgt_pos_emb"],
        params["src_w"], params["src_b"],
        params["tgt_w"], params["tgt_b"],
        params["enc_wqkv"], params["enc_wo"], params["enc_ln"],
        params["enc_fw1"], params["enc_fb1"], params["enc_fw2"], params["enc_fb2"],
        params["dec_wqkv"], params["dec_wo_self"],
        params["dec_wq_c"], params["dec_wkv_c"], params["dec_wo_c"], params["dec_ln"],
        params["dec_fw1"], params["dec_fb1"], params["dec_fw2"], params["dec_fb2"],
        params["proj_w"], params["proj_b"],
    ]
    in_specs = [
        pl.BlockSpec((1, SRC_LEN, SRC_SIZE), lambda b: (b, 0, 0)),
        pl.BlockSpec((1, TGT_LEN, TGT_SIZE), lambda b: (b, 0, 0)),
    ] + [_full_spec(a.shape) for a in args[2:]]

    return pl.pallas_call(
        _transformer_kernel,
        out_shape=jax.ShapeDtypeStruct((B, TGT_LEN, TGT_SIZE), jnp.float32),
        grid=(B,),
        in_specs=in_specs,
        out_specs=pl.BlockSpec((1, TGT_LEN, TGT_SIZE), lambda b: (b, 0, 0)),
        compiler_params=pltpu.CompilerParams(
            dimension_semantics=("parallel",),     # v7x: one batch elem per TC
            vmem_limit_bytes=32 * 1024 * 1024,     # explicit budget (v7x-safe)
        ),
    )(*args)


# ------------------------------ parameter init -------------------------------
def init_params(key):
    keys = iter(jax.random.split(key, 64))

    def rnd(shape, scale=0.02):
        return jax.random.normal(next(keys), shape, jnp.float32) * scale

    def zeros(shape):
        return jnp.zeros(shape, jnp.float32)

    enc_ln = jnp.tile(jnp.array([1., 0., 1., 0.], jnp.float32)[None, :, None],
                      (N_ENC_LAYERS, 1, D_MODEL))
    dec_ln = jnp.tile(jnp.array([1., 0., 1., 0., 1., 0.], jnp.float32)[None, :, None],
                      (N_DEC_LAYERS, 1, D_MODEL))

    return {
        "src_pos_emb": rnd((SRC_LEN, D_MODEL)),
        "tgt_pos_emb": rnd((TGT_LEN, D_MODEL)),
        "src_w": rnd((SRC_SIZE, D_MODEL)), "src_b": zeros((1, D_MODEL)),
        "tgt_w": rnd((TGT_SIZE, D_MODEL)), "tgt_b": zeros((1, D_MODEL)),
        # encoder (stacked over layers; QKV fused along output dim)
        "enc_wqkv": rnd((N_ENC_LAYERS, D_MODEL, 3 * D_MODEL)),
        "enc_wo": rnd((N_ENC_LAYERS, D_MODEL, D_MODEL)),
        "enc_ln": enc_ln,
        "enc_fw1": rnd((N_ENC_LAYERS, D_MODEL, D_FF)),
        "enc_fb1": zeros((N_ENC_LAYERS, 1, D_FF)),
        "enc_fw2": rnd((N_ENC_LAYERS, D_FF, D_MODEL)),
        "enc_fb2": zeros((N_ENC_LAYERS, 1, D_MODEL)),
        # decoder
        "dec_wqkv": rnd((N_DEC_LAYERS, D_MODEL, 3 * D_MODEL)),
        "dec_wo_self": rnd((N_DEC_LAYERS, D_MODEL, D_MODEL)),
        "dec_wq_c": rnd((N_DEC_LAYERS, D_MODEL, D_MODEL)),
        "dec_wkv_c": rnd((N_DEC_LAYERS, D_MODEL, 2 * D_MODEL)),
        "dec_wo_c": rnd((N_DEC_LAYERS, D_MODEL, D_MODEL)),
        "dec_ln": dec_ln,
        "dec_fw1": rnd((N_DEC_LAYERS, D_MODEL, D_FF)),
        "dec_fb1": zeros((N_DEC_LAYERS, 1, D_FF)),
        "dec_fw2": rnd((N_DEC_LAYERS, D_FF, D_MODEL)),
        "dec_fb2": zeros((N_DEC_LAYERS, 1, D_MODEL)),
        # projection head
        "proj_w": rnd((D_MODEL, TGT_SIZE)), "proj_b": zeros((1, TGT_SIZE)),
    }


# ----------------------------------- main ------------------------------------
if __name__ == "__main__":
    key = jax.random.PRNGKey(0)
    k_params, k_src, k_tgt = jax.random.split(key, 3)
    params = init_params(k_params)

    src = jax.random.normal(k_src, (BATCH, SRC_LEN, SRC_SIZE), jnp.float32)
    tgt = jax.random.normal(k_tgt, (BATCH, TGT_LEN, TGT_SIZE), jnp.float32)

    out = jax.jit(transformer_forward)(params, src, tgt)
    out = jax.block_until_ready(out)

    assert out.shape == (BATCH, TGT_LEN, TGT_SIZE)
    assert bool(jnp.all(jnp.isfinite(out)))
    print("KERNEL_OK")
</pallas_src>

<mosaic_0001>
module attributes {stable_mosaic.version = 11 : i64} {
  func.func @_transformer_kernel(%arg0: i32, %arg1: memref<1x8x4xf32, #tpu.memory_space<vmem>>, %arg2: memref<1x8x4xf32, #tpu.memory_space<vmem>>, %arg3: memref<8x32xf32, #tpu.memory_space<vmem>>, %arg4: memref<8x32xf32, #tpu.memory_space<vmem>>, %arg5: memref<4x32xf32, #tpu.memory_space<vmem>>, %arg6: memref<1x32xf32, #tpu.memory_space<vmem>>, %arg7: memref<4x32xf32, #tpu.memory_space<vmem>>, %arg8: memref<1x32xf32, #tpu.memory_space<vmem>>, %arg9: memref<2x32x96xf32, #tpu.memory_space<vmem>>, %arg10: memref<2x32x32xf32, #tpu.memory_space<vmem>>, %arg11: memref<2x4x32xf32, #tpu.memory_space<vmem>>, %arg12: memref<2x32x64xf32, #tpu.memory_space<vmem>>, %arg13: memref<2x1x64xf32, #tpu.memory_space<vmem>>, %arg14: memref<2x64x32xf32, #tpu.memory_space<vmem>>, %arg15: memref<2x1x32xf32, #tpu.memory_space<vmem>>, %arg16: memref<2x32x96xf32, #tpu.memory_space<vmem>>, %arg17: memref<2x32x32xf32, #tpu.memory_space<vmem>>, %arg18: memref<2x32x32xf32, #tpu.memory_space<vmem>>, %arg19: memref<2x32x64xf32, #tpu.memory_space<vmem>>, %arg20: memref<2x32x32xf32, #tpu.memory_space<vmem>>, %arg21: memref<2x6x32xf32, #tpu.memory_space<vmem>>, %arg22: memref<2x32x64xf32, #tpu.memory_space<vmem>>, %arg23: memref<2x1x64xf32, #tpu.memory_space<vmem>>, %arg24: memref<2x64x32xf32, #tpu.memory_space<vmem>>, %arg25: memref<2x1x32xf32, #tpu.memory_space<vmem>>, %arg26: memref<32x4xf32, #tpu.memory_space<vmem>>, %arg27: memref<1x4xf32, #tpu.memory_space<vmem>>, %arg28: memref<1x8x4xf32, #tpu.memory_space<vmem>>) attributes {dimension_semantics = [#tpu.dimension_semantics<parallel>], iteration_bounds = array<i64: 2>, scalar_prefetch = 0 : i64, scratch_operands = 0 : i64, tpu.core_type = #tpu.core_type<tc>, window_params = [{transform_indices = @transform_0, window_bounds = array<i64: 1, 8, 4>}, {transform_indices = @transform_1, window_bounds = array<i64: 1, 8, 4>}, {pipeline_mode = #tpu.pipeline_mode<synchronous>, transform_indices = @transform_2, window_bounds = array<i64: 8, 32>}, {pipeline_mode = #tpu.pipeline_mode<synchronous>, transform_indices = @transform_3, window_bounds = array<i64: 8, 32>}, {pipeline_mode = #tpu.pipeline_mode<synchronous>, transform_indices = @transform_4, window_bounds = array<i64: 4, 32>}, {pipeline_mode = #tpu.pipeline_mode<synchronous>, transform_indices = @transform_5, window_bounds = array<i64: 1, 32>}, {pipeline_mode = #tpu.pipeline_mode<synchronous>, transform_indices = @transform_6, window_bounds = array<i64: 4, 32>}, {pipeline_mode = #tpu.pipeline_mode<synchronous>, transform_indices = @transform_7, window_bounds = array<i64: 1, 32>}, {pipeline_mode = #tpu.pipeline_mode<synchronous>, transform_indices = @transform_8, window_bounds = array<i64: 2, 32, 96>}, {pipeline_mode = #tpu.pipeline_mode<synchronous>, transform_indices = @transform_9, window_bounds = array<i64: 2, 32, 32>}, {pipeline_mode = #tpu.pipeline_mode<synchronous>, transform_indices = @transform_10, window_bounds = array<i64: 2, 4, 32>}, {pipeline_mode = #tpu.pipeline_mode<synchronous>, transform_indices = @transform_11, window_bounds = array<i64: 2, 32, 64>}, {pipeline_mode = #tpu.pipeline_mode<synchronous>, transform_indices = @transform_12, window_bounds = array<i64: 2, 1, 64>}, {pipeline_mode = #tpu.pipeline_mode<synchronous>, transform_indices = @transform_13, window_bounds = array<i64: 2, 64, 32>}, {pipeline_mode = #tpu.pipeline_mode<synchronous>, transform_indices = @transform_14, window_bounds = array<i64: 2, 1, 32>}, {pipeline_mode = #tpu.pipeline_mode<synchronous>, transform_indices = @transform_15, window_bounds = array<i64: 2, 32, 96>}, {pipeline_mode = #tpu.pipeline_mode<synchronous>, transform_indices = @transform_16, window_bounds = array<i64: 2, 32, 32>}, {pipeline_mode = #tpu.pipeline_mode<synchronous>, transform_indices = @transform_17, window_bounds = array<i64: 2, 32, 32>}, {pipeline_mode = #tpu.pipeline_mode<synchronous>, transform_indices = @transform_18, window_bounds = array<i64: 2, 32, 64>}, {pipeline_mode = #tpu.pipeline_mode<synchronous>, transform_indices = @transform_19, window_bounds = array<i64: 2, 32, 32>}, {pipeline_mode = #tpu.pipeline_mode<synchronous>, transform_indices = @transform_20, window_bounds = array<i64: 2, 6, 32>}, {pipeline_mode = #tpu.pipeline_mode<synchronous>, transform_indices = @transform_21, window_bounds = array<i64: 2, 32, 64>}, {pipeline_mode = #tpu.pipeline_mode<synchronous>, transform_indices = @transform_22, window_bounds = array<i64: 2, 1, 64>}, {pipeline_mode = #tpu.pipeline_mode<synchronous>, transform_indices = @transform_23, window_bounds = array<i64: 2, 64, 32>}, {pipeline_mode = #tpu.pipeline_mode<synchronous>, transform_indices = @transform_24, window_bounds = array<i64: 2, 1, 32>}, {pipeline_mode = #tpu.pipeline_mode<synchronous>, transform_indices = @transform_25, window_bounds = array<i64: 32, 4>}, {pipeline_mode = #tpu.pipeline_mode<synchronous>, transform_indices = @transform_26, window_bounds = array<i64: 1, 4>}, {transform_indices = @transform_27, window_bounds = array<i64: 1, 8, 4>}]} {
    %0 = tpu.iota {dimensions = array<i32: 1>} : vector<8x8xi32>
    %c6_i32 = arith.constant 6 : i32
    %1 = vector.broadcast %c6_i32 : i32 to vector<8x8xi32>
    %2 = arith.cmpi sge, %0, %1 : vector<8x8xi32>
    %cst = arith.constant -1.000000e+30 : f32
    %cst_0 = arith.constant 0.000000e+00 : f32
    %3 = vector.broadcast %cst : f32 to vector<8x8xf32>
    %4 = vector.broadcast %cst_0 : f32 to vector<8x8xf32>
    %5 = arith.select %2, %3, %4 : vector<8x8xi1>, vector<8x8xf32>
    %c0 = arith.constant 0 : index
    %c0_1 = arith.constant 0 : index
    %c0_2 = arith.constant 0 : index
    %6 = vector.load %arg1[%c0, %c0_1, %c0_2] : memref<1x8x4xf32, #tpu.memory_space<vmem>>, vector<1x8x4xf32>
    %7 = vector.shape_cast %6 : vector<1x8x4xf32> to vector<8x4xf32>
    %c0_3 = arith.constant 0 : index
    %c0_4 = arith.constant 0 : index
    %c0_5 = arith.constant 0 : index
    %8 = vector.load %arg2[%c0_3, %c0_4, %c0_5] : memref<1x8x4xf32, #tpu.memory_space<vmem>>, vector<1x8x4xf32>
    %9 = vector.shape_cast %8 : vector<1x8x4xf32> to vector<8x4xf32>
    %c0_6 = arith.constant 0 : index
    %c0_7 = arith.constant 0 : index
    %10 = vector.load %arg5[%c0_6, %c0_7] : memref<4x32xf32, #tpu.memory_space<vmem>>, vector<4x32xf32>
    %cst_8 = arith.constant dense<0.000000e+00> : vector<8x32xf32>
    %11 = tpu.matmul %7, %10, %cst_8 {dimension_numbers = #tpu.dot_dimension_numbers<[1], [0], [0], [1], [0, 0, 1, 1], [], []>} : vector<8x4xf32>, vector<4x32xf32>, vector<8x32xf32> -> vector<8x32xf32>
    %c0_9 = arith.constant 0 : index
    %c0_10 = arith.constant 0 : index
    %12 = vector.load %arg6[%c0_9, %c0_10] : memref<1x32xf32, #tpu.memory_space<vmem>>, vector<1x32xf32>
    %13 = vector.broadcast %12 : vector<1x32xf32> to vector<8x32xf32>
    %14 = arith.addf %11, %13 : vector<8x32xf32>
    %c0_11 = arith.constant 0 : index
    %c0_12 = arith.constant 0 : index
    %15 = vector.load %arg3[%c0_11, %c0_12] : memref<8x32xf32, #tpu.memory_space<vmem>>, vector<8x32xf32>
    %16 = arith.addf %14, %15 : vector<8x32xf32>
    %c0_13 = arith.constant 0 : index
    %c0_14 = arith.constant 0 : index
    %17 = vector.load %arg7[%c0_13, %c0_14] : memref<4x32xf32, #tpu.memory_space<vmem>>, vector<4x32xf32>
    %cst_15 = arith.constant dense<0.000000e+00> : vector<8x32xf32>
    %18 = tpu.matmul %9, %17, %cst_15 {dimension_numbers = #tpu.dot_dimension_numbers<[1], [0], [0], [1], [0, 0, 1, 1], [], []>} : vector<8x4xf32>, vector<4x32xf32>, vector<8x32xf32> -> vector<8x32xf32>
    %c0_16 = arith.constant 0 : index
    %c0_17 = arith.constant 0 : index
    %19 = vector.load %arg8[%c0_16, %c0_17] : memref<1x32xf32, #tpu.memory_space<vmem>>, vector<1x32xf32>
    %20 = vector.broadcast %19 : vector<1x32xf32> to vector<8x32xf32>
    %21 = arith.addf %18, %20 : vector<8x32xf32>
    %c0_18 = arith.constant 0 : index
    %c0_19 = arith.constant 0 : index
    %22 = vector.load %arg4[%c0_18, %c0_19] : memref<8x32xf32, #tpu.memory_space<vmem>>, vector<8x32xf32>
    %23 = arith.addf %21, %22 : vector<8x32xf32>
    %c0_20 = arith.constant 0 : index
    %c0_21 = arith.constant 0 : index
    %c0_22 = arith.constant 0 : index
    %24 = vector.load %arg11[%c0_20, %c0_21, %c0_22] : memref<2x4x32xf32, #tpu.memory_space<vmem>>, vector<1x4x32xf32>
    %25 = vector.shape_cast %24 : vector<1x4x32xf32> to vector<4x32xf32>
    %c0_23 = arith.constant 0 : index
    %c0_24 = arith.constant 0 : index
    %c0_25 = arith.constant 0 : index
    %26 = vector.load %arg9[%c0_23, %c0_24, %c0_25] : memref<2x32x96xf32, #tpu.memory_space<vmem>>, vector<1x32x96xf32>
    %27 = vector.shape_cast %26 : vector<1x32x96xf32> to vector<32x96xf32>
    %c0_26 = arith.constant 0 : index
    %c0_27 = arith.constant 0 : index
    %c0_28 = arith.constant 0 : index
    %28 = vector.load %arg10[%c0_26, %c0_27, %c0_28] : memref<2x32x32xf32, #tpu.memory_space<vmem>>, vector<1x32x32xf32>
    %29 = vector.shape_cast %28 : vector<1x32x32xf32> to vector<32x32xf32>
    %cst_29 = arith.constant dense<0.000000e+00> : vector<8x96xf32>
    %30 = tpu.matmul %16, %27, %cst_29 {dimension_numbers = #tpu.dot_dimension_numbers<[1], [0], [0], [1], [0, 0, 1, 1], [], []>} : vector<8x32xf32>, vector<32x96xf32>, vector<8x96xf32> -> vector<8x96xf32>
    %31 = vector.extract_strided_slice %30 {offsets = [0, 0], sizes = [8, 32], strides = [1, 1]} : vector<8x96xf32> to vector<8x32xf32>
    %cst_30 = arith.constant 0.353553385 : f32
    %32 = vector.broadcast %cst_30 : f32 to vector<8x32xf32>
    %33 = arith.mulf %31, %32 : vector<8x32xf32>
    %34 = vector.extract_strided_slice %30 {offsets = [0, 32], sizes = [8, 32], strides = [1, 1]} : vector<8x96xf32> to vector<8x32xf32>
    %35 = vector.extract_strided_slice %30 {offsets = [0, 64], sizes = [8, 32], strides = [1, 1]} : vector<8x96xf32> to vector<8x32xf32>
    %cst_31 = arith.constant 0.000000e+00 : f32
    %36 = vector.broadcast %cst_31 : f32 to vector<8x32xf32>
    %37 = vector.extract_strided_slice %33 {offsets = [0, 0], sizes = [8, 8], strides = [1, 1]} : vector<8x32xf32> to vector<8x8xf32>
    %38 = vector.extract_strided_slice %34 {offsets = [0, 0], sizes = [8, 8], strides = [1, 1]} : vector<8x32xf32> to vector<8x8xf32>
    %cst_32 = arith.constant dense<0.000000e+00> : vector<8x8xf32>
    %39 = tpu.matmul %37, %38, %cst_32 {dimension_numbers = #tpu.dot_dimension_numbers<[1], [1], [0], [0], [0, 0, 1, 0], [], []>} : vector<8x8xf32>, vector<8x8xf32>, vector<8x8xf32> -> vector<8x8xf32>
    %cst_33 = arith.constant dense<0xFF800000> : vector<8xf32>
    %40 = vector.multi_reduction <maximumf>, %39, %cst_33 [1] : vector<8x8xf32> to vector<8xf32>
    %41 = vector.shape_cast %40 : vector<8xf32> to vector<8x1xf32>
    %42 = vector.broadcast %41 : vector<8x1xf32> to vector<8x8xf32>
    %43 = arith.subf %39, %42 : vector<8x8xf32>
    %44 = math.exp %43 : vector<8x8xf32>
    %cst_34 = arith.constant dense<0.000000e+00> : vector<8xf32>
    %45 = vector.multi_reduction <add>, %44, %cst_34 [1] : vector<8x8xf32> to vector<8xf32>
    %46 = vector.shape_cast %45 : vector<8xf32> to vector<8x1xf32>
    %47 = tpu.reciprocal %46 {approx = true} : vector<8x1xf32> -> vector<8x1xf32>
    %48 = vector.broadcast %47 : vector<8x1xf32> to vector<8x8xf32>
    %49 = arith.mulf %44, %48 : vector<8x8xf32>
    %50 = vector.extract_strided_slice %35 {offsets = [0, 0], sizes = [8, 8], strides = [1, 1]} : vector<8x32xf32> to vector<8x8xf32>
    %cst_35 = arith.constant dense<0.000000e+00> : vector<8x8xf32>
    %51 = tpu.matmul %49, %50, %cst_35 {dimension_numbers = #tpu.dot_dimension_numbers<[1], [0], [0], [1], [0, 0, 1, 1], [], []>} : vector<8x8xf32>, vector<8x8xf32>, vector<8x8xf32> -> vector<8x8xf32>
    %52 = vector.extract_strided_slice %29 {offsets = [0, 0], sizes = [8, 32], strides = [1, 1]} : vector<32x32xf32> to vector<8x32xf32>
    %cst_36 = arith.constant dense<0.000000e+00> : vector<8x32xf32>
    %53 = tpu.matmul %51, %52, %cst_36 {dimension_numbers = #tpu.dot_dimension_numbers<[1], [0], [0], [1], [0, 0, 1, 1], [], []>} : vector<8x8xf32>, vector<8x32xf32>, vector<8x32xf32> -> vector<8x32xf32>
    %54 = arith.addf %36, %53 : vector<8x32xf32>
    %55 = vector.extract_strided_slice %33 {offsets = [0, 8], sizes = [8, 8], strides = [1, 1]} : vector<8x32xf32> to vector<8x8xf32>
    %56 = vector.extract_strided_slice %34 {offsets = [0, 8], sizes = [8, 8], strides = [1, 1]} : vector<8x32xf32> to vector<8x8xf32>
    %cst_37 = arith.constant dense<0.000000e+00> : vector<8x8xf32>
    %57 = tpu.matmul %55, %56, %cst_37 {dimension_numbers = #tpu.dot_dimension_numbers<[1], [1], [0], [0], [0, 0, 1, 0], [], []>} : vector<8x8xf32>, vector<8x8xf32>, vector<8x8xf32> -> vector<8x8xf32>
    %cst_38 = arith.constant dense<0xFF800000> : vector<8xf32>
    %58 = vector.multi_reduction <maximumf>, %57, %cst_38 [1] : vector<8x8xf32> to vector<8xf32>
    %59 = vector.shape_cast %58 : vector<8xf32> to vector<8x1xf32>
    %60 = vector.broadcast %59 : vector<8x1xf32> to vector<8x8xf32>
    %61 = arith.subf %57, %60 : vector<8x8xf32>
    %62 = math.exp %61 : vector<8x8xf32>
    %cst_39 = arith.constant dense<0.000000e+00> : vector<8xf32>
    %63 = vector.multi_reduction <add>, %62, %cst_39 [1] : vector<8x8xf32> to vector<8xf32>
    %64 = vector.shape_cast %63 : vector<8xf32> to vector<8x1xf32>
    %65 = tpu.reciprocal %64 {approx = true} : vector<8x1xf32> -> vector<8x1xf32>
    %66 = vector.broadcast %65 : vector<8x1xf32> to vector<8x8xf32>
    %67 = arith.mulf %62, %66 : vector<8x8xf32>
    %68 = vector.extract_strided_slice %35 {offsets = [0, 8], sizes = [8, 8], strides = [1, 1]} : vector<8x32xf32> to vector<8x8xf32>
    %cst_40 = arith.constant dense<0.000000e+00> : vector<8x8xf32>
    %69 = tpu.matmul %67, %68, %cst_40 {dimension_numbers = #tpu.dot_dimension_numbers<[1], [0], [0], [1], [0, 0, 1, 1], [], []>} : vector<8x8xf32>, vector<8x8xf32>, vector<8x8xf32> -> vector<8x8xf32>
    %70 = vector.extract_strided_slice %29 {offsets = [8, 0], sizes = [8, 32], strides = [1, 1]} : vector<32x32xf32> to vector<8x32xf32>
    %cst_41 = arith.constant dense<0.000000e+00> : vector<8x32xf32>
    %71 = tpu.matmul %69, %70, %cst_41 {dimension_numbers = #tpu.dot_dimension_numbers<[1], [0], [0], [1], [0, 0, 1, 1], [], []>} : vector<8x8xf32>, vector<8x32xf32>, vector<8x32xf32> -> vector<8x32xf32>
    %72 = arith.addf %54, %71 : vector<8x32xf32>
    %73 = vector.extract_strided_slice %33 {offsets = [0, 16], sizes = [8, 8], strides = [1, 1]} : vector<8x32xf32> to vector<8x8xf32>
    %74 = vector.extract_strided_slice %34 {offsets = [0, 16], sizes = [8, 8], strides = [1, 1]} : vector<8x32xf32> to vector<8x8xf32>
    %cst_42 = arith.constant dense<0.000000e+00> : vector<8x8xf32>
    %75 = tpu.matmul %73, %74, %cst_42 {dimension_numbers = #tpu.dot_dimension_numbers<[1], [1], [0], [0], [0, 0, 1, 0], [], []>} : vector<8x8xf32>, vector<8x8xf32>, vector<8x8xf32> -> vector<8x8xf32>
    %cst_43 = arith.constant dense<0xFF800000> : vector<8xf32>
    %76 = vector.multi_reduction <maximumf>, %75, %cst_43 [1] : vector<8x8xf32> to vector<8xf32>
    %77 = vector.shape_cast %76 : vector<8xf32> to vector<8x1xf32>
    %78 = vector.broadcast %77 : vector<8x1xf32> to vector<8x8xf32>
    %79 = arith.subf %75, %78 : vector<8x8xf32>
    %80 = math.exp %79 : vector<8x8xf32>
    %cst_44 = arith.constant dense<0.000000e+00> : vector<8xf32>
    %81 = vector.multi_reduction <add>, %80, %cst_44 [1] : vector<8x8xf32> to vector<8xf32>
    %82 = vector.shape_cast %81 : vector<8xf32> to vector<8x1xf32>
    %83 = tpu.reciprocal %82 {approx = true} : vector<8x1xf32> -> vector<8x1xf32>
    %84 = vector.broadcast %83 : vector<8x1xf32> to vector<8x8xf32>
    %85 = arith.mulf %80, %84 : vector<8x8xf32>
    %86 = vector.extract_strided_slice %35 {offsets = [0, 16], sizes = [8, 8], strides = [1, 1]} : vector<8x32xf32> to vector<8x8xf32>
    %cst_45 = arith.constant dense<0.000000e+00> : vector<8x8xf32>
    %87 = tpu.matmul %85, %86, %cst_45 {dimension_numbers = #tpu.dot_dimension_numbers<[1], [0], [0], [1], [0, 0, 1, 1], [], []>} : vector<8x8xf32>, vector<8x8xf32>, vector<8x8xf32> -> vector<8x8xf32>
    %88 = vector.extract_strided_slice %29 {offsets = [16, 0], sizes = [8, 32], strides = [1, 1]} : vector<32x32xf32> to vector<8x32xf32>
    %cst_46 = arith.constant dense<0.000000e+00> : vector<8x32xf32>
    %89 = tpu.matmul %87, %88, %cst_46 {dimension_numbers = #tpu.dot_dimension_numbers<[1], [0], [0], [1], [0, 0, 1, 1], [], []>} : vector<8x8xf32>, vector<8x32xf32>, vector<8x32xf32> -> vector<8x32xf32>
    %90 = arith.addf %72, %89 : vector<8x32xf32>
    %91 = vector.extract_strided_slice %33 {offsets = [0, 24], sizes = [8, 8], strides = [1, 1]} : vector<8x32xf32> to vector<8x8xf32>
    %92 = vector.extract_strided_slice %34 {offsets = [0, 24], sizes = [8, 8], strides = [1, 1]} : vector<8x32xf32> to vector<8x8xf32>
    %cst_47 = arith.constant dense<0.000000e+00> : vector<8x8xf32>
    %93 = tpu.matmul %91, %92, %cst_47 {dimension_numbers = #tpu.dot_dimension_numbers<[1], [1], [0], [0], [0, 0, 1, 0], [], []>} : vector<8x8xf32>, vector<8x8xf32>, vector<8x8xf32> -> vector<8x8xf32>
    %cst_48 = arith.constant dense<0xFF800000> : vector<8xf32>
    %94 = vector.multi_reduction <maximumf>, %93, %cst_48 [1] : vector<8x8xf32> to vector<8xf32>
    %95 = vector.shape_cast %94 : vector<8xf32> to vector<8x1xf32>
    %96 = vector.broadcast %95 : vector<8x1xf32> to vector<8x8xf32>
    %97 = arith.subf %93, %96 : vector<8x8xf32>
    %98 = math.exp %97 : vector<8x8xf32>
    %cst_49 = arith.constant dense<0.000000e+00> : vector<8xf32>
    %99 = vector.multi_reduction <add>, %98, %cst_49 [1] : vector<8x8xf32> to vector<8xf32>
    %100 = vector.shape_cast %99 : vector<8xf32> to vector<8x1xf32>
    %101 = tpu.reciprocal %100 {approx = true} : vector<8x1xf32> -> vector<8x1xf32>
    %102 = vector.broadcast %101 : vector<8x1xf32> to vector<8x8xf32>
    %103 = arith.mulf %98, %102 : vector<8x8xf32>
    %104 = vector.extract_strided_slice %35 {offsets = [0, 24], sizes = [8, 8], strides = [1, 1]} : vector<8x32xf32> to vector<8x8xf32>
    %cst_50 = arith.constant dense<0.000000e+00> : vector<8x8xf32>
    %105 = tpu.matmul %103, %104, %cst_50 {dimension_numbers = #tpu.dot_dimension_numbers<[1], [0], [0], [1], [0, 0, 1, 1], [], []>} : vector<8x8xf32>, vector<8x8xf32>, vector<8x8xf32> -> vector<8x8xf32>
    %106 = vector.extract_strided_slice %29 {offsets = [24, 0], sizes = [8, 32], strides = [1, 1]} : vector<32x32xf32> to vector<8x32xf32>
    %cst_51 = arith.constant dense<0.000000e+00> : vector<8x32xf32>
    %107 = tpu.matmul %105, %106, %cst_51 {dimension_numbers = #tpu.dot_dimension_numbers<[1], [0], [0], [1], [0, 0, 1, 1], [], []>} : vector<8x8xf32>, vector<8x32xf32>, vector<8x32xf32> -> vector<8x32xf32>
    %108 = arith.addf %90, %107 : vector<8x32xf32>
    %109 = arith.addf %108, %16 : vector<8x32xf32>
    %110 = vector.extract_strided_slice %25 {offsets = [0, 0], sizes = [1, 32], strides = [1, 1]} : vector<4x32xf32> to vector<1x32xf32>
    %111 = vector.extract_strided_slice %25 {offsets = [1, 0], sizes = [1, 32], strides = [1, 1]} : vector<4x32xf32> to vector<1x32xf32>
    %cst_52 = arith.constant dense<0.000000e+00> : vector<8xf32>
    %112 = vector.multi_reduction <add>, %109, %cst_52 [1] : vector<8x32xf32> to vector<8xf32>
    %113 = vector.shape_cast %112 : vector<8xf32> to vector<8x1xf32>
    %cst_53 = arith.constant 3.200000e+01 : f32
    %114 = vector.broadcast %cst_53 : f32 to vector<8x1xf32>
    %115 = arith.divf %113, %114 : vector<8x1xf32>
    %116 = arith.mulf %109, %109 : vector<8x32xf32>
    %cst_54 = arith.constant dense<0.000000e+00> : vector<8xf32>
    %117 = vector.multi_reduction <add>, %116, %cst_54 [1] : vector<8x32xf32> to vector<8xf32>
    %118 = vector.shape_cast %117 : vector<8xf32> to vector<8x1xf32>
    %cst_55 = arith.constant 3.200000e+01 : f32
    %119 = vector.broadcast %cst_55 : f32 to vector<8x1xf32>
    %120 = arith.divf %118, %119 : vector<8x1xf32>
    %121 = arith.mulf %115, %115 : vector<8x1xf32>
    %122 = arith.subf %120, %121 : vector<8x1xf32>
    %123 = vector.broadcast %115 : vector<8x1xf32> to vector<8x32xf32>
    %124 = arith.subf %109, %123 : vector<8x32xf32>
    %cst_56 = arith.constant 9.99999974E-6 : f32
    %125 = vector.broadcast %cst_56 : f32 to vector<8x1xf32>
    %126 = arith.addf %122, %125 : vector<8x1xf32>
    %127 = math.rsqrt %126 : vector<8x1xf32>
    %128 = vector.broadcast %127 : vector<8x1xf32> to vector<8x32xf32>
    %129 = arith.mulf %124, %128 : vector<8x32xf32>
    %130 = vector.broadcast %110 : vector<1x32xf32> to vector<8x32xf32>
    %131 = arith.mulf %129, %130 : vector<8x32xf32>
    %132 = vector.broadcast %111 : vector<1x32xf32> to vector<8x32xf32>
    %133 = arith.addf %131, %132 : vector<8x32xf32>
    %c0_57 = arith.constant 0 : index
    %c0_58 = arith.constant 0 : index
    %c0_59 = arith.constant 0 : index
    %134 = vector.load %arg12[%c0_57, %c0_58, %c0_59] : memref<2x32x64xf32, #tpu.memory_space<vmem>>, vector<1x32x64xf32>
    %135 = vector.shape_cast %134 : vector<1x32x64xf32> to vector<32x64xf32>
    %c0_60 = arith.constant 0 : index
    %c0_61 = arith.constant 0 : index
    %c0_62 = arith.constant 0 : index
    %136 = vector.load %arg13[%c0_60, %c0_61, %c0_62] : memref<2x1x64xf32, #tpu.memory_space<vmem>>, vector<1x1x64xf32>
    %137 = vector.shape_cast %136 : vector<1x1x64xf32> to vector<1x64xf32>
    %c0_63 = arith.constant 0 : index
    %c0_64 = arith.constant 0 : index
    %c0_65 = arith.constant 0 : index
    %138 = vector.load %arg14[%c0_63, %c0_64, %c0_65] : memref<2x64x32xf32, #tpu.memory_space<vmem>>, vector<1x64x32xf32>
    %139 = vector.shape_cast %138 : vector<1x64x32xf32> to vector<64x32xf32>
    %c0_66 = arith.constant 0 : index
    %c0_67 = arith.constant 0 : index
    %c0_68 = arith.constant 0 : index
    %140 = vector.load %arg15[%c0_66, %c0_67, %c0_68] : memref<2x1x32xf32, #tpu.memory_space<vmem>>, vector<1x1x32xf32>
    %141 = vector.shape_cast %140 : vector<1x1x32xf32> to vector<1x32xf32>
    %cst_69 = arith.constant dense<0.000000e+00> : vector<8x64xf32>
    %142 = tpu.matmul %133, %135, %cst_69 {dimension_numbers = #tpu.dot_dimension_numbers<[1], [0], [0], [1], [0, 0, 1, 1], [], []>} : vector<8x32xf32>, vector<32x64xf32>, vector<8x64xf32> -> vector<8x64xf32>
    %143 = vector.broadcast %137 : vector<1x64xf32> to vector<8x64xf32>
    %144 = arith.addf %142, %143 : vector<8x64xf32>
    %cst_70 = arith.constant 0.000000e+00 : f32
    %145 = vector.broadcast %cst_70 : f32 to vector<8x64xf32>
    %146 = arith.maximumf %144, %145 : vector<8x64xf32>
    %cst_71 = arith.constant dense<0.000000e+00> : vector<8x32xf32>
    %147 = tpu.matmul %146, %139, %cst_71 {dimension_numbers = #tpu.dot_dimension_numbers<[1], [0], [0], [1], [0, 0, 1, 1], [], []>} : vector<8x64xf32>, vector<64x32xf32>, vector<8x32xf32> -> vector<8x32xf32>
    %148 = vector.broadcast %141 : vector<1x32xf32> to vector<8x32xf32>
    %149 = arith.addf %147, %148 : vector<8x32xf32>
    %150 = arith.addf %149, %133 : vector<8x32xf32>
    %151 = vector.extract_strided_slice %25 {offsets = [2, 0], sizes = [1, 32], strides = [1, 1]} : vector<4x32xf32> to vector<1x32xf32>
    %152 = vector.extract_strided_slice %25 {offsets = [3, 0], sizes = [1, 32], strides = [1, 1]} : vector<4x32xf32> to vector<1x32xf32>
    %cst_72 = arith.constant dense<0.000000e+00> : vector<8xf32>
    %153 = vector.multi_reduction <add>, %150, %cst_72 [1] : vector<8x32xf32> to vector<8xf32>
    %154 = vector.shape_cast %153 : vector<8xf32> to vector<8x1xf32>
    %cst_73 = arith.constant 3.200000e+01 : f32
    %155 = vector.broadcast %cst_73 : f32 to vector<8x1xf32>
    %156 = arith.divf %154, %155 : vector<8x1xf32>
    %157 = arith.mulf %150, %150 : vector<8x32xf32>
    %cst_74 = arith.constant dense<0.000000e+00> : vector<8xf32>
    %158 = vector.multi_reduction <add>, %157, %cst_74 [1] : vector<8x32xf32> to vector<8xf32>
    %159 = vector.shape_cast %158 : vector<8xf32> to vector<8x1xf32>
    %cst_75 = arith.constant 3.200000e+01 : f32
    %160 = vector.broadcast %cst_75 : f32 to vector<8x1xf32>
    %161 = arith.divf %159, %160 : vector<8x1xf32>
    %162 = arith.mulf %156, %156 : vector<8x1xf32>
    %163 = arith.subf %161, %162 : vector<8x1xf32>
    %164 = vector.broadcast %156 : vector<8x1xf32> to vector<8x32xf32>
    %165 = arith.subf %150, %164 : vector<8x32xf32>
    %cst_76 = arith.constant 9.99999974E-6 : f32
    %166 = vector.broadcast %cst_76 : f32 to vector<8x1xf32>
    %167 = arith.addf %163, %166 : vector<8x1xf32>
    %168 = math.rsqrt %167 : vector<8x1xf32>
    %169 = vector.broadcast %168 : vector<8x1xf32> to vector<8x32xf32>
    %170 = arith.mulf %165, %169 : vector<8x32xf32>
    %171 = vector.broadcast %151 : vector<1x32xf32> to vector<8x32xf32>
    %172 = arith.mulf %170, %171 : vector<8x32xf32>
    %173 = vector.broadcast %152 : vector<1x32xf32> to vector<8x32xf32>
    %174 = arith.addf %172, %173 : vector<8x32xf32>
    %c1 = arith.constant 1 : index
    %c0_77 = arith.constant 0 : index
    %c0_78 = arith.constant 0 : index
    %175 = vector.load %arg11[%c1, %c0_77, %c0_78] : memref<2x4x32xf32, #tpu.memory_space<vmem>>, vector<1x4x32xf32>
    %176 = vector.shape_cast %175 : vector<1x4x32xf32> to vector<4x32xf32>
    %c1_79 = arith.constant 1 : index
    %c0_80 = arith.constant 0 : index
    %c0_81 = arith.constant 0 : index
    %177 = vector.load %arg9[%c1_79, %c0_80, %c0_81] : memref<2x32x96xf32, #tpu.memory_space<vmem>>, vector<1x32x96xf32>
    %178 = vector.shape_cast %177 : vector<1x32x96xf32> to vector<32x96xf32>
    %c1_82 = arith.constant 1 : index
    %c0_83 = arith.constant 0 : index
    %c0_84 = arith.constant 0 : index
    %179 = vector.load %arg10[%c1_82, %c0_83, %c0_84] : memref<2x32x32xf32, #tpu.memory_space<vmem>>, vector<1x32x32xf32>
    %180 = vector.shape_cast %179 : vector<1x32x32xf32> to vector<32x32xf32>
    %cst_85 = arith.constant dense<0.000000e+00> : vector<8x96xf32>
    %181 = tpu.matmul %174, %178, %cst_85 {dimension_numbers = #tpu.dot_dimension_numbers<[1], [0], [0], [1], [0, 0, 1, 1], [], []>} : vector<8x32xf32>, vector<32x96xf32>, vector<8x96xf32> -> vector<8x96xf32>
    %182 = vector.extract_strided_slice %181 {offsets = [0, 0], sizes = [8, 32], strides = [1, 1]} : vector<8x96xf32> to vector<8x32xf32>
    %cst_86 = arith.constant 0.353553385 : f32
    %183 = vector.broadcast %cst_86 : f32 to vector<8x32xf32>
    %184 = arith.mulf %182, %183 : vector<8x32xf32>
    %185 = vector.extract_strided_slice %181 {offsets = [0, 32], sizes = [8, 32], strides = [1, 1]} : vector<8x96xf32> to vector<8x32xf32>
    %186 = vector.extract_strided_slice %181 {offsets = [0, 64], sizes = [8, 32], strides = [1, 1]} : vector<8x96xf32> to vector<8x32xf32>
    %cst_87 = arith.constant 0.000000e+00 : f32
    %187 = vector.broadcast %cst_87 : f32 to vector<8x32xf32>
    %188 = vector.extract_strided_slice %184 {offsets = [0, 0], sizes = [8, 8], strides = [1, 1]} : vector<8x32xf32> to vector<8x8xf32>
    %189 = vector.extract_strided_slice %185 {offsets = [0, 0], sizes = [8, 8], strides = [1, 1]} : vector<8x32xf32> to vector<8x8xf32>
    %cst_88 = arith.constant dense<0.000000e+00> : vector<8x8xf32>
    %190 = tpu.matmul %188, %189, %cst_88 {dimension_numbers = #tpu.dot_dimension_numbers<[1], [1], [0], [0], [0, 0, 1, 0], [], []>} : vector<8x8xf32>, vector<8x8xf32>, vector<8x8xf32> -> vector<8x8xf32>
    %cst_89 = arith.constant dense<0xFF800000> : vector<8xf32>
    %191 = vector.multi_reduction <maximumf>, %190, %cst_89 [1] : vector<8x8xf32> to vector<8xf32>
    %192 = vector.shape_cast %191 : vector<8xf32> to vector<8x1xf32>
    %193 = vector.broadcast %192 : vector<8x1xf32> to vector<8x8xf32>
    %194 = arith.subf %190, %193 : vector<8x8xf32>
    %195 = math.exp %194 : vector<8x8xf32>
    %cst_90 = arith.constant dense<0.000000e+00> : vector<8xf32>
    %196 = vector.multi_reduction <add>, %195, %cst_90 [1] : vector<8x8xf32> to vector<8xf32>
    %197 = vector.shape_cast %196 : vector<8xf32> to vector<8x1xf32>
    %198 = tpu.reciprocal %197 {approx = true} : vector<8x1xf32> -> vector<8x1xf32>
    %199 = vector.broadcast %198 : vector<8x1xf32> to vector<8x8xf32>
    %200 = arith.mulf %195, %199 : vector<8x8xf32>
    %201 = vector.extract_strided_slice %186 {offsets = [0, 0], sizes = [8, 8], strides = [1, 1]} : vector<8x32xf32> to vector<8x8xf32>
    %cst_91 = arith.constant dense<0.000000e+00> : vector<8x8xf32>
    %202 = tpu.matmul %200, %201, %cst_91 {dimension_numbers = #tpu.dot_dimension_numbers<[1], [0], [0], [1], [0, 0, 1, 1], [], []>} : vector<8x8xf32>, vector<8x8xf32>, vector<8x8xf32> -> vector<8x8xf32>
    %203 = vector.extract_strided_slice %180 {offsets = [0, 0], sizes = [8, 32], strides = [1, 1]} : vector<32x32xf32> to vector<8x32xf32>
    %cst_92 = arith.constant dense<0.000000e+00> : vector<8x32xf32>
    %204 = tpu.matmul %202, %203, %cst_92 {dimension_numbers = #tpu.dot_dimension_numbers<[1], [0], [0], [1], [0, 0, 1, 1], [], []>} : vector<8x8xf32>, vector<8x32xf32>, vector<8x32xf32> -> vector<8x32xf32>
    %205 = arith.addf %187, %204 : vector<8x32xf32>
    %206 = vector.extract_strided_slice %184 {offsets = [0, 8], sizes = [8, 8], strides = [1, 1]} : vector<8x32xf32> to vector<8x8xf32>
    %207 = vector.extract_strided_slice %185 {offsets = [0, 8], sizes = [8, 8], strides = [1, 1]} : vector<8x32xf32> to vector<8x8xf32>
    %cst_93 = arith.constant dense<0.000000e+00> : vector<8x8xf32>
    %208 = tpu.matmul %206, %207, %cst_93 {dimension_numbers = #tpu.dot_dimension_numbers<[1], [1], [0], [0], [0, 0, 1, 0], [], []>} : vector<8x8xf32>, vector<8x8xf32>, vector<8x8xf32> -> vector<8x8xf32>
    %cst_94 = arith.constant dense<0xFF800000> : vector<8xf32>
    %209 = vector.multi_reduction <maximumf>, %208, %cst_94 [1] : vector<8x8xf32> to vector<8xf32>
    %210 = vector.shape_cast %209 : vector<8xf32> to vector<8x1xf32>
    %211 = vector.broadcast %210 : vector<8x1xf32> to vector<8x8xf32>
    %212 = arith.subf %208, %211 : vector<8x8xf32>
    %213 = math.exp %212 : vector<8x8xf32>
    %cst_95 = arith.constant dense<0.000000e+00> : vector<8xf32>
    %214 = vector.multi_reduction <add>, %213, %cst_95 [1] : vector<8x8xf32> to vector<8xf32>
    %215 = vector.shape_cast %214 : vector<8xf32> to vector<8x1xf32>
    %216 = tpu.reciprocal %215 {approx = true} : vector<8x1xf32> -> vector<8x1xf32>
    %217 = vector.broadcast %216 : vector<8x1xf32> to vector<8x8xf32>
    %218 = arith.mulf %213, %217 : vector<8x8xf32>
    %219 = vector.extract_strided_slice %186 {offsets = [0, 8], sizes = [8, 8], strides = [1, 1]} : vector<8x32xf32> to vector<8x8xf32>
    %cst_96 = arith.constant dense<0.000000e+00> : vector<8x8xf32>
    %220 = tpu.matmul %218, %219, %cst_96 {dimension_numbers = #tpu.dot_dimension_numbers<[1], [0], [0], [1], [0, 0, 1, 1], [], []>} : vector<8x8xf32>, vector<8x8xf32>, vector<8x8xf32> -> vector<8x8xf32>
    %221 = vector.extract_strided_slice %180 {offsets = [8, 0], sizes = [8, 32], strides = [1, 1]} : vector<32x32xf32> to vector<8x32xf32>
    %cst_97 = arith.constant dense<0.000000e+00> : vector<8x32xf32>
    %222 = tpu.matmul %220, %221, %cst_97 {dimension_numbers = #tpu.dot_dimension_numbers<[1], [0], [0], [1], [0, 0, 1, 1], [], []>} : vector<8x8xf32>, vector<8x32xf32>, vector<8x32xf32> -> vector<8x32xf32>
    %223 = arith.addf %205, %222 : vector<8x32xf32>
    %224 = vector.extract_strided_slice %184 {offsets = [0, 16], sizes = [8, 8], strides = [1, 1]} : vector<8x32xf32> to vector<8x8xf32>
    %225 = vector.extract_strided_slice %185 {offsets = [0, 16], sizes = [8, 8], strides = [1, 1]} : vector<8x32xf32> to vector<8x8xf32>
    %cst_98 = arith.constant dense<0.000000e+00> : vector<8x8xf32>
    %226 = tpu.matmul %224, %225, %cst_98 {dimension_numbers = #tpu.dot_dimension_numbers<[1], [1], [0], [0], [0, 0, 1, 0], [], []>} : vector<8x8xf32>, vector<8x8xf32>, vector<8x8xf32> -> vector<8x8xf32>
    %cst_99 = arith.constant dense<0xFF800000> : vector<8xf32>
    %227 = vector.multi_reduction <maximumf>, %226, %cst_99 [1] : vector<8x8xf32> to vector<8xf32>
    %228 = vector.shape_cast %227 : vector<8xf32> to vector<8x1xf32>
    %229 = vector.broadcast %228 : vector<8x1xf32> to vector<8x8xf32>
    %230 = arith.subf %226, %229 : vector<8x8xf32>
    %231 = math.exp %230 : vector<8x8xf32>
    %cst_100 = arith.constant dense<0.000000e+00> : vector<8xf32>
    %232 = vector.multi_reduction <add>, %231, %cst_100 [1] : vector<8x8xf32> to vector<8xf32>
    %233 = vector.shape_cast %232 : vector<8xf32> to vector<8x1xf32>
    %234 = tpu.reciprocal %233 {approx = true} : vector<8x1xf32> -> vector<8x1xf32>
    %235 = vector.broadcast %234 : vector<8x1xf32> to vector<8x8xf32>
    %236 = arith.mulf %231, %235 : vector<8x8xf32>
    %237 = vector.extract_strided_slice %186 {offsets = [0, 16], sizes = [8, 8], strides = [1, 1]} : vector<8x32xf32> to vector<8x8xf32>
    %cst_101 = arith.constant dense<0.000000e+00> : vector<8x8xf32>
    %238 = tpu.matmul %236, %237, %cst_101 {dimension_numbers = #tpu.dot_dimension_numbers<[1], [0], [0], [1], [0, 0, 1, 1], [], []>} : vector<8x8xf32>, vector<8x8xf32>, vector<8x8xf32> -> vector<8x8xf32>
    %239 = vector.extract_strided_slice %180 {offsets = [16, 0], sizes = [8, 32], strides = [1, 1]} : vector<32x32xf32> to vector<8x32xf32>
    %cst_102 = arith.constant dense<0.000000e+00> : vector<8x32xf32>
    %240 = tpu.matmul %238, %239, %cst_102 {dimension_numbers = #tpu.dot_dimension_numbers<[1], [0], [0], [1], [0, 0, 1, 1], [], []>} : vector<8x8xf32>, vector<8x32xf32>, vector<8x32xf32> -> vector<8x32xf32>
    %241 = arith.addf %223, %240 : vector<8x32xf32>
    %242 = vector.extract_strided_slice %184 {offsets = [0, 24], sizes = [8, 8], strides = [1, 1]} : vector<8x32xf32> to vector<8x8xf32>
    %243 = vector.extract_strided_slice %185 {offsets = [0, 24], sizes = [8, 8], strides = [1, 1]} : vector<8x32xf32> to vector<8x8xf32>
    %cst_103 = arith.constant dense<0.000000e+00> : vector<8x8xf32>
    %244 = tpu.matmul %242, %243, %cst_103 {dimension_numbers = #tpu.dot_dimension_numbers<[1], [1], [0], [0], [0, 0, 1, 0], [], []>} : vector<8x8xf32>, vector<8x8xf32>, vector<8x8xf32> -> vector<8x8xf32>
    %cst_104 = arith.constant dense<0xFF800000> : vector<8xf32>
    %245 = vector.multi_reduction <maximumf>, %244, %cst_104 [1] : vector<8x8xf32> to vector<8xf32>
    %246 = vector.shape_cast %245 : vector<8xf32> to vector<8x1xf32>
    %247 = vector.broadcast %246 : vector<8x1xf32> to vector<8x8xf32>
    %248 = arith.subf %244, %247 : vector<8x8xf32>
    %249 = math.exp %248 : vector<8x8xf32>
    %cst_105 = arith.constant dense<0.000000e+00> : vector<8xf32>
    %250 = vector.multi_reduction <add>, %249, %cst_105 [1] : vector<8x8xf32> to vector<8xf32>
    %251 = vector.shape_cast %250 : vector<8xf32> to vector<8x1xf32>
    %252 = tpu.reciprocal %251 {approx = true} : vector<8x1xf32> -> vector<8x1xf32>
    %253 = vector.broadcast %252 : vector<8x1xf32> to vector<8x8xf32>
    %254 = arith.mulf %249, %253 : vector<8x8xf32>
    %255 = vector.extract_strided_slice %186 {offsets = [0, 24], sizes = [8, 8], strides = [1, 1]} : vector<8x32xf32> to vector<8x8xf32>
    %cst_106 = arith.constant dense<0.000000e+00> : vector<8x8xf32>
    %256 = tpu.matmul %254, %255, %cst_106 {dimension_numbers = #tpu.dot_dimension_numbers<[1], [0], [0], [1], [0, 0, 1, 1], [], []>} : vector<8x8xf32>, vector<8x8xf32>, vector<8x8xf32> -> vector<8x8xf32>
    %257 = vector.extract_strided_slice %180 {offsets = [24, 0], sizes = [8, 32], strides = [1, 1]} : vector<32x32xf32> to vector<8x32xf32>
    %cst_107 = arith.constant dense<0.000000e+00> : vector<8x32xf32>
    %258 = tpu.matmul %256, %257, %cst_107 {dimension_numbers = #tpu.dot_dimension_numbers<[1], [0], [0], [1], [0, 0, 1, 1], [], []>} : vector<8x8xf32>, vector<8x32xf32>, vector<8x32xf32> -> vector<8x32xf32>
    %259 = arith.addf %241, %258 : vector<8x32xf32>
    %260 = arith.addf %259, %174 : vector<8x32xf32>
    %261 = vector.extract_strided_slice %176 {offsets = [0, 0], sizes = [1, 32], strides = [1, 1]} : vector<4x32xf32> to vector<1x32xf32>
    %262 = vector.extract_strided_slice %176 {offsets = [1, 0], sizes = [1, 32], strides = [1, 1]} : vector<4x32xf32> to vector<1x32xf32>
    %cst_108 = arith.constant dense<0.000000e+00> : vector<8xf32>
    %263 = vector.multi_reduction <add>, %260, %cst_108 [1] : vector<8x32xf32> to vector<8xf32>
    %264 = vector.shape_cast %263 : vector<8xf32> to vector<8x1xf32>
    %cst_109 = arith.constant 3.200000e+01 : f32
    %265 = vector.broadcast %cst_109 : f32 to vector<8x1xf32>
    %266 = arith.divf %264, %265 : vector<8x1xf32>
    %267 = arith.mulf %260, %260 : vector<8x32xf32>
    %cst_110 = arith.constant dense<0.000000e+00> : vector<8xf32>
    %268 = vector.multi_reduction <add>, %267, %cst_110 [1] : vector<8x32xf32> to vector<8xf32>
    %269 = vector.shape_cast %268 : vector<8xf32> to vector<8x1xf32>
    %cst_111 = arith.constant 3.200000e+01 : f32
    %270 = vector.broadcast %cst_111 : f32 to vector<8x1xf32>
    %271 = arith.divf %269, %270 : vector<8x1xf32>
    %272 = arith.mulf %266, %266 : vector<8x1xf32>
    %273 = arith.subf %271, %272 : vector<8x1xf32>
    %274 = vector.broadcast %266 : vector<8x1xf32> to vector<8x32xf32>
    %275 = arith.subf %260, %274 : vector<8x32xf32>
    %cst_112 = arith.constant 9.99999974E-6 : f32
    %276 = vector.broadcast %cst_112 : f32 to vector<8x1xf32>
    %277 = arith.addf %273, %276 : vector<8x1xf32>
    %278 = math.rsqrt %277 : vector<8x1xf32>
    %279 = vector.broadcast %278 : vector<8x1xf32> to vector<8x32xf32>
    %280 = arith.mulf %275, %279 : vector<8x32xf32>
    %281 = vector.broadcast %261 : vector<1x32xf32> to vector<8x32xf32>
    %282 = arith.mulf %280, %281 : vector<8x32xf32>
    %283 = vector.broadcast %262 : vector<1x32xf32> to vector<8x32xf32>
    %284 = arith.addf %282, %283 : vector<8x32xf32>
    %c1_113 = arith.constant 1 : index
    %c0_114 = arith.constant 0 : index
    %c0_115 = arith.constant 0 : index
    %285 = vector.load %arg12[%c1_113, %c0_114, %c0_115] : memref<2x32x64xf32, #tpu.memory_space<vmem>>, vector<1x32x64xf32>
    %286 = vector.shape_cast %285 : vector<1x32x64xf32> to vector<32x64xf32>
    %c1_116 = arith.constant 1 : index
    %c0_117 = arith.constant 0 : index
    %c0_118 = arith.constant 0 : index
    %287 = vector.load %arg13[%c1_116, %c0_117, %c0_118] : memref<2x1x64xf32, #tpu.memory_space<vmem>>, vector<1x1x64xf32>
    %288 = vector.shape_cast %287 : vector<1x1x64xf32> to vector<1x64xf32>
    %c1_119 = arith.constant 1 : index
    %c0_120 = arith.constant 0 : index
    %c0_121 = arith.constant 0 : index
    %289 = vector.load %arg14[%c1_119, %c0_120, %c0_121] : memref<2x64x32xf32, #tpu.memory_space<vmem>>, vector<1x64x32xf32>
    %290 = vector.shape_cast %289 : vector<1x64x32xf32> to vector<64x32xf32>
    %c1_122 = arith.constant 1 : index
    %c0_123 = arith.constant 0 : index
    %c0_124 = arith.constant 0 : index
    %291 = vector.load %arg15[%c1_122, %c0_123, %c0_124] : memref<2x1x32xf32, #tpu.memory_space<vmem>>, vector<1x1x32xf32>
    %292 = vector.shape_cast %291 : vector<1x1x32xf32> to vector<1x32xf32>
    %cst_125 = arith.constant dense<0.000000e+00> : vector<8x64xf32>
    %293 = tpu.matmul %284, %286, %cst_125 {dimension_numbers = #tpu.dot_dimension_numbers<[1], [0], [0], [1], [0, 0, 1, 1], [], []>} : vector<8x32xf32>, vector<32x64xf32>, vector<8x64xf32> -> vector<8x64xf32>
    %294 = vector.broadcast %288 : vector<1x64xf32> to vector<8x64xf32>
    %295 = arith.addf %293, %294 : vector<8x64xf32>
    %cst_126 = arith.constant 0.000000e+00 : f32
    %296 = vector.broadcast %cst_126 : f32 to vector<8x64xf32>
    %297 = arith.maximumf %295, %296 : vector<8x64xf32>
    %cst_127 = arith.constant dense<0.000000e+00> : vector<8x32xf32>
    %298 = tpu.matmul %297, %290, %cst_127 {dimension_numbers = #tpu.dot_dimension_numbers<[1], [0], [0], [1], [0, 0, 1, 1], [], []>} : vector<8x64xf32>, vector<64x32xf32>, vector<8x32xf32> -> vector<8x32xf32>
    %299 = vector.broadcast %292 : vector<1x32xf32> to vector<8x32xf32>
    %300 = arith.addf %298, %299 : vector<8x32xf32>
    %301 = arith.addf %300, %284 : vector<8x32xf32>
    %302 = vector.extract_strided_slice %176 {offsets = [2, 0], sizes = [1, 32], strides = [1, 1]} : vector<4x32xf32> to vector<1x32xf32>
    %303 = vector.extract_strided_slice %176 {offsets = [3, 0], sizes = [1, 32], strides = [1, 1]} : vector<4x32xf32> to vector<1x32xf32>
    %cst_128 = arith.constant dense<0.000000e+00> : vector<8xf32>
    %304 = vector.multi_reduction <add>, %301, %cst_128 [1] : vector<8x32xf32> to vector<8xf32>
    %305 = vector.shape_cast %304 : vector<8xf32> to vector<8x1xf32>
    %cst_129 = arith.constant 3.200000e+01 : f32
    %306 = vector.broadcast %cst_129 : f32 to vector<8x1xf32>
    %307 = arith.divf %305, %306 : vector<8x1xf32>
    %308 = arith.mulf %301, %301 : vector<8x32xf32>
    %cst_130 = arith.constant dense<0.000000e+00> : vector<8xf32>
    %309 = vector.multi_reduction <add>, %308, %cst_130 [1] : vector<8x32xf32> to vector<8xf32>
    %310 = vector.shape_cast %309 : vector<8xf32> to vector<8x1xf32>
    %cst_131 = arith.constant 3.200000e+01 : f32
    %311 = vector.broadcast %cst_131 : f32 to vector<8x1xf32>
    %312 = arith.divf %310, %311 : vector<8x1xf32>
    %313 = arith.mulf %307, %307 : vector<8x1xf32>
    %314 = arith.subf %312, %313 : vector<8x1xf32>
    %315 = vector.broadcast %307 : vector<8x1xf32> to vector<8x32xf32>
    %316 = arith.subf %301, %315 : vector<8x32xf32>
    %cst_132 = arith.constant 9.99999974E-6 : f32
    %317 = vector.broadcast %cst_132 : f32 to vector<8x1xf32>
    %318 = arith.addf %314, %317 : vector<8x1xf32>
    %319 = math.rsqrt %318 : vector<8x1xf32>
    %320 = vector.broadcast %319 : vector<8x1xf32> to vector<8x32xf32>
    %321 = arith.mulf %316, %320 : vector<8x32xf32>
    %322 = vector.broadcast %302 : vector<1x32xf32> to vector<8x32xf32>
    %323 = arith.mulf %321, %322 : vector<8x32xf32>
    %324 = vector.broadcast %303 : vector<1x32xf32> to vector<8x32xf32>
    %325 = arith.addf %323, %324 : vector<8x32xf32>
    %c0_133 = arith.constant 0 : index
    %c0_134 = arith.constant 0 : index
    %c0_135 = arith.constant 0 : index
    %326 = vector.load %arg21[%c0_133, %c0_134, %c0_135] : memref<2x6x32xf32, #tpu.memory_space<vmem>>, vector<1x6x32xf32>
    %327 = vector.shape_cast %326 : vector<1x6x32xf32> to vector<6x32xf32>
    %c0_136 = arith.constant 0 : index
    %c0_137 = arith.constant 0 : index
    %c0_138 = arith.constant 0 : index
    %328 = vector.load %arg16[%c0_136, %c0_137, %c0_138] : memref<2x32x96xf32, #tpu.memory_space<vmem>>, vector<1x32x96xf32>
    %329 = vector.shape_cast %328 : vector<1x32x96xf32> to vector<32x96xf32>
    %c0_139 = arith.constant 0 : index
    %c0_140 = arith.constant 0 : index
    %c0_141 = arith.constant 0 : index
    %330 = vector.load %arg17[%c0_139, %c0_140, %c0_141] : memref<2x32x32xf32, #tpu.memory_space<vmem>>, vector<1x32x32xf32>
    %331 = vector.shape_cast %330 : vector<1x32x32xf32> to vector<32x32xf32>
    %cst_142 = arith.constant dense<0.000000e+00> : vector<8x96xf32>
    %332 = tpu.matmul %23, %329, %cst_142 {dimension_numbers = #tpu.dot_dimension_numbers<[1], [0], [0], [1], [0, 0, 1, 1], [], []>} : vector<8x32xf32>, vector<32x96xf32>, vector<8x96xf32> -> vector<8x96xf32>
    %333 = vector.extract_strided_slice %332 {offsets = [0, 0], sizes = [8, 32], strides = [1, 1]} : vector<8x96xf32> to vector<8x32xf32>
    %cst_143 = arith.constant 0.353553385 : f32
    %334 = vector.broadcast %cst_143 : f32 to vector<8x32xf32>
    %335 = arith.mulf %333, %334 : vector<8x32xf32>
    %336 = vector.extract_strided_slice %332 {offsets = [0, 32], sizes = [8, 32], strides = [1, 1]} : vector<8x96xf32> to vector<8x32xf32>
    %337 = vector.extract_strided_slice %332 {offsets = [0, 64], sizes = [8, 32], strides = [1, 1]} : vector<8x96xf32> to vector<8x32xf32>
    %cst_144 = arith.constant 0.000000e+00 : f32
    %338 = vector.broadcast %cst_144 : f32 to vector<8x32xf32>
    %339 = vector.extract_strided_slice %335 {offsets = [0, 0], sizes = [8, 8], strides = [1, 1]} : vector<8x32xf32> to vector<8x8xf32>
    %340 = vector.extract_strided_slice %336 {offsets = [0, 0], sizes = [8, 8], strides = [1, 1]} : vector<8x32xf32> to vector<8x8xf32>
    %cst_145 = arith.constant dense<0.000000e+00> : vector<8x8xf32>
    %341 = tpu.matmul %339, %340, %cst_145 {dimension_numbers = #tpu.dot_dimension_numbers<[1], [1], [0], [0], [0, 0, 1, 0], [], []>} : vector<8x8xf32>, vector<8x8xf32>, vector<8x8xf32> -> vector<8x8xf32>
    %342 = arith.addf %341, %5 : vector<8x8xf32>
    %cst_146 = arith.constant dense<0xFF800000> : vector<8xf32>
    %343 = vector.multi_reduction <maximumf>, %342, %cst_146 [1] : vector<8x8xf32> to vector<8xf32>
    %344 = vector.shape_cast %343 : vector<8xf32> to vector<8x1xf32>
    %345 = vector.broadcast %344 : vector<8x1xf32> to vector<8x8xf32>
    %346 = arith.subf %342, %345 : vector<8x8xf32>
    %347 = math.exp %346 : vector<8x8xf32>
    %cst_147 = arith.constant dense<0.000000e+00> : vector<8xf32>
    %348 = vector.multi_reduction <add>, %347, %cst_147 [1] : vector<8x8xf32> to vector<8xf32>
    %349 = vector.shape_cast %348 : vector<8xf32> to vector<8x1xf32>
    %350 = tpu.reciprocal %349 {approx = true} : vector<8x1xf32> -> vector<8x1xf32>
    %351 = vector.broadcast %350 : vector<8x1xf32> to vector<8x8xf32>
    %352 = arith.mulf %347, %351 : vector<8x8xf32>
    %353 = vector.extract_strided_slice %337 {offsets = [0, 0], sizes = [8, 8], strides = [1, 1]} : vector<8x32xf32> to vector<8x8xf32>
    %cst_148 = arith.constant dense<0.000000e+00> : vector<8x8xf32>
    %354 = tpu.matmul %352, %353, %cst_148 {dimension_numbers = #tpu.dot_dimension_numbers<[1], [0], [0], [1], [0, 0, 1, 1], [], []>} : vector<8x8xf32>, vector<8x8xf32>, vector<8x8xf32> -> vector<8x8xf32>
    %355 = vector.extract_strided_slice %331 {offsets = [0, 0], sizes = [8, 32], strides = [1, 1]} : vector<32x32xf32> to vector<8x32xf32>
    %cst_149 = arith.constant dense<0.000000e+00> : vector<8x32xf32>
    %356 = tpu.matmul %354, %355, %cst_149 {dimension_numbers = #tpu.dot_dimension_numbers<[1], [0], [0], [1], [0, 0, 1, 1], [], []>} : vector<8x8xf32>, vector<8x32xf32>, vector<8x32xf32> -> vector<8x32xf32>
    %357 = arith.addf %338, %356 : vector<8x32xf32>
    %358 = vector.extract_strided_slice %335 {offsets = [0, 8], sizes = [8, 8], strides = [1, 1]} : vector<8x32xf32> to vector<8x8xf32>
    %359 = vector.extract_strided_slice %336 {offsets = [0, 8], sizes = [8, 8], strides = [1, 1]} : vector<8x32xf32> to vector<8x8xf32>
    %cst_150 = arith.constant dense<0.000000e+00> : vector<8x8xf32>
    %360 = tpu.matmul %358, %359, %cst_150 {dimension_numbers = #tpu.dot_dimension_numbers<[1], [1], [0], [0], [0, 0, 1, 0], [], []>} : vector<8x8xf32>, vector<8x8xf32>, vector<8x8xf32> -> vector<8x8xf32>
    %361 = arith.addf %360, %5 : vector<8x8xf32>
    %cst_151 = arith.constant dense<0xFF800000> : vector<8xf32>
    %362 = vector.multi_reduction <maximumf>, %361, %cst_151 [1] : vector<8x8xf32> to vector<8xf32>
    %363 = vector.shape_cast %362 : vector<8xf32> to vector<8x1xf32>
    %364 = vector.broadcast %363 : vector<8x1xf32> to vector<8x8xf32>
    %365 = arith.subf %361, %364 : vector<8x8xf32>
    %366 = math.exp %365 : vector<8x8xf32>
    %cst_152 = arith.constant dense<0.000000e+00> : vector<8xf32>
    %367 = vector.multi_reduction <add>, %366, %cst_152 [1] : vector<8x8xf32> to vector<8xf32>
    %368 = vector.shape_cast %367 : vector<8xf32> to vector<8x1xf32>
    %369 = tpu.reciprocal %368 {approx = true} : vector<8x1xf32> -> vector<8x1xf32>
    %370 = vector.broadcast %369 : vector<8x1xf32> to vector<8x8xf32>
    %371 = arith.mulf %366, %370 : vector<8x8xf32>
    %372 = vector.extract_strided_slice %337 {offsets = [0, 8], sizes = [8, 8], strides = [1, 1]} : vector<8x32xf32> to vector<8x8xf32>
    %cst_153 = arith.constant dense<0.000000e+00> : vector<8x8xf32>
    %373 = tpu.matmul %371, %372, %cst_153 {dimension_numbers = #tpu.dot_dimension_numbers<[1], [0], [0], [1], [0, 0, 1, 1], [], []>} : vector<8x8xf32>, vector<8x8xf32>, vector<8x8xf32> -> vector<8x8xf32>
    %374 = vector.extract_strided_slice %331 {offsets = [8, 0], sizes = [8, 32], strides = [1, 1]} : vector<32x32xf32> to vector<8x32xf32>
    %cst_154 = arith.constant dense<0.000000e+00> : vector<8x32xf32>
    %375 = tpu.matmul %373, %374, %cst_154 {dimension_numbers = #tpu.dot_dimension_numbers<[1], [0], [0], [1], [0, 0, 1, 1], [], []>} : vector<8x8xf32>, vector<8x32xf32>, vector<8x32xf32> -> vector<8x32xf32>
    %376 = arith.addf %357, %375 : vector<8x32xf32>
    %377 = vector.extract_strided_slice %335 {offsets = [0, 16], sizes = [8, 8], strides = [1, 1]} : vector<8x32xf32> to vector<8x8xf32>
    %378 = vector.extract_strided_slice %336 {offsets = [0, 16], sizes = [8, 8], strides = [1, 1]} : vector<8x32xf32> to vector<8x8xf32>
    %cst_155 = arith.constant dense<0.000000e+00> : vector<8x8xf32>
    %379 = tpu.matmul %377, %378, %cst_155 {dimension_numbers = #tpu.dot_dimension_numbers<[1], [1], [0], [0], [0, 0, 1, 0], [], []>} : vector<8x8xf32>, vector<8x8xf32>, vector<8x8xf32> -> vector<8x8xf32>
    %380 = arith.addf %379, %5 : vector<8x8xf32>
    %cst_156 = arith.constant dense<0xFF800000> : vector<8xf32>
    %381 = vector.multi_reduction <maximumf>, %380, %cst_156 [1] : vector<8x8xf32> to vector<8xf32>
    %382 = vector.shape_cast %381 : vector<8xf32> to vector<8x1xf32>
    %383 = vector.broadcast %382 : vector<8x1xf32> to vector<8x8xf32>
    %384 = arith.subf %380, %383 : vector<8x8xf32>
    %385 = math.exp %384 : vector<8x8xf32>
    %cst_157 = arith.constant dense<0.000000e+00> : vector<8xf32>
    %386 = vector.multi_reduction <add>, %385, %cst_157 [1] : vector<8x8xf32> to vector<8xf32>
    %387 = vector.shape_cast %386 : vector<8xf32> to vector<8x1xf32>
    %388 = tpu.reciprocal %387 {approx = true} : vector<8x1xf32> -> vector<8x1xf32>
    %389 = vector.broadcast %388 : vector<8x1xf32> to vector<8x8xf32>
    %390 = arith.mulf %385, %389 : vector<8x8xf32>
    %391 = vector.extract_strided_slice %337 {offsets = [0, 16], sizes = [8, 8], strides = [1, 1]} : vector<8x32xf32> to vector<8x8xf32>
    %cst_158 = arith.constant dense<0.000000e+00> : vector<8x8xf32>
    %392 = tpu.matmul %390, %391, %cst_158 {dimension_numbers = #tpu.dot_dimension_numbers<[1], [0], [0], [1], [0, 0, 1, 1], [], []>} : vector<8x8xf32>, vector<8x8xf32>, vector<8x8xf32> -> vector<8x8xf32>
    %393 = vector.extract_strided_slice %331 {offsets = [16, 0], sizes = [8, 32], strides = [1, 1]} : vector<32x32xf32> to vector<8x32xf32>
    %cst_159 = arith.constant dense<0.000000e+00> : vector<8x32xf32>
    %394 = tpu.matmul %392, %393, %cst_159 {dimension_numbers = #tpu.dot_dimension_numbers<[1], [0], [0], [1], [0, 0, 1, 1], [], []>} : vector<8x8xf32>, vector<8x32xf32>, vector<8x32xf32> -> vector<8x32xf32>
    %395 = arith.addf %376, %394 : vector<8x32xf32>
    %396 = vector.extract_strided_slice %335 {offsets = [0, 24], sizes = [8, 8], strides = [1, 1]} : vector<8x32xf32> to vector<8x8xf32>
    %397 = vector.extract_strided_slice %336 {offsets = [0, 24], sizes = [8, 8], strides = [1, 1]} : vector<8x32xf32> to vector<8x8xf32>
    %cst_160 = arith.constant dense<0.000000e+00> : vector<8x8xf32>
    %398 = tpu.matmul %396, %397, %cst_160 {dimension_numbers = #tpu.dot_dimension_numbers<[1], [1], [0], [0], [0, 0, 1, 0], [], []>} : vector<8x8xf32>, vector<8x8xf32>, vector<8x8xf32> -> vector<8x8xf32>
    %399 = arith.addf %398, %5 : vector<8x8xf32>
    %cst_161 = arith.constant dense<0xFF800000> : vector<8xf32>
    %400 = vector.multi_reduction <maximumf>, %399, %cst_161 [1] : vector<8x8xf32> to vector<8xf32>
    %401 = vector.shape_cast %400 : vector<8xf32> to vector<8x1xf32>
    %402 = vector.broadcast %401 : vector<8x1xf32> to vector<8x8xf32>
    %403 = arith.subf %399, %402 : vector<8x8xf32>
    %404 = math.exp %403 : vector<8x8xf32>
    %cst_162 = arith.constant dense<0.000000e+00> : vector<8xf32>
    %405 = vector.multi_reduction <add>, %404, %cst_162 [1] : vector<8x8xf32> to vector<8xf32>
    %406 = vector.shape_cast %405 : vector<8xf32> to vector<8x1xf32>
    %407 = tpu.reciprocal %406 {approx = true} : vector<8x1xf32> -> vector<8x1xf32>
    %408 = vector.broadcast %407 : vector<8x1xf32> to vector<8x8xf32>
    %409 = arith.mulf %404, %408 : vector<8x8xf32>
    %410 = vector.extract_strided_slice %337 {offsets = [0, 24], sizes = [8, 8], strides = [1, 1]} : vector<8x32xf32> to vector<8x8xf32>
    %cst_163 = arith.constant dense<0.000000e+00> : vector<8x8xf32>
    %411 = tpu.matmul %409, %410, %cst_163 {dimension_numbers = #tpu.dot_dimension_numbers<[1], [0], [0], [1], [0, 0, 1, 1], [], []>} : vector<8x8xf32>, vector<8x8xf32>, vector<8x8xf32> -> vector<8x8xf32>
    %412 = vector.extract_strided_slice %331 {offsets = [24, 0], sizes = [8, 32], strides = [1, 1]} : vector<32x32xf32> to vector<8x32xf32>
    %cst_164 = arith.constant dense<0.000000e+00> : vector<8x32xf32>
    %413 = tpu.matmul %411, %412, %cst_164 {dimension_numbers = #tpu.dot_dimension_numbers<[1], [0], [0], [1], [0, 0, 1, 1], [], []>} : vector<8x8xf32>, vector<8x32xf32>, vector<8x32xf32> -> vector<8x32xf32>
    %414 = arith.addf %395, %413 : vector<8x32xf32>
    %415 = arith.addf %414, %23 : vector<8x32xf32>
    %416 = vector.extract_strided_slice %327 {offsets = [0, 0], sizes = [1, 32], strides = [1, 1]} : vector<6x32xf32> to vector<1x32xf32>
    %417 = vector.extract_strided_slice %327 {offsets = [1, 0], sizes = [1, 32], strides = [1, 1]} : vector<6x32xf32> to vector<1x32xf32>
    %cst_165 = arith.constant dense<0.000000e+00> : vector<8xf32>
    %418 = vector.multi_reduction <add>, %415, %cst_165 [1] : vector<8x32xf32> to vector<8xf32>
    %419 = vector.shape_cast %418 : vector<8xf32> to vector<8x1xf32>
    %cst_166 = arith.constant 3.200000e+01 : f32
    %420 = vector.broadcast %cst_166 : f32 to vector<8x1xf32>
    %421 = arith.divf %419, %420 : vector<8x1xf32>
    %422 = arith.mulf %415, %415 : vector<8x32xf32>
    %cst_167 = arith.constant dense<0.000000e+00> : vector<8xf32>
    %423 = vector.multi_reduction <add>, %422, %cst_167 [1] : vector<8x32xf32> to vector<8xf32>
    %424 = vector.shape_cast %423 : vector<8xf32> to vector<8x1xf32>
    %cst_168 = arith.constant 3.200000e+01 : f32
    %425 = vector.broadcast %cst_168 : f32 to vector<8x1xf32>
    %426 = arith.divf %424, %425 : vector<8x1xf32>
    %427 = arith.mulf %421, %421 : vector<8x1xf32>
    %428 = arith.subf %426, %427 : vector<8x1xf32>
    %429 = vector.broadcast %421 : vector<8x1xf32> to vector<8x32xf32>
    %430 = arith.subf %415, %429 : vector<8x32xf32>
    %cst_169 = arith.constant 9.99999974E-6 : f32
    %431 = vector.broadcast %cst_169 : f32 to vector<8x1xf32>
    %432 = arith.addf %428, %431 : vector<8x1xf32>
    %433 = math.rsqrt %432 : vector<8x1xf32>
    %434 = vector.broadcast %433 : vector<8x1xf32> to vector<8x32xf32>
    %435 = arith.mulf %430, %434 : vector<8x32xf32>
    %436 = vector.broadcast %416 : vector<1x32xf32> to vector<8x32xf32>
    %437 = arith.mulf %435, %436 : vector<8x32xf32>
    %438 = vector.broadcast %417 : vector<1x32xf32> to vector<8x32xf32>
    %439 = arith.addf %437, %438 : vector<8x32xf32>
    %c0_170 = arith.constant 0 : index
    %c0_171 = arith.constant 0 : index
    %c0_172 = arith.constant 0 : index
    %440 = vector.load %arg18[%c0_170, %c0_171, %c0_172] : memref<2x32x32xf32, #tpu.memory_space<vmem>>, vector<1x32x32xf32>
    %441 = vector.shape_cast %440 : vector<1x32x32xf32> to vector<32x32xf32>
    %c0_173 = arith.constant 0 : index
    %c0_174 = arith.constant 0 : index
    %c0_175 = arith.constant 0 : index
    %442 = vector.load %arg19[%c0_173, %c0_174, %c0_175] : memref<2x32x64xf32, #tpu.memory_space<vmem>>, vector<1x32x64xf32>
    %443 = vector.shape_cast %442 : vector<1x32x64xf32> to vector<32x64xf32>
    %c0_176 = arith.constant 0 : index
    %c0_177 = arith.constant 0 : index
    %c0_178 = arith.constant 0 : index
    %444 = vector.load %arg20[%c0_176, %c0_177, %c0_178] : memref<2x32x32xf32, #tpu.memory_space<vmem>>, vector<1x32x32xf32>
    %445 = vector.shape_cast %444 : vector<1x32x32xf32> to vector<32x32xf32>
    %cst_179 = arith.constant dense<0.000000e+00> : vector<8x32xf32>
    %446 = tpu.matmul %439, %441, %cst_179 {dimension_numbers = #tpu.dot_dimension_numbers<[1], [0], [0], [1], [0, 0, 1, 1], [], []>} : vector<8x32xf32>, vector<32x32xf32>, vector<8x32xf32> -> vector<8x32xf32>
    %cst_180 = arith.constant 0.353553385 : f32
    %447 = vector.broadcast %cst_180 : f32 to vector<8x32xf32>
    %448 = arith.mulf %446, %447 : vector<8x32xf32>
    %cst_181 = arith.constant dense<0.000000e+00> : vector<8x64xf32>
    %449 = tpu.matmul %325, %443, %cst_181 {dimension_numbers = #tpu.dot_dimension_numbers<[1], [0], [0], [1], [0, 0, 1, 1], [], []>} : vector<8x32xf32>, vector<32x64xf32>, vector<8x64xf32> -> vector<8x64xf32>
    %450 = vector.extract_strided_slice %449 {offsets = [0, 0], sizes = [8, 32], strides = [1, 1]} : vector<8x64xf32> to vector<8x32xf32>
    %451 = vector.extract_strided_slice %449 {offsets = [0, 32], sizes = [8, 32], strides = [1, 1]} : vector<8x64xf32> to vector<8x32xf32>
    %cst_182 = arith.constant 0.000000e+00 : f32
    %452 = vector.broadcast %cst_182 : f32 to vector<8x32xf32>
    %453 = vector.extract_strided_slice %448 {offsets = [0, 0], sizes = [8, 8], strides = [1, 1]} : vector<8x32xf32> to vector<8x8xf32>
    %454 = vector.extract_strided_slice %450 {offsets = [0, 0], sizes = [8, 8], strides = [1, 1]} : vector<8x32xf32> to vector<8x8xf32>
    %cst_183 = arith.constant dense<0.000000e+00> : vector<8x8xf32>
    %455 = tpu.matmul %453, %454, %cst_183 {dimension_numbers = #tpu.dot_dimension_numbers<[1], [1], [0], [0], [0, 0, 1, 0], [], []>} : vector<8x8xf32>, vector<8x8xf32>, vector<8x8xf32> -> vector<8x8xf32>
    %cst_184 = arith.constant dense<0xFF800000> : vector<8xf32>
    %456 = vector.multi_reduction <maximumf>, %455, %cst_184 [1] : vector<8x8xf32> to vector<8xf32>
    %457 = vector.shape_cast %456 : vector<8xf32> to vector<8x1xf32>
    %458 = vector.broadcast %457 : vector<8x1xf32> to vector<8x8xf32>
    %459 = arith.subf %455, %458 : vector<8x8xf32>
    %460 = math.exp %459 : vector<8x8xf32>
    %cst_185 = arith.constant dense<0.000000e+00> : vector<8xf32>
    %461 = vector.multi_reduction <add>, %460, %cst_185 [1] : vector<8x8xf32> to vector<8xf32>
    %462 = vector.shape_cast %461 : vector<8xf32> to vector<8x1xf32>
    %463 = tpu.reciprocal %462 {approx = true} : vector<8x1xf32> -> vector<8x1xf32>
    %464 = vector.broadcast %463 : vector<8x1xf32> to vector<8x8xf32>
    %465 = arith.mulf %460, %464 : vector<8x8xf32>
    %466 = vector.extract_strided_slice %451 {offsets = [0, 0], sizes = [8, 8], strides = [1, 1]} : vector<8x32xf32> to vector<8x8xf32>
    %cst_186 = arith.constant dense<0.000000e+00> : vector<8x8xf32>
    %467 = tpu.matmul %465, %466, %cst_186 {dimension_numbers = #tpu.dot_dimension_numbers<[1], [0], [0], [1], [0, 0, 1, 1], [], []>} : vector<8x8xf32>, vector<8x8xf32>, vector<8x8xf32> -> vector<8x8xf32>
    %468 = vector.extract_strided_slice %445 {offsets = [0, 0], sizes = [8, 32], strides = [1, 1]} : vector<32x32xf32> to vector<8x32xf32>
    %cst_187 = arith.constant dense<0.000000e+00> : vector<8x32xf32>
    %469 = tpu.matmul %467, %468, %cst_187 {dimension_numbers = #tpu.dot_dimension_numbers<[1], [0], [0], [1], [0, 0, 1, 1], [], []>} : vector<8x8xf32>, vector<8x32xf32>, vector<8x32xf32> -> vector<8x32xf32>
    %470 = arith.addf %452, %469 : vector<8x32xf32>
    %471 = vector.extract_strided_slice %448 {offsets = [0, 8], sizes = [8, 8], strides = [1, 1]} : vector<8x32xf32> to vector<8x8xf32>
    %472 = vector.extract_strided_slice %450 {offsets = [0, 8], sizes = [8, 8], strides = [1, 1]} : vector<8x32xf32> to vector<8x8xf32>
    %cst_188 = arith.constant dense<0.000000e+00> : vector<8x8xf32>
    %473 = tpu.matmul %471, %472, %cst_188 {dimension_numbers = #tpu.dot_dimension_numbers<[1], [1], [0], [0], [0, 0, 1, 0], [], []>} : vector<8x8xf32>, vector<8x8xf32>, vector<8x8xf32> -> vector<8x8xf32>
    %cst_189 = arith.constant dense<0xFF800000> : vector<8xf32>
    %474 = vector.multi_reduction <maximumf>, %473, %cst_189 [1] : vector<8x8xf32> to vector<8xf32>
    %475 = vector.shape_cast %474 : vector<8xf32> to vector<8x1xf32>
    %476 = vector.broadcast %475 : vector<8x1xf32> to vector<8x8xf32>
    %477 = arith.subf %473, %476 : vector<8x8xf32>
    %478 = math.exp %477 : vector<8x8xf32>
    %cst_190 = arith.constant dense<0.000000e+00> : vector<8xf32>
    %479 = vector.multi_reduction <add>, %478, %cst_190 [1] : vector<8x8xf32> to vector<8xf32>
    %480 = vector.shape_cast %479 : vector<8xf32> to vector<8x1xf32>
    %481 = tpu.reciprocal %480 {approx = true} : vector<8x1xf32> -> vector<8x1xf32>
    %482 = vector.broadcast %481 : vector<8x1xf32> to vector<8x8xf32>
    %483 = arith.mulf %478, %482 : vector<8x8xf32>
    %484 = vector.extract_strided_slice %451 {offsets = [0, 8], sizes = [8, 8], strides = [1, 1]} : vector<8x32xf32> to vector<8x8xf32>
    %cst_191 = arith.constant dense<0.000000e+00> : vector<8x8xf32>
    %485 = tpu.matmul %483, %484, %cst_191 {dimension_numbers = #tpu.dot_dimension_numbers<[1], [0], [0], [1], [0, 0, 1, 1], [], []>} : vector<8x8xf32>, vector<8x8xf32>, vector<8x8xf32> -> vector<8x8xf32>
    %486 = vector.extract_strided_slice %445 {offsets = [8, 0], sizes = [8, 32], strides = [1, 1]} : vector<32x32xf32> to vector<8x32xf32>
    %cst_192 = arith.constant dense<0.000000e+00> : vector<8x32xf32>
    %487 = tpu.matmul %485, %486, %cst_192 {dimension_numbers = #tpu.dot_dimension_numbers<[1], [0], [0], [1], [0, 0, 1, 1], [], []>} : vector<8x8xf32>, vector<8x32xf32>, vector<8x32xf32> -> vector<8x32xf32>
    %488 = arith.addf %470, %487 : vector<8x32xf32>
    %489 = vector.extract_strided_slice %448 {offsets = [0, 16], sizes = [8, 8], strides = [1, 1]} : vector<8x32xf32> to vector<8x8xf32>
    %490 = vector.extract_strided_slice %450 {offsets = [0, 16], sizes = [8, 8], strides = [1, 1]} : vector<8x32xf32> to vector<8x8xf32>
    %cst_193 = arith.constant dense<0.000000e+00> : vector<8x8xf32>
    %491 = tpu.matmul %489, %490, %cst_193 {dimension_numbers = #tpu.dot_dimension_numbers<[1], [1], [0], [0], [0, 0, 1, 0], [], []>} : vector<8x8xf32>, vector<8x8xf32>, vector<8x8xf32> -> vector<8x8xf32>
    %cst_194 = arith.constant dense<0xFF800000> : vector<8xf32>
    %492 = vector.multi_reduction <maximumf>, %491, %cst_194 [1] : vector<8x8xf32> to vector<8xf32>
    %493 = vector.shape_cast %492 : vector<8xf32> to vector<8x1xf32>
    %494 = vector.broadcast %493 : vector<8x1xf32> to vector<8x8xf32>
    %495 = arith.subf %491, %494 : vector<8x8xf32>
    %496 = math.exp %495 : vector<8x8xf32>
    %cst_195 = arith.constant dense<0.000000e+00> : vector<8xf32>
    %497 = vector.multi_reduction <add>, %496, %cst_195 [1] : vector<8x8xf32> to vector<8xf32>
    %498 = vector.shape_cast %497 : vector<8xf32> to vector<8x1xf32>
    %499 = tpu.reciprocal %498 {approx = true} : vector<8x1xf32> -> vector<8x1xf32>
    %500 = vector.broadcast %499 : vector<8x1xf32> to vector<8x8xf32>
    %501 = arith.mulf %496, %500 : vector<8x8xf32>
    %502 = vector.extract_strided_slice %451 {offsets = [0, 16], sizes = [8, 8], strides = [1, 1]} : vector<8x32xf32> to vector<8x8xf32>
    %cst_196 = arith.constant dense<0.000000e+00> : vector<8x8xf32>
    %503 = tpu.matmul %501, %502, %cst_196 {dimension_numbers = #tpu.dot_dimension_numbers<[1], [0], [0], [1], [0, 0, 1, 1], [], []>} : vector<8x8xf32>, vector<8x8xf32>, vector<8x8xf32> -> vector<8x8xf32>
    %504 = vector.extract_strided_slice %445 {offsets = [16, 0], sizes = [8, 32], strides = [1, 1]} : vector<32x32xf32> to vector<8x32xf32>
    %cst_197 = arith.constant dense<0.000000e+00> : vector<8x32xf32>
    %505 = tpu.matmul %503, %504, %cst_197 {dimension_numbers = #tpu.dot_dimension_numbers<[1], [0], [0], [1], [0, 0, 1, 1], [], []>} : vector<8x8xf32>, vector<8x32xf32>, vector<8x32xf32> -> vector<8x32xf32>
    %506 = arith.addf %488, %505 : vector<8x32xf32>
    %507 = vector.extract_strided_slice %448 {offsets = [0, 24], sizes = [8, 8], strides = [1, 1]} : vector<8x32xf32> to vector<8x8xf32>
    %508 = vector.extract_strided_slice %450 {offsets = [0, 24], sizes = [8, 8], strides = [1, 1]} : vector<8x32xf32> to vector<8x8xf32>
    %cst_198 = arith.constant dense<0.000000e+00> : vector<8x8xf32>
    %509 = tpu.matmul %507, %508, %cst_198 {dimension_numbers = #tpu.dot_dimension_numbers<[1], [1], [0], [0], [0, 0, 1, 0], [], []>} : vector<8x8xf32>, vector<8x8xf32>, vector<8x8xf32> -> vector<8x8xf32>
    %cst_199 = arith.constant dense<0xFF800000> : vector<8xf32>
    %510 = vector.multi_reduction <maximumf>, %509, %cst_199 [1] : vector<8x8xf32> to vector<8xf32>
    %511 = vector.shape_cast %510 : vector<8xf32> to vector<8x1xf32>
    %512 = vector.broadcast %511 : vector<8x1xf32> to vector<8x8xf32>
    %513 = arith.subf %509, %512 : vector<8x8xf32>
    %514 = math.exp %513 : vector<8x8xf32>
    %cst_200 = arith.constant dense<0.000000e+00> : vector<8xf32>
    %515 = vector.multi_reduction <add>, %514, %cst_200 [1] : vector<8x8xf32> to vector<8xf32>
    %516 = vector.shape_cast %515 : vector<8xf32> to vector<8x1xf32>
    %517 = tpu.reciprocal %516 {approx = true} : vector<8x1xf32> -> vector<8x1xf32>
    %518 = vector.broadcast %517 : vector<8x1xf32> to vector<8x8xf32>
    %519 = arith.mulf %514, %518 : vector<8x8xf32>
    %520 = vector.extract_strided_slice %451 {offsets = [0, 24], sizes = [8, 8], strides = [1, 1]} : vector<8x32xf32> to vector<8x8xf32>
    %cst_201 = arith.constant dense<0.000000e+00> : vector<8x8xf32>
    %521 = tpu.matmul %519, %520, %cst_201 {dimension_numbers = #tpu.dot_dimension_numbers<[1], [0], [0], [1], [0, 0, 1, 1], [], []>} : vector<8x8xf32>, vector<8x8xf32>, vector<8x8xf32> -> vector<8x8xf32>
    %522 = vector.extract_strided_slice %445 {offsets = [24, 0], sizes = [8, 32], strides = [1, 1]} : vector<32x32xf32> to vector<8x32xf32>
    %cst_202 = arith.constant dense<0.000000e+00> : vector<8x32xf32>
    %523 = tpu.matmul %521, %522, %cst_202 {dimension_numbers = #tpu.dot_dimension_numbers<[1], [0], [0], [1], [0, 0, 1, 1], [], []>} : vector<8x8xf32>, vector<8x32xf32>, vector<8x32xf32> -> vector<8x32xf32>
    %524 = arith.addf %506, %523 : vector<8x32xf32>
    %525 = arith.addf %524, %439 : vector<8x32xf32>
    %526 = vector.extract_strided_slice %327 {offsets = [2, 0], sizes = [1, 32], strides = [1, 1]} : vector<6x32xf32> to vector<1x32xf32>
    %527 = vector.extract_strided_slice %327 {offsets = [3, 0], sizes = [1, 32], strides = [1, 1]} : vector<6x32xf32> to vector<1x32xf32>
    %cst_203 = arith.constant dense<0.000000e+00> : vector<8xf32>
    %528 = vector.multi_reduction <add>, %525, %cst_203 [1] : vector<8x32xf32> to vector<8xf32>
    %529 = vector.shape_cast %528 : vector<8xf32> to vector<8x1xf32>
    %cst_204 = arith.constant 3.200000e+01 : f32
    %530 = vector.broadcast %cst_204 : f32 to vector<8x1xf32>
    %531 = arith.divf %529, %530 : vector<8x1xf32>
    %532 = arith.mulf %525, %525 : vector<8x32xf32>
    %cst_205 = arith.constant dense<0.000000e+00> : vector<8xf32>
    %533 = vector.multi_reduction <add>, %532, %cst_205 [1] : vector<8x32xf32> to vector<8xf32>
    %534 = vector.shape_cast %533 : vector<8xf32> to vector<8x1xf32>
    %cst_206 = arith.constant 3.200000e+01 : f32
    %535 = vector.broadcast %cst_206 : f32 to vector<8x1xf32>
    %536 = arith.divf %534, %535 : vector<8x1xf32>
    %537 = arith.mulf %531, %531 : vector<8x1xf32>
    %538 = arith.subf %536, %537 : vector<8x1xf32>
    %539 = vector.broadcast %531 : vector<8x1xf32> to vector<8x32xf32>
    %540 = arith.subf %525, %539 : vector<8x32xf32>
    %cst_207 = arith.constant 9.99999974E-6 : f32
    %541 = vector.broadcast %cst_207 : f32 to vector<8x1xf32>
    %542 = arith.addf %538, %541 : vector<8x1xf32>
    %543 = math.rsqrt %542 : vector<8x1xf32>
    %544 = vector.broadcast %543 : vector<8x1xf32> to vector<8x32xf32>
    %545 = arith.mulf %540, %544 : vector<8x32xf32>
    %546 = vector.broadcast %526 : vector<1x32xf32> to vector<8x32xf32>
    %547 = arith.mulf %545, %546 : vector<8x32xf32>
    %548 = vector.broadcast %527 : vector<1x32xf32> to vector<8x32xf32>
    %549 = arith.addf %547, %548 : vector<8x32xf32>
    %c0_208 = arith.constant 0 : index
    %c0_209 = arith.constant 0 : index
    %c0_210 = arith.constant 0 : index
    %550 = vector.load %arg22[%c0_208, %c0_209, %c0_210] : memref<2x32x64xf32, #tpu.memory_space<vmem>>, vector<1x32x64xf32>
    %551 = vector.shape_cast %550 : vector<1x32x64xf32> to vector<32x64xf32>
    %c0_211 = arith.constant 0 : index
    %c0_212 = arith.constant 0 : index
    %c0_213 = arith.constant 0 : index
    %552 = vector.load %arg23[%c0_211, %c0_212, %c0_213] : memref<2x1x64xf32, #tpu.memory_space<vmem>>, vector<1x1x64xf32>
    %553 = vector.shape_cast %552 : vector<1x1x64xf32> to vector<1x64xf32>
    %c0_214 = arith.constant 0 : index
    %c0_215 = arith.constant 0 : index
    %c0_216 = arith.constant 0 : index
    %554 = vector.load %arg24[%c0_214, %c0_215, %c0_216] : memref<2x64x32xf32, #tpu.memory_space<vmem>>, vector<1x64x32xf32>
    %555 = vector.shape_cast %554 : vector<1x64x32xf32> to vector<64x32xf32>
    %c0_217 = arith.constant 0 : index
    %c0_218 = arith.constant 0 : index
    %c0_219 = arith.constant 0 : index
    %556 = vector.load %arg25[%c0_217, %c0_218, %c0_219] : memref<2x1x32xf32, #tpu.memory_space<vmem>>, vector<1x1x32xf32>
    %557 = vector.shape_cast %556 : vector<1x1x32xf32> to vector<1x32xf32>
    %cst_220 = arith.constant dense<0.000000e+00> : vector<8x64xf32>
    %558 = tpu.matmul %549, %551, %cst_220 {dimension_numbers = #tpu.dot_dimension_numbers<[1], [0], [0], [1], [0, 0, 1, 1], [], []>} : vector<8x32xf32>, vector<32x64xf32>, vector<8x64xf32> -> vector<8x64xf32>
    %559 = vector.broadcast %553 : vector<1x64xf32> to vector<8x64xf32>
    %560 = arith.addf %558, %559 : vector<8x64xf32>
    %cst_221 = arith.constant 0.000000e+00 : f32
    %561 = vector.broadcast %cst_221 : f32 to vector<8x64xf32>
    %562 = arith.maximumf %560, %561 : vector<8x64xf32>
    %cst_222 = arith.constant dense<0.000000e+00> : vector<8x32xf32>
    %563 = tpu.matmul %562, %555, %cst_222 {dimension_numbers = #tpu.dot_dimension_numbers<[1], [0], [0], [1], [0, 0, 1, 1], [], []>} : vector<8x64xf32>, vector<64x32xf32>, vector<8x32xf32> -> vector<8x32xf32>
    %564 = vector.broadcast %557 : vector<1x32xf32> to vector<8x32xf32>
    %565 = arith.addf %563, %564 : vector<8x32xf32>
    %566 = arith.addf %565, %549 : vector<8x32xf32>
    %567 = vector.extract_strided_slice %327 {offsets = [4, 0], sizes = [1, 32], strides = [1, 1]} : vector<6x32xf32> to vector<1x32xf32>
    %568 = vector.extract_strided_slice %327 {offsets = [5, 0], sizes = [1, 32], strides = [1, 1]} : vector<6x32xf32> to vector<1x32xf32>
    %cst_223 = arith.constant dense<0.000000e+00> : vector<8xf32>
    %569 = vector.multi_reduction <add>, %566, %cst_223 [1] : vector<8x32xf32> to vector<8xf32>
    %570 = vector.shape_cast %569 : vector<8xf32> to vector<8x1xf32>
    %cst_224 = arith.constant 3.200000e+01 : f32
    %571 = vector.broadcast %cst_224 : f32 to vector<8x1xf32>
    %572 = arith.divf %570, %571 : vector<8x1xf32>
    %573 = arith.mulf %566, %566 : vector<8x32xf32>
    %cst_225 = arith.constant dense<0.000000e+00> : vector<8xf32>
    %574 = vector.multi_reduction <add>, %573, %cst_225 [1] : vector<8x32xf32> to vector<8xf32>
    %575 = vector.shape_cast %574 : vector<8xf32> to vector<8x1xf32>
    %cst_226 = arith.constant 3.200000e+01 : f32
    %576 = vector.broadcast %cst_226 : f32 to vector<8x1xf32>
    %577 = arith.divf %575, %576 : vector<8x1xf32>
    %578 = arith.mulf %572, %572 : vector<8x1xf32>
    %579 = arith.subf %577, %578 : vector<8x1xf32>
    %580 = vector.broadcast %572 : vector<8x1xf32> to vector<8x32xf32>
    %581 = arith.subf %566, %580 : vector<8x32xf32>
    %cst_227 = arith.constant 9.99999974E-6 : f32
    %582 = vector.broadcast %cst_227 : f32 to vector<8x1xf32>
    %583 = arith.addf %579, %582 : vector<8x1xf32>
    %584 = math.rsqrt %583 : vector<8x1xf32>
    %585 = vector.broadcast %584 : vector<8x1xf32> to vector<8x32xf32>
    %586 = arith.mulf %581, %585 : vector<8x32xf32>
    %587 = vector.broadcast %567 : vector<1x32xf32> to vector<8x32xf32>
    %588 = arith.mulf %586, %587 : vector<8x32xf32>
    %589 = vector.broadcast %568 : vector<1x32xf32> to vector<8x32xf32>
    %590 = arith.addf %588, %589 : vector<8x32xf32>
    %c1_228 = arith.constant 1 : index
    %c0_229 = arith.constant 0 : index
    %c0_230 = arith.constant 0 : index
    %591 = vector.load %arg21[%c1_228, %c0_229, %c0_230] : memref<2x6x32xf32, #tpu.memory_space<vmem>>, vector<1x6x32xf32>
    %592 = vector.shape_cast %591 : vector<1x6x32xf32> to vector<6x32xf32>
    %c1_231 = arith.constant 1 : index
    %c0_232 = arith.constant 0 : index
    %c0_233 = arith.constant 0 : index
    %593 = vector.load %arg16[%c1_231, %c0_232, %c0_233] : memref<2x32x96xf32, #tpu.memory_space<vmem>>, vector<1x32x96xf32>
    %594 = vector.shape_cast %593 : vector<1x32x96xf32> to vector<32x96xf32>
    %c1_234 = arith.constant 1 : index
    %c0_235 = arith.constant 0 : index
    %c0_236 = arith.constant 0 : index
    %595 = vector.load %arg17[%c1_234, %c0_235, %c0_236] : memref<2x32x32xf32, #tpu.memory_space<vmem>>, vector<1x32x32xf32>
    %596 = vector.shape_cast %595 : vector<1x32x32xf32> to vector<32x32xf32>
    %cst_237 = arith.constant dense<0.000000e+00> : vector<8x96xf32>
    %597 = tpu.matmul %590, %594, %cst_237 {dimension_numbers = #tpu.dot_dimension_numbers<[1], [0], [0], [1], [0, 0, 1, 1], [], []>} : vector<8x32xf32>, vector<32x96xf32>, vector<8x96xf32> -> vector<8x96xf32>
    %598 = vector.extract_strided_slice %597 {offsets = [0, 0], sizes = [8, 32], strides = [1, 1]} : vector<8x96xf32> to vector<8x32xf32>
    %cst_238 = arith.constant 0.353553385 : f32
    %599 = vector.broadcast %cst_238 : f32 to vector<8x32xf32>
    %600 = arith.mulf %598, %599 : vector<8x32xf32>
    %601 = vector.extract_strided_slice %597 {offsets = [0, 32], sizes = [8, 32], strides = [1, 1]} : vector<8x96xf32> to vector<8x32xf32>
    %602 = vector.extract_strided_slice %597 {offsets = [0, 64], sizes = [8, 32], strides = [1, 1]} : vector<8x96xf32> to vector<8x32xf32>
    %cst_239 = arith.constant 0.000000e+00 : f32
    %603 = vector.broadcast %cst_239 : f32 to vector<8x32xf32>
    %604 = vector.extract_strided_slice %600 {offsets = [0, 0], sizes = [8, 8], strides = [1, 1]} : vector<8x32xf32> to vector<8x8xf32>
    %605 = vector.extract_strided_slice %601 {offsets = [0, 0], sizes = [8, 8], strides = [1, 1]} : vector<8x32xf32> to vector<8x8xf32>
    %cst_240 = arith.constant dense<0.000000e+00> : vector<8x8xf32>
    %606 = tpu.matmul %604, %605, %cst_240 {dimension_numbers = #tpu.dot_dimension_numbers<[1], [1], [0], [0], [0, 0, 1, 0], [], []>} : vector<8x8xf32>, vector<8x8xf32>, vector<8x8xf32> -> vector<8x8xf32>
    %607 = arith.addf %606, %5 : vector<8x8xf32>
    %cst_241 = arith.constant dense<0xFF800000> : vector<8xf32>
    %608 = vector.multi_reduction <maximumf>, %607, %cst_241 [1] : vector<8x8xf32> to vector<8xf32>
    %609 = vector.shape_cast %608 : vector<8xf32> to vector<8x1xf32>
    %610 = vector.broadcast %609 : vector<8x1xf32> to vector<8x8xf32>
    %611 = arith.subf %607, %610 : vector<8x8xf32>
    %612 = math.exp %611 : vector<8x8xf32>
    %cst_242 = arith.constant dense<0.000000e+00> : vector<8xf32>
    %613 = vector.multi_reduction <add>, %612, %cst_242 [1] : vector<8x8xf32> to vector<8xf32>
    %614 = vector.shape_cast %613 : vector<8xf32> to vector<8x1xf32>
    %615 = tpu.reciprocal %614 {approx = true} : vector<8x1xf32> -> vector<8x1xf32>
    %616 = vector.broadcast %615 : vector<8x1xf32> to vector<8x8xf32>
    %617 = arith.mulf %612, %616 : vector<8x8xf32>
    %618 = vector.extract_strided_slice %602 {offsets = [0, 0], sizes = [8, 8], strides = [1, 1]} : vector<8x32xf32> to vector<8x8xf32>
    %cst_243 = arith.constant dense<0.000000e+00> : vector<8x8xf32>
    %619 = tpu.matmul %617, %618, %cst_243 {dimension_numbers = #tpu.dot_dimension_numbers<[1], [0], [0], [1], [0, 0, 1, 1], [], []>} : vector<8x8xf32>, vector<8x8xf32>, vector<8x8xf32> -> vector<8x8xf32>
    %620 = vector.extract_strided_slice %596 {offsets = [0, 0], sizes = [8, 32], strides = [1, 1]} : vector<32x32xf32> to vector<8x32xf32>
    %cst_244 = arith.constant dense<0.000000e+00> : vector<8x32xf32>
    %621 = tpu.matmul %619, %620, %cst_244 {dimension_numbers = #tpu.dot_dimension_numbers<[1], [0], [0], [1], [0, 0, 1, 1], [], []>} : vector<8x8xf32>, vector<8x32xf32>, vector<8x32xf32> -> vector<8x32xf32>
    %622 = arith.addf %603, %621 : vector<8x32xf32>
    %623 = vector.extract_strided_slice %600 {offsets = [0, 8], sizes = [8, 8], strides = [1, 1]} : vector<8x32xf32> to vector<8x8xf32>
    %624 = vector.extract_strided_slice %601 {offsets = [0, 8], sizes = [8, 8], strides = [1, 1]} : vector<8x32xf32> to vector<8x8xf32>
    %cst_245 = arith.constant dense<0.000000e+00> : vector<8x8xf32>
    %625 = tpu.matmul %623, %624, %cst_245 {dimension_numbers = #tpu.dot_dimension_numbers<[1], [1], [0], [0], [0, 0, 1, 0], [], []>} : vector<8x8xf32>, vector<8x8xf32>, vector<8x8xf32> -> vector<8x8xf32>
    %626 = arith.addf %625, %5 : vector<8x8xf32>
    %cst_246 = arith.constant dense<0xFF800000> : vector<8xf32>
    %627 = vector.multi_reduction <maximumf>, %626, %cst_246 [1] : vector<8x8xf32> to vector<8xf32>
    %628 = vector.shape_cast %627 : vector<8xf32> to vector<8x1xf32>
    %629 = vector.broadcast %628 : vector<8x1xf32> to vector<8x8xf32>
    %630 = arith.subf %626, %629 : vector<8x8xf32>
    %631 = math.exp %630 : vector<8x8xf32>
    %cst_247 = arith.constant dense<0.000000e+00> : vector<8xf32>
    %632 = vector.multi_reduction <add>, %631, %cst_247 [1] : vector<8x8xf32> to vector<8xf32>
    %633 = vector.shape_cast %632 : vector<8xf32> to vector<8x1xf32>
    %634 = tpu.reciprocal %633 {approx = true} : vector<8x1xf32> -> vector<8x1xf32>
    %635 = vector.broadcast %634 : vector<8x1xf32> to vector<8x8xf32>
    %636 = arith.mulf %631, %635 : vector<8x8xf32>
    %637 = vector.extract_strided_slice %602 {offsets = [0, 8], sizes = [8, 8], strides = [1, 1]} : vector<8x32xf32> to vector<8x8xf32>
    %cst_248 = arith.constant dense<0.000000e+00> : vector<8x8xf32>
    %638 = tpu.matmul %636, %637, %cst_248 {dimension_numbers = #tpu.dot_dimension_numbers<[1], [0], [0], [1], [0, 0, 1, 1], [], []>} : vector<8x8xf32>, vector<8x8xf32>, vector<8x8xf32> -> vector<8x8xf32>
    %639 = vector.extract_strided_slice %596 {offsets = [8, 0], sizes = [8, 32], strides = [1, 1]} : vector<32x32xf32> to vector<8x32xf32>
    %cst_249 = arith.constant dense<0.000000e+00> : vector<8x32xf32>
    %640 = tpu.matmul %638, %639, %cst_249 {dimension_numbers = #tpu.dot_dimension_numbers<[1], [0], [0], [1], [0, 0, 1, 1], [], []>} : vector<8x8xf32>, vector<8x32xf32>, vector<8x32xf32> -> vector<8x32xf32>
    %641 = arith.addf %622, %640 : vector<8x32xf32>
    %642 = vector.extract_strided_slice %600 {offsets = [0, 16], sizes = [8, 8], strides = [1, 1]} : vector<8x32xf32> to vector<8x8xf32>
    %643 = vector.extract_strided_slice %601 {offsets = [0, 16], sizes = [8, 8], strides = [1, 1]} : vector<8x32xf32> to vector<8x8xf32>
    %cst_250 = arith.constant dense<0.000000e+00> : vector<8x8xf32>
    %644 = tpu.matmul %642, %643, %cst_250 {dimension_numbers = #tpu.dot_dimension_numbers<[1], [1], [0], [0], [0, 0, 1, 0], [], []>} : vector<8x8xf32>, vector<8x8xf32>, vector<8x8xf32> -> vector<8x8xf32>
    %645 = arith.addf %644, %5 : vector<8x8xf32>
    %cst_251 = arith.constant dense<0xFF800000> : vector<8xf32>
    %646 = vector.multi_reduction <maximumf>, %645, %cst_251 [1] : vector<8x8xf32> to vector<8xf32>
    %647 = vector.shape_cast %646 : vector<8xf32> to vector<8x1xf32>
    %648 = vector.broadcast %647 : vector<8x1xf32> to vector<8x8xf32>
    %649 = arith.subf %645, %648 : vector<8x8xf32>
    %650 = math.exp %649 : vector<8x8xf32>
    %cst_252 = arith.constant dense<0.000000e+00> : vector<8xf32>
    %651 = vector.multi_reduction <add>, %650, %cst_252 [1] : vector<8x8xf32> to vector<8xf32>
    %652 = vector.shape_cast %651 : vector<8xf32> to vector<8x1xf32>
    %653 = tpu.reciprocal %652 {approx = true} : vector<8x1xf32> -> vector<8x1xf32>
    %654 = vector.broadcast %653 : vector<8x1xf32> to vector<8x8xf32>
    %655 = arith.mulf %650, %654 : vector<8x8xf32>
    %656 = vector.extract_strided_slice %602 {offsets = [0, 16], sizes = [8, 8], strides = [1, 1]} : vector<8x32xf32> to vector<8x8xf32>
    %cst_253 = arith.constant dense<0.000000e+00> : vector<8x8xf32>
    %657 = tpu.matmul %655, %656, %cst_253 {dimension_numbers = #tpu.dot_dimension_numbers<[1], [0], [0], [1], [0, 0, 1, 1], [], []>} : vector<8x8xf32>, vector<8x8xf32>, vector<8x8xf32> -> vector<8x8xf32>
    %658 = vector.extract_strided_slice %596 {offsets = [16, 0], sizes = [8, 32], strides = [1, 1]} : vector<32x32xf32> to vector<8x32xf32>
    %cst_254 = arith.constant dense<0.000000e+00> : vector<8x32xf32>
    %659 = tpu.matmul %657, %658, %cst_254 {dimension_numbers = #tpu.dot_dimension_numbers<[1], [0], [0], [1], [0, 0, 1, 1], [], []>} : vector<8x8xf32>, vector<8x32xf32>, vector<8x32xf32> -> vector<8x32xf32>
    %660 = arith.addf %641, %659 : vector<8x32xf32>
    %661 = vector.extract_strided_slice %600 {offsets = [0, 24], sizes = [8, 8], strides = [1, 1]} : vector<8x32xf32> to vector<8x8xf32>
    %662 = vector.extract_strided_slice %601 {offsets = [0, 24], sizes = [8, 8], strides = [1, 1]} : vector<8x32xf32> to vector<8x8xf32>
    %cst_255 = arith.constant dense<0.000000e+00> : vector<8x8xf32>
    %663 = tpu.matmul %661, %662, %cst_255 {dimension_numbers = #tpu.dot_dimension_numbers<[1], [1], [0], [0], [0, 0, 1, 0], [], []>} : vector<8x8xf32>, vector<8x8xf32>, vector<8x8xf32> -> vector<8x8xf32>
    %664 = arith.addf %663, %5 : vector<8x8xf32>
    %cst_256 = arith.constant dense<0xFF800000> : vector<8xf32>
    %665 = vector.multi_reduction <maximumf>, %664, %cst_256 [1] : vector<8x8xf32> to vector<8xf32>
    %666 = vector.shape_cast %665 : vector<8xf32> to vector<8x1xf32>
    %667 = vector.broadcast %666 : vector<8x1xf32> to vector<8x8xf32>
    %668 = arith.subf %664, %667 : vector<8x8xf32>
    %669 = math.exp %668 : vector<8x8xf32>
    %cst_257 = arith.constant dense<0.000000e+00> : vector<8xf32>
    %670 = vector.multi_reduction <add>, %669, %cst_257 [1] : vector<8x8xf32> to vector<8xf32>
    %671 = vector.shape_cast %670 : vector<8xf32> to vector<8x1xf32>
    %672 = tpu.reciprocal %671 {approx = true} : vector<8x1xf32> -> vector<8x1xf32>
    %673 = vector.broadcast %672 : vector<8x1xf32> to vector<8x8xf32>
    %674 = arith.mulf %669, %673 : vector<8x8xf32>
    %675 = vector.extract_strided_slice %602 {offsets = [0, 24], sizes = [8, 8], strides = [1, 1]} : vector<8x32xf32> to vector<8x8xf32>
    %cst_258 = arith.constant dense<0.000000e+00> : vector<8x8xf32>
    %676 = tpu.matmul %674, %675, %cst_258 {dimension_numbers = #tpu.dot_dimension_numbers<[1], [0], [0], [1], [0, 0, 1, 1], [], []>} : vector<8x8xf32>, vector<8x8xf32>, vector<8x8xf32> -> vector<8x8xf32>
    %677 = vector.extract_strided_slice %596 {offsets = [24, 0], sizes = [8, 32], strides = [1, 1]} : vector<32x32xf32> to vector<8x32xf32>
    %cst_259 = arith.constant dense<0.000000e+00> : vector<8x32xf32>
    %678 = tpu.matmul %676, %677, %cst_259 {dimension_numbers = #tpu.dot_dimension_numbers<[1], [0], [0], [1], [0, 0, 1, 1], [], []>} : vector<8x8xf32>, vector<8x32xf32>, vector<8x32xf32> -> vector<8x32xf32>
    %679 = arith.addf %660, %678 : vector<8x32xf32>
    %680 = arith.addf %679, %590 : vector<8x32xf32>
    %681 = vector.extract_strided_slice %592 {offsets = [0, 0], sizes = [1, 32], strides = [1, 1]} : vector<6x32xf32> to vector<1x32xf32>
    %682 = vector.extract_strided_slice %592 {offsets = [1, 0], sizes = [1, 32], strides = [1, 1]} : vector<6x32xf32> to vector<1x32xf32>
    %cst_260 = arith.constant dense<0.000000e+00> : vector<8xf32>
    %683 = vector.multi_reduction <add>, %680, %cst_260 [1] : vector<8x32xf32> to vector<8xf32>
    %684 = vector.shape_cast %683 : vector<8xf32> to vector<8x1xf32>
    %cst_261 = arith.constant 3.200000e+01 : f32
    %685 = vector.broadcast %cst_261 : f32 to vector<8x1xf32>
    %686 = arith.divf %684, %685 : vector<8x1xf32>
    %687 = arith.mulf %680, %680 : vector<8x32xf32>
    %cst_262 = arith.constant dense<0.000000e+00> : vector<8xf32>
    %688 = vector.multi_reduction <add>, %687, %cst_262 [1] : vector<8x32xf32> to vector<8xf32>
    %689 = vector.shape_cast %688 : vector<8xf32> to vector<8x1xf32>
    %cst_263 = arith.constant 3.200000e+01 : f32
    %690 = vector.broadcast %cst_263 : f32 to vector<8x1xf32>
    %691 = arith.divf %689, %690 : vector<8x1xf32>
    %692 = arith.mulf %686, %686 : vector<8x1xf32>
    %693 = arith.subf %691, %692 : vector<8x1xf32>
    %694 = vector.broadcast %686 : vector<8x1xf32> to vector<8x32xf32>
    %695 = arith.subf %680, %694 : vector<8x32xf32>
    %cst_264 = arith.constant 9.99999974E-6 : f32
    %696 = vector.broadcast %cst_264 : f32 to vector<8x1xf32>
    %697 = arith.addf %693, %696 : vector<8x1xf32>
    %698 = math.rsqrt %697 : vector<8x1xf32>
    %699 = vector.broadcast %698 : vector<8x1xf32> to vector<8x32xf32>
    %700 = arith.mulf %695, %699 : vector<8x32xf32>
    %701 = vector.broadcast %681 : vector<1x32xf32> to vector<8x32xf32>
    %702 = arith.mulf %700, %701 : vector<8x32xf32>
    %703 = vector.broadcast %682 : vector<1x32xf32> to vector<8x32xf32>
    %704 = arith.addf %702, %703 : vector<8x32xf32>
    %c1_265 = arith.constant 1 : index
    %c0_266 = arith.constant 0 : index
    %c0_267 = arith.constant 0 : index
    %705 = vector.load %arg18[%c1_265, %c0_266, %c0_267] : memref<2x32x32xf32, #tpu.memory_space<vmem>>, vector<1x32x32xf32>
    %706 = vector.shape_cast %705 : vector<1x32x32xf32> to vector<32x32xf32>
    %c1_268 = arith.constant 1 : index
    %c0_269 = arith.constant 0 : index
    %c0_270 = arith.constant 0 : index
    %707 = vector.load %arg19[%c1_268, %c0_269, %c0_270] : memref<2x32x64xf32, #tpu.memory_space<vmem>>, vector<1x32x64xf32>
    %708 = vector.shape_cast %707 : vector<1x32x64xf32> to vector<32x64xf32>
    %c1_271 = arith.constant 1 : index
    %c0_272 = arith.constant 0 : index
    %c0_273 = arith.constant 0 : index
    %709 = vector.load %arg20[%c1_271, %c0_272, %c0_273] : memref<2x32x32xf32, #tpu.memory_space<vmem>>, vector<1x32x32xf32>
    %710 = vector.shape_cast %709 : vector<1x32x32xf32> to vector<32x32xf32>
    %cst_274 = arith.constant dense<0.000000e+00> : vector<8x32xf32>
    %711 = tpu.matmul %704, %706, %cst_274 {dimension_numbers = #tpu.dot_dimension_numbers<[1], [0], [0], [1], [0, 0, 1, 1], [], []>} : vector<8x32xf32>, vector<32x32xf32>, vector<8x32xf32> -> vector<8x32xf32>
    %cst_275 = arith.constant 0.353553385 : f32
    %712 = vector.broadcast %cst_275 : f32 to vector<8x32xf32>
    %713 = arith.mulf %711, %712 : vector<8x32xf32>
    %cst_276 = arith.constant dense<0.000000e+00> : vector<8x64xf32>
    %714 = tpu.matmul %325, %708, %cst_276 {dimension_numbers = #tpu.dot_dimension_numbers<[1], [0], [0], [1], [0, 0, 1, 1], [], []>} : vector<8x32xf32>, vector<32x64xf32>, vector<8x64xf32> -> vector<8x64xf32>
    %715 = vector.extract_strided_slice %714 {offsets = [0, 0], sizes = [8, 32], strides = [1, 1]} : vector<8x64xf32> to vector<8x32xf32>
    %716 = vector.extract_strided_slice %714 {offsets = [0, 32], sizes = [8, 32], strides = [1, 1]} : vector<8x64xf32> to vector<8x32xf32>
    %cst_277 = arith.constant 0.000000e+00 : f32
    %717 = vector.broadcast %cst_277 : f32 to vector<8x32xf32>
    %718 = vector.extract_strided_slice %713 {offsets = [0, 0], sizes = [8, 8], strides = [1, 1]} : vector<8x32xf32> to vector<8x8xf32>
    %719 = vector.extract_strided_slice %715 {offsets = [0, 0], sizes = [8, 8], strides = [1, 1]} : vector<8x32xf32> to vector<8x8xf32>
    %cst_278 = arith.constant dense<0.000000e+00> : vector<8x8xf32>
    %720 = tpu.matmul %718, %719, %cst_278 {dimension_numbers = #tpu.dot_dimension_numbers<[1], [1], [0], [0], [0, 0, 1, 0], [], []>} : vector<8x8xf32>, vector<8x8xf32>, vector<8x8xf32> -> vector<8x8xf32>
    %cst_279 = arith.constant dense<0xFF800000> : vector<8xf32>
    %721 = vector.multi_reduction <maximumf>, %720, %cst_279 [1] : vector<8x8xf32> to vector<8xf32>
    %722 = vector.shape_cast %721 : vector<8xf32> to vector<8x1xf32>
    %723 = vector.broadcast %722 : vector<8x1xf32> to vector<8x8xf32>
    %724 = arith.subf %720, %723 : vector<8x8xf32>
    %725 = math.exp %724 : vector<8x8xf32>
    %cst_280 = arith.constant dense<0.000000e+00> : vector<8xf32>
    %726 = vector.multi_reduction <add>, %725, %cst_280 [1] : vector<8x8xf32> to vector<8xf32>
    %727 = vector.shape_cast %726 : vector<8xf32> to vector<8x1xf32>
    %728 = tpu.reciprocal %727 {approx = true} : vector<8x1xf32> -> vector<8x1xf32>
    %729 = vector.broadcast %728 : vector<8x1xf32> to vector<8x8xf32>
    %730 = arith.mulf %725, %729 : vector<8x8xf32>
    %731 = vector.extract_strided_slice %716 {offsets = [0, 0], sizes = [8, 8], strides = [1, 1]} : vector<8x32xf32> to vector<8x8xf32>
    %cst_281 = arith.constant dense<0.000000e+00> : vector<8x8xf32>
    %732 = tpu.matmul %730, %731, %cst_281 {dimension_numbers = #tpu.dot_dimension_numbers<[1], [0], [0], [1], [0, 0, 1, 1], [], []>} : vector<8x8xf32>, vector<8x8xf32>, vector<8x8xf32> -> vector<8x8xf32>
    %733 = vector.extract_strided_slice %710 {offsets = [0, 0], sizes = [8, 32], strides = [1, 1]} : vector<32x32xf32> to vector<8x32xf32>
    %cst_282 = arith.constant dense<0.000000e+00> : vector<8x32xf32>
    %734 = tpu.matmul %732, %733, %cst_282 {dimension_numbers = #tpu.dot_dimension_numbers<[1], [0], [0], [1], [0, 0, 1, 1], [], []>} : vector<8x8xf32>, vector<8x32xf32>, vector<8x32xf32> -> vector<8x32xf32>
    %735 = arith.addf %717, %734 : vector<8x32xf32>
    %736 = vector.extract_strided_slice %713 {offsets = [0, 8], sizes = [8, 8], strides = [1, 1]} : vector<8x32xf32> to vector<8x8xf32>
    %737 = vector.extract_strided_slice %715 {offsets = [0, 8], sizes = [8, 8], strides = [1, 1]} : vector<8x32xf32> to vector<8x8xf32>
    %cst_283 = arith.constant dense<0.000000e+00> : vector<8x8xf32>
    %738 = tpu.matmul %736, %737, %cst_283 {dimension_numbers = #tpu.dot_dimension_numbers<[1], [1], [0], [0], [0, 0, 1, 0], [], []>} : vector<8x8xf32>, vector<8x8xf32>, vector<8x8xf32> -> vector<8x8xf32>
    %cst_284 = arith.constant dense<0xFF800000> : vector<8xf32>
    %739 = vector.multi_reduction <maximumf>, %738, %cst_284 [1] : vector<8x8xf32> to vector<8xf32>
    %740 = vector.shape_cast %739 : vector<8xf32> to vector<8x1xf32>
    %741 = vector.broadcast %740 : vector<8x1xf32> to vector<8x8xf32>
    %742 = arith.subf %738, %741 : vector<8x8xf32>
    %743 = math.exp %742 : vector<8x8xf32>
    %cst_285 = arith.constant dense<0.000000e+00> : vector<8xf32>
    %744 = vector.multi_reduction <add>, %743, %cst_285 [1] : vector<8x8xf32> to vector<8xf32>
    %745 = vector.shape_cast %744 : vector<8xf32> to vector<8x1xf32>
    %746 = tpu.reciprocal %745 {approx = true} : vector<8x1xf32> -> vector<8x1xf32>
    %747 = vector.broadcast %746 : vector<8x1xf32> to vector<8x8xf32>
    %748 = arith.mulf %743, %747 : vector<8x8xf32>
    %749 = vector.extract_strided_slice %716 {offsets = [0, 8], sizes = [8, 8], strides = [1, 1]} : vector<8x32xf32> to vector<8x8xf32>
    %cst_286 = arith.constant dense<0.000000e+00> : vector<8x8xf32>
    %750 = tpu.matmul %748, %749, %cst_286 {dimension_numbers = #tpu.dot_dimension_numbers<[1], [0], [0], [1], [0, 0, 1, 1], [], []>} : vector<8x8xf32>, vector<8x8xf32>, vector<8x8xf32> -> vector<8x8xf32>
    %751 = vector.extract_strided_slice %710 {offsets = [8, 0], sizes = [8, 32], strides = [1, 1]} : vector<32x32xf32> to vector<8x32xf32>
    %cst_287 = arith.constant dense<0.000000e+00> : vector<8x32xf32>
    %752 = tpu.matmul %750, %751, %cst_287 {dimension_numbers = #tpu.dot_dimension_numbers<[1], [0], [0], [1], [0, 0, 1, 1], [], []>} : vector<8x8xf32>, vector<8x32xf32>, vector<8x32xf32> -> vector<8x32xf32>
    %753 = arith.addf %735, %752 : vector<8x32xf32>
    %754 = vector.extract_strided_slice %713 {offsets = [0, 16], sizes = [8, 8], strides = [1, 1]} : vector<8x32xf32> to vector<8x8xf32>
    %755 = vector.extract_strided_slice %715 {offsets = [0, 16], sizes = [8, 8], strides = [1, 1]} : vector<8x32xf32> to vector<8x8xf32>
    %cst_288 = arith.constant dense<0.000000e+00> : vector<8x8xf32>
    %756 = tpu.matmul %754, %755, %cst_288 {dimension_numbers = #tpu.dot_dimension_numbers<[1], [1], [0], [0], [0, 0, 1, 0], [], []>} : vector<8x8xf32>, vector<8x8xf32>, vector<8x8xf32> -> vector<8x8xf32>
    %cst_289 = arith.constant dense<0xFF800000> : vector<8xf32>
    %757 = vector.multi_reduction <maximumf>, %756, %cst_289 [1] : vector<8x8xf32> to vector<8xf32>
    %758 = vector.shape_cast %757 : vector<8xf32> to vector<8x1xf32>
    %759 = vector.broadcast %758 : vector<8x1xf32> to vector<8x8xf32>
    %760 = arith.subf %756, %759 : vector<8x8xf32>
    %761 = math.exp %760 : vector<8x8xf32>
    %cst_290 = arith.constant dense<0.000000e+00> : vector<8xf32>
    %762 = vector.multi_reduction <add>, %761, %cst_290 [1] : vector<8x8xf32> to vector<8xf32>
    %763 = vector.shape_cast %762 : vector<8xf32> to vector<8x1xf32>
    %764 = tpu.reciprocal %763 {approx = true} : vector<8x1xf32> -> vector<8x1xf32>
    %765 = vector.broadcast %764 : vector<8x1xf32> to vector<8x8xf32>
    %766 = arith.mulf %761, %765 : vector<8x8xf32>
    %767 = vector.extract_strided_slice %716 {offsets = [0, 16], sizes = [8, 8], strides = [1, 1]} : vector<8x32xf32> to vector<8x8xf32>
    %cst_291 = arith.constant dense<0.000000e+00> : vector<8x8xf32>
    %768 = tpu.matmul %766, %767, %cst_291 {dimension_numbers = #tpu.dot_dimension_numbers<[1], [0], [0], [1], [0, 0, 1, 1], [], []>} : vector<8x8xf32>, vector<8x8xf32>, vector<8x8xf32> -> vector<8x8xf32>
    %769 = vector.extract_strided_slice %710 {offsets = [16, 0], sizes = [8, 32], strides = [1, 1]} : vector<32x32xf32> to vector<8x32xf32>
    %cst_292 = arith.constant dense<0.000000e+00> : vector<8x32xf32>
    %770 = tpu.matmul %768, %769, %cst_292 {dimension_numbers = #tpu.dot_dimension_numbers<[1], [0], [0], [1], [0, 0, 1, 1], [], []>} : vector<8x8xf32>, vector<8x32xf32>, vector<8x32xf32> -> vector<8x32xf32>
    %771 = arith.addf %753, %770 : vector<8x32xf32>
    %772 = vector.extract_strided_slice %713 {offsets = [0, 24], sizes = [8, 8], strides = [1, 1]} : vector<8x32xf32> to vector<8x8xf32>
    %773 = vector.extract_strided_slice %715 {offsets = [0, 24], sizes = [8, 8], strides = [1, 1]} : vector<8x32xf32> to vector<8x8xf32>
    %cst_293 = arith.constant dense<0.000000e+00> : vector<8x8xf32>
    %774 = tpu.matmul %772, %773, %cst_293 {dimension_numbers = #tpu.dot_dimension_numbers<[1], [1], [0], [0], [0, 0, 1, 0], [], []>} : vector<8x8xf32>, vector<8x8xf32>, vector<8x8xf32> -> vector<8x8xf32>
    %cst_294 = arith.constant dense<0xFF800000> : vector<8xf32>
    %775 = vector.multi_reduction <maximumf>, %774, %cst_294 [1] : vector<8x8xf32> to vector<8xf32>
    %776 = vector.shape_cast %775 : vector<8xf32> to vector<8x1xf32>
    %777 = vector.broadcast %776 : vector<8x1xf32> to vector<8x8xf32>
    %778 = arith.subf %774, %777 : vector<8x8xf32>
    %779 = math.exp %778 : vector<8x8xf32>
    %cst_295 = arith.constant dense<0.000000e+00> : vector<8xf32>
    %780 = vector.multi_reduction <add>, %779, %cst_295 [1] : vector<8x8xf32> to vector<8xf32>
    %781 = vector.shape_cast %780 : vector<8xf32> to vector<8x1xf32>
    %782 = tpu.reciprocal %781 {approx = true} : vector<8x1xf32> -> vector<8x1xf32>
    %783 = vector.broadcast %782 : vector<8x1xf32> to vector<8x8xf32>
    %784 = arith.mulf %779, %783 : vector<8x8xf32>
    %785 = vector.extract_strided_slice %716 {offsets = [0, 24], sizes = [8, 8], strides = [1, 1]} : vector<8x32xf32> to vector<8x8xf32>
    %cst_296 = arith.constant dense<0.000000e+00> : vector<8x8xf32>
    %786 = tpu.matmul %784, %785, %cst_296 {dimension_numbers = #tpu.dot_dimension_numbers<[1], [0], [0], [1], [0, 0, 1, 1], [], []>} : vector<8x8xf32>, vector<8x8xf32>, vector<8x8xf32> -> vector<8x8xf32>
    %787 = vector.extract_strided_slice %710 {offsets = [24, 0], sizes = [8, 32], strides = [1, 1]} : vector<32x32xf32> to vector<8x32xf32>
    %cst_297 = arith.constant dense<0.000000e+00> : vector<8x32xf32>
    %788 = tpu.matmul %786, %787, %cst_297 {dimension_numbers = #tpu.dot_dimension_numbers<[1], [0], [0], [1], [0, 0, 1, 1], [], []>} : vector<8x8xf32>, vector<8x32xf32>, vector<8x32xf32> -> vector<8x32xf32>
    %789 = arith.addf %771, %788 : vector<8x32xf32>
    %790 = arith.addf %789, %704 : vector<8x32xf32>
    %791 = vector.extract_strided_slice %592 {offsets = [2, 0], sizes = [1, 32], strides = [1, 1]} : vector<6x32xf32> to vector<1x32xf32>
    %792 = vector.extract_strided_slice %592 {offsets = [3, 0], sizes = [1, 32], strides = [1, 1]} : vector<6x32xf32> to vector<1x32xf32>
    %cst_298 = arith.constant dense<0.000000e+00> : vector<8xf32>
    %793 = vector.multi_reduction <add>, %790, %cst_298 [1] : vector<8x32xf32> to vector<8xf32>
    %794 = vector.shape_cast %793 : vector<8xf32> to vector<8x1xf32>
    %cst_299 = arith.constant 3.200000e+01 : f32
    %795 = vector.broadcast %cst_299 : f32 to vector<8x1xf32>
    %796 = arith.divf %794, %795 : vector<8x1xf32>
    %797 = arith.mulf %790, %790 : vector<8x32xf32>
    %cst_300 = arith.constant dense<0.000000e+00> : vector<8xf32>
    %798 = vector.multi_reduction <add>, %797, %cst_300 [1] : vector<8x32xf32> to vector<8xf32>
    %799 = vector.shape_cast %798 : vector<8xf32> to vector<8x1xf32>
    %cst_301 = arith.constant 3.200000e+01 : f32
    %800 = vector.broadcast %cst_301 : f32 to vector<8x1xf32>
    %801 = arith.divf %799, %800 : vector<8x1xf32>
    %802 = arith.mulf %796, %796 : vector<8x1xf32>
    %803 = arith.subf %801, %802 : vector<8x1xf32>
    %804 = vector.broadcast %796 : vector<8x1xf32> to vector<8x32xf32>
    %805 = arith.subf %790, %804 : vector<8x32xf32>
    %cst_302 = arith.constant 9.99999974E-6 : f32
    %806 = vector.broadcast %cst_302 : f32 to vector<8x1xf32>
    %807 = arith.addf %803, %806 : vector<8x1xf32>
    %808 = math.rsqrt %807 : vector<8x1xf32>
    %809 = vector.broadcast %808 : vector<8x1xf32> to vector<8x32xf32>
    %810 = arith.mulf %805, %809 : vector<8x32xf32>
    %811 = vector.broadcast %791 : vector<1x32xf32> to vector<8x32xf32>
    %812 = arith.mulf %810, %811 : vector<8x32xf32>
    %813 = vector.broadcast %792 : vector<1x32xf32> to vector<8x32xf32>
    %814 = arith.addf %812, %813 : vector<8x32xf32>
    %c1_303 = arith.constant 1 : index
    %c0_304 = arith.constant 0 : index
    %c0_305 = arith.constant 0 : index
    %815 = vector.load %arg22[%c1_303, %c0_304, %c0_305] : memref<2x32x64xf32, #tpu.memory_space<vmem>>, vector<1x32x64xf32>
    %816 = vector.shape_cast %815 : vector<1x32x64xf32> to vector<32x64xf32>
    %c1_306 = arith.constant 1 : index
    %c0_307 = arith.constant 0 : index
    %c0_308 = arith.constant 0 : index
    %817 = vector.load %arg23[%c1_306, %c0_307, %c0_308] : memref<2x1x64xf32, #tpu.memory_space<vmem>>, vector<1x1x64xf32>
    %818 = vector.shape_cast %817 : vector<1x1x64xf32> to vector<1x64xf32>
    %c1_309 = arith.constant 1 : index
    %c0_310 = arith.constant 0 : index
    %c0_311 = arith.constant 0 : index
    %819 = vector.load %arg24[%c1_309, %c0_310, %c0_311] : memref<2x64x32xf32, #tpu.memory_space<vmem>>, vector<1x64x32xf32>
    %820 = vector.shape_cast %819 : vector<1x64x32xf32> to vector<64x32xf32>
    %c1_312 = arith.constant 1 : index
    %c0_313 = arith.constant 0 : index
    %c0_314 = arith.constant 0 : index
    %821 = vector.load %arg25[%c1_312, %c0_313, %c0_314] : memref<2x1x32xf32, #tpu.memory_space<vmem>>, vector<1x1x32xf32>
    %822 = vector.shape_cast %821 : vector<1x1x32xf32> to vector<1x32xf32>
    %cst_315 = arith.constant dense<0.000000e+00> : vector<8x64xf32>
    %823 = tpu.matmul %814, %816, %cst_315 {dimension_numbers = #tpu.dot_dimension_numbers<[1], [0], [0], [1], [0, 0, 1, 1], [], []>} : vector<8x32xf32>, vector<32x64xf32>, vector<8x64xf32> -> vector<8x64xf32>
    %824 = vector.broadcast %818 : vector<1x64xf32> to vector<8x64xf32>
    %825 = arith.addf %823, %824 : vector<8x64xf32>
    %cst_316 = arith.constant 0.000000e+00 : f32
    %826 = vector.broadcast %cst_316 : f32 to vector<8x64xf32>
    %827 = arith.maximumf %825, %826 : vector<8x64xf32>
    %cst_317 = arith.constant dense<0.000000e+00> : vector<8x32xf32>
    %828 = tpu.matmul %827, %820, %cst_317 {dimension_numbers = #tpu.dot_dimension_numbers<[1], [0], [0], [1], [0, 0, 1, 1], [], []>} : vector<8x64xf32>, vector<64x32xf32>, vector<8x32xf32> -> vector<8x32xf32>
    %829 = vector.broadcast %822 : vector<1x32xf32> to vector<8x32xf32>
    %830 = arith.addf %828, %829 : vector<8x32xf32>
    %831 = arith.addf %830, %814 : vector<8x32xf32>
    %832 = vector.extract_strided_slice %592 {offsets = [4, 0], sizes = [1, 32], strides = [1, 1]} : vector<6x32xf32> to vector<1x32xf32>
    %833 = vector.extract_strided_slice %592 {offsets = [5, 0], sizes = [1, 32], strides = [1, 1]} : vector<6x32xf32> to vector<1x32xf32>
    %cst_318 = arith.constant dense<0.000000e+00> : vector<8xf32>
    %834 = vector.multi_reduction <add>, %831, %cst_318 [1] : vector<8x32xf32> to vector<8xf32>
    %835 = vector.shape_cast %834 : vector<8xf32> to vector<8x1xf32>
    %cst_319 = arith.constant 3.200000e+01 : f32
    %836 = vector.broadcast %cst_319 : f32 to vector<8x1xf32>
    %837 = arith.divf %835, %836 : vector<8x1xf32>
    %838 = arith.mulf %831, %831 : vector<8x32xf32>
    %cst_320 = arith.constant dense<0.000000e+00> : vector<8xf32>
    %839 = vector.multi_reduction <add>, %838, %cst_320 [1] : vector<8x32xf32> to vector<8xf32>
    %840 = vector.shape_cast %839 : vector<8xf32> to vector<8x1xf32>
    %cst_321 = arith.constant 3.200000e+01 : f32
    %841 = vector.broadcast %cst_321 : f32 to vector<8x1xf32>
    %842 = arith.divf %840, %841 : vector<8x1xf32>
    %843 = arith.mulf %837, %837 : vector<8x1xf32>
    %844 = arith.subf %842, %843 : vector<8x1xf32>
    %845 = vector.broadcast %837 : vector<8x1xf32> to vector<8x32xf32>
    %846 = arith.subf %831, %845 : vector<8x32xf32>
    %cst_322 = arith.constant 9.99999974E-6 : f32
    %847 = vector.broadcast %cst_322 : f32 to vector<8x1xf32>
    %848 = arith.addf %844, %847 : vector<8x1xf32>
    %849 = math.rsqrt %848 : vector<8x1xf32>
    %850 = vector.broadcast %849 : vector<8x1xf32> to vector<8x32xf32>
    %851 = arith.mulf %846, %850 : vector<8x32xf32>
    %852 = vector.broadcast %832 : vector<1x32xf32> to vector<8x32xf32>
    %853 = arith.mulf %851, %852 : vector<8x32xf32>
    %854 = vector.broadcast %833 : vector<1x32xf32> to vector<8x32xf32>
    %855 = arith.addf %853, %854 : vector<8x32xf32>
    %c0_323 = arith.constant 0 : index
    %c0_324 = arith.constant 0 : index
    %856 = vector.load %arg26[%c0_323, %c0_324] : memref<32x4xf32, #tpu.memory_space<vmem>>, vector<32x4xf32>
    %cst_325 = arith.constant dense<0.000000e+00> : vector<8x4xf32>
    %857 = tpu.matmul %855, %856, %cst_325 {dimension_numbers = #tpu.dot_dimension_numbers<[1], [0], [0], [1], [0, 0, 1, 1], [], []>} : vector<8x32xf32>, vector<32x4xf32>, vector<8x4xf32> -> vector<8x4xf32>
    %c0_326 = arith.constant 0 : index
    %c0_327 = arith.constant 0 : index
    %858 = vector.load %arg27[%c0_326, %c0_327] : memref<1x4xf32, #tpu.memory_space<vmem>>, vector<1x4xf32>
    %859 = vector.broadcast %858 : vector<1x4xf32> to vector<8x4xf32>
    %860 = arith.addf %857, %859 : vector<8x4xf32>
    %c0_328 = arith.constant 0 : index
    %c0_329 = arith.constant 0 : index
    %c0_330 = arith.constant 0 : index
    %861 = vector.load %arg28[%c0_328, %c0_329, %c0_330] : memref<1x8x4xf32, #tpu.memory_space<vmem>>, vector<1x8x4xf32>
    %862 = vector.shape_cast %861 : vector<1x8x4xf32> to vector<8x4xf32>
    %863 = vector.shape_cast %860 : vector<8x4xf32> to vector<1x8x4xf32>
    tpu.vector_store %arg28[%c0_328, %c0_329, %c0_330], %863 {strides = array<i32>} : memref<1x8x4xf32, #tpu.memory_space<vmem>>, vector<1x8x4xf32>,
    return
  }
  func.func @transform_0(%arg0: i32) -> (i32, i32, i32) {
    %c0_i32 = arith.constant 0 : i32
    %c0_i32_0 = arith.constant 0 : i32
    %c0_i32_1 = arith.constant 0 : i32
    return %arg0, %c0_i32, %c0_i32_0 : i32, i32, i32
  }
  func.func @transform_1(%arg0: i32) -> (i32, i32, i32) {
    %c0_i32 = arith.constant 0 : i32
    %c0_i32_0 = arith.constant 0 : i32
    %c0_i32_1 = arith.constant 0 : i32
    return %arg0, %c0_i32, %c0_i32_0 : i32, i32, i32
  }
  func.func @transform_2(%arg0: i32) -> (i32, i32) {
    %c0_i32 = arith.constant 0 : i32
    %c0_i32_0 = arith.constant 0 : i32
    %c0_i32_1 = arith.constant 0 : i32
    return %c0_i32, %c0_i32_0 : i32, i32
  }
  func.func @transform_3(%arg0: i32) -> (i32, i32) {
    %c0_i32 = arith.constant 0 : i32
    %c0_i32_0 = arith.constant 0 : i32
    %c0_i32_1 = arith.constant 0 : i32
    return %c0_i32, %c0_i32_0 : i32, i32
  }
  func.func @transform_4(%arg0: i32) -> (i32, i32) {
    %c0_i32 = arith.constant 0 : i32
    %c0_i32_0 = arith.constant 0 : i32
    %c0_i32_1 = arith.constant 0 : i32
    return %c0_i32, %c0_i32_0 : i32, i32
  }
  func.func @transform_5(%arg0: i32) -> (i32, i32) {
    %c0_i32 = arith.constant 0 : i32
    %c0_i32_0 = arith.constant 0 : i32
    %c0_i32_1 = arith.constant 0 : i32
    return %c0_i32, %c0_i32_0 : i32, i32
  }
  func.func @transform_6(%arg0: i32) -> (i32, i32) {
    %c0_i32 = arith.constant 0 : i32
    %c0_i32_0 = arith.constant 0 : i32
    %c0_i32_1 = arith.constant 0 : i32
    return %c0_i32, %c0_i32_0 : i32, i32
  }
  func.func @transform_7(%arg0: i32) -> (i32, i32) {
    %c0_i32 = arith.constant 0 : i32
    %c0_i32_0 = arith.constant 0 : i32
    %c0_i32_1 = arith.constant 0 : i32
    return %c0_i32, %c0_i32_0 : i32, i32
  }
  func.func @transform_8(%arg0: i32) -> (i32, i32, i32) {
    %c0_i32 = arith.constant 0 : i32
    %c0_i32_0 = arith.constant 0 : i32
    %c0_i32_1 = arith.constant 0 : i32
    %c0_i32_2 = arith.constant 0 : i32
    return %c0_i32, %c0_i32_0, %c0_i32_1 : i32, i32, i32
  }
  func.func @transform_9(%arg0: i32) -> (i32, i32, i32) {
    %c0_i32 = arith.constant 0 : i32
    %c0_i32_0 = arith.constant 0 : i32
    %c0_i32_1 = arith.constant 0 : i32
    %c0_i32_2 = arith.constant 0 : i32
    return %c0_i32, %c0_i32_0, %c0_i32_1 : i32, i32, i32
  }
  func.func @transform_10(%arg0: i32) -> (i32, i32, i32) {
    %c0_i32 = arith.constant 0 : i32
    %c0_i32_0 = arith.constant 0 : i32
    %c0_i32_1 = arith.constant 0 : i32
    %c0_i32_2 = arith.constant 0 : i32
    return %c0_i32, %c0_i32_0, %c0_i32_1 : i32, i32, i32
  }
  func.func @transform_11(%arg0: i32) -> (i32, i32, i32) {
    %c0_i32 = arith.constant 0 : i32
    %c0_i32_0 = arith.constant 0 : i32
    %c0_i32_1 = arith.constant 0 : i32
    %c0_i32_2 = arith.constant 0 : i32
    return %c0_i32, %c0_i32_0, %c0_i32_1 : i32, i32, i32
  }
  func.func @transform_12(%arg0: i32) -> (i32, i32, i32) {
    %c0_i32 = arith.constant 0 : i32
    %c0_i32_0 = arith.constant 0 : i32
    %c0_i32_1 = arith.constant 0 : i32
    %c0_i32_2 = arith.constant 0 : i32
    return %c0_i32, %c0_i32_0, %c0_i32_1 : i32, i32, i32
  }
  func.func @transform_13(%arg0: i32) -> (i32, i32, i32) {
    %c0_i32 = arith.constant 0 : i32
    %c0_i32_0 = arith.constant 0 : i32
    %c0_i32_1 = arith.constant 0 : i32
    %c0_i32_2 = arith.constant 0 : i32
    return %c0_i32, %c0_i32_0, %c0_i32_1 : i32, i32, i32
  }
  func.func @transform_14(%arg0: i32) -> (i32, i32, i32) {
    %c0_i32 = arith.constant 0 : i32
    %c0_i32_0 = arith.constant 0 : i32
    %c0_i32_1 = arith.constant 0 : i32
    %c0_i32_2 = arith.constant 0 : i32
    return %c0_i32, %c0_i32_0, %c0_i32_1 : i32, i32, i32
  }
  func.func @transform_15(%arg0: i32) -> (i32, i32, i32) {
    %c0_i32 = arith.constant 0 : i32
    %c0_i32_0 = arith.constant 0 : i32
    %c0_i32_1 = arith.constant 0 : i32
    %c0_i32_2 = arith.constant 0 : i32
    return %c0_i32, %c0_i32_0, %c0_i32_1 : i32, i32, i32
  }
  func.func @transform_16(%arg0: i32) -> (i32, i32, i32) {
    %c0_i32 = arith.constant 0 : i32
    %c0_i32_0 = arith.constant 0 : i32
    %c0_i32_1 = arith.constant 0 : i32
    %c0_i32_2 = arith.constant 0 : i32
    return %c0_i32, %c0_i32_0, %c0_i32_1 : i32, i32, i32
  }
  func.func @transform_17(%arg0: i32) -> (i32, i32, i32) {
    %c0_i32 = arith.constant 0 : i32
    %c0_i32_0 = arith.constant 0 : i32
    %c0_i32_1 = arith.constant 0 : i32
    %c0_i32_2 = arith.constant 0 : i32
    return %c0_i32, %c0_i32_0, %c0_i32_1 : i32, i32, i32
  }
  func.func @transform_18(%arg0: i32) -> (i32, i32, i32) {
    %c0_i32 = arith.constant 0 : i32
    %c0_i32_0 = arith.constant 0 : i32
    %c0_i32_1 = arith.constant 0 : i32
    %c0_i32_2 = arith.constant 0 : i32
    return %c0_i32, %c0_i32_0, %c0_i32_1 : i32, i32, i32
  }
  func.func @transform_19(%arg0: i32) -> (i32, i32, i32) {
    %c0_i32 = arith.constant 0 : i32
    %c0_i32_0 = arith.constant 0 : i32
    %c0_i32_1 = arith.constant 0 : i32
    %c0_i32_2 = arith.constant 0 : i32
    return %c0_i32, %c0_i32_0, %c0_i32_1 : i32, i32, i32
  }
  func.func @transform_20(%arg0: i32) -> (i32, i32, i32) {
    %c0_i32 = arith.constant 0 : i32
    %c0_i32_0 = arith.constant 0 : i32
    %c0_i32_1 = arith.constant 0 : i32
    %c0_i32_2 = arith.constant 0 : i32
    return %c0_i32, %c0_i32_0, %c0_i32_1 : i32, i32, i32
  }
  func.func @transform_21(%arg0: i32) -> (i32, i32, i32) {
    %c0_i32 = arith.constant 0 : i32
    %c0_i32_0 = arith.constant 0 : i32
    %c0_i32_1 = arith.constant 0 : i32
    %c0_i32_2 = arith.constant 0 : i32
    return %c0_i32, %c0_i32_0, %c0_i32_1 : i32, i32, i32
  }
  func.func @transform_22(%arg0: i32) -> (i32, i32, i32) {
    %c0_i32 = arith.constant 0 : i32
    %c0_i32_0 = arith.constant 0 : i32
    %c0_i32_1 = arith.constant 0 : i32
    %c0_i32_2 = arith.constant 0 : i32
    return %c0_i32, %c0_i32_0, %c0_i32_1 : i32, i32, i32
  }
  func.func @transform_23(%arg0: i32) -> (i32, i32, i32) {
    %c0_i32 = arith.constant 0 : i32
    %c0_i32_0 = arith.constant 0 : i32
    %c0_i32_1 = arith.constant 0 : i32
    %c0_i32_2 = arith.constant 0 : i32
    return %c0_i32, %c0_i32_0, %c0_i32_1 : i32, i32, i32
  }
  func.func @transform_24(%arg0: i32) -> (i32, i32, i32) {
    %c0_i32 = arith.constant 0 : i32
    %c0_i32_0 = arith.constant 0 : i32
    %c0_i32_1 = arith.constant 0 : i32
    %c0_i32_2 = arith.constant 0 : i32
    return %c0_i32, %c0_i32_0, %c0_i32_1 : i32, i32, i32
  }
  func.func @transform_25(%arg0: i32) -> (i32, i32) {
    %c0_i32 = arith.constant 0 : i32
    %c0_i32_0 = arith.constant 0 : i32
    %c0_i32_1 = arith.constant 0 : i32
    return %c0_i32, %c0_i32_0 : i32, i32
  }
  func.func @transform_26(%arg0: i32) -> (i32, i32) {
    %c0_i32 = arith.constant 0 : i32
    %c0_i32_0 = arith.constant 0 : i32
    %c0_i32_1 = arith.constant 0 : i32
    return %c0_i32, %c0_i32_0 : i32, i32
  }
  func.func @transform_27(%arg0: i32) -> (i32, i32, i32) {
    %c0_i32 = arith.constant 0 : i32
    %c0_i32_0 = arith.constant 0 : i32
    %c0_i32_1 = arith.constant 0 : i32
    return %arg0, %c0_i32, %c0_i32_0 : i32, i32, i32
  }
}

</mosaic_0001>

<bundles_post_ra>
// kernel: transformer_forward.1
= control target key start
LH: loop header
LB: loop body
LE: loop exit
PB: predicated region body
PF: predicated region fallthrough
CT: control target
= control target key end

     0   :  { %s11444_s0 = inlined_call_operand.vmem [shape: f32[2,8,4], index: 0, kind: input, shape index: {}]   ;;  %s11445_s1 = inlined_call_operand.vmem [shape: f32[2,8,4], index: 1, kind: input, shape index: {}]   ;;  %s11446_s2 = inlined_call_operand.vmem [shape: f32[8,32], index: 2, kind: input, shape index: {}]   ;;  %s11447_s3 = inlined_call_operand.vmem [shape: f32[8,32], index: 3, kind: input, shape index: {}]   ;;  %s11448_s4 = inlined_call_operand.vmem [shape: f32[4,32], index: 4, kind: input, shape index: {}]   ;;  %s11449_s5 = inlined_call_operand.vmem [shape: f32[1,32], index: 5, kind: input, shape index: {}]   ;;  %s11450_s6 = inlined_call_operand.vmem [shape: f32[4,32], index: 6, kind: input, shape index: {}]   ;;  %s11451_s7 = inlined_call_operand.vmem [shape: f32[1,32], index: 7, kind: input, shape index: {}]   ;;  %s11452_s8 = inlined_call_operand.vmem [shape: f32[2,32,96], index: 8, kind: input, shape index: {}]   ;;  %s11453_s9 = inlined_call_operand.vmem [shape: f32[2,32,32], index: 9, kind: input, shape index: {}]   ;;  %s11454_s10 = inlined_call_operand.vmem [shape: f32[2,4,32], index: 10, kind: input, shape index: {}]   ;;  %s11455_s11 = inlined_call_operand.vmem [shape: f32[2,32,64], index: 11, kind: input, shape index: {}]   ;;  %s11456_s12 = inlined_call_operand.vmem [shape: f32[2,1,64], index: 12, kind: input, shape index: {}]   ;;  %s11457_s13 = inlined_call_operand.vmem [shape: f32[2,64,32], index: 13, kind: input, shape index: {}]   ;;  %s11458_s14 = inlined_call_operand.vmem [shape: f32[2,1,32], index: 14, kind: input, shape index: {}]   ;;  %s11459_s15 = inlined_call_operand.vmem [shape: f32[2,32,96], index: 15, kind: input, shape index: {}]   ;;  %s11460_s16 = inlined_call_operand.vmem [shape: f32[2,32,32], index: 16, kind: input, shape index: {}]   ;;  %s11461_s17 = inlined_call_operand.hbm [shape: f32[2,32,32], index: 17, kind: input, shape index: {}]   ;;  %s11462_s18 = inlined_call_operand.hbm [shape: f32[2,32,64], index: 18, kind: input, shape index: {}]   ;;  %s11463_s19 = inlined_call_operand.hbm [shape: f32[2,32,32], index: 19, kind: input, shape index: {}]   ;;  %s11464_s20 = inlined_call_operand.vmem [shape: f32[2,6,32], index: 20, kind: input, shape index: {}]   ;;  %s11465_s21 = inlined_call_operand.hbm [shape: f32[2,32,64], index: 21, kind: input, shape index: {}]   ;;  %s11466_s22 = inlined_call_operand.hbm [shape: f32[2,1,64], index: 22, kind: input, shape index: {}]   ;;  %s11467_s23 = inlined_call_operand.vmem [shape: f32[2,64,32], index: 23, kind: input, shape index: {}]   ;;  %s11468_s24 = inlined_call_operand.hbm [shape: f32[2,1,32], index: 24, kind: input, shape index: {}]   ;;  %s11469_s25 = inlined_call_operand.vmem [shape: f32[32,4], index: 25, kind: input, shape index: {}]   ;;  %s11470_s26 = inlined_call_operand.vmem [shape: f32[1,4], index: 26, kind: input, shape index: {}]   ;;  %s11471_s27 = inlined_call_operand.vmem [shape: f32[2,8,4], index: 27, kind: output, shape index: {}]  }
   0x1   :  { %11502 = sst [smem:[#allocation17_spill]] %s11444_s0 }
   0x2   :  { %11503 = sst [smem:[#allocation18_spill]] %s11445_s1 }
   0x3   :  { %11504 = sst [smem:[#allocation19_spill]] %s11446_s2 }
   0x4   :  { %11505 = sst [smem:[#allocation20_spill]] %s11447_s3 }
   0x5   :  { %11506 = sst [smem:[#allocation21_spill]] %s11448_s4 }
   0x6   :  { %11507 = sst [smem:[#allocation22_spill]] %s11449_s5 }
   0x7   :  { %11508 = sst [smem:[#allocation23_spill]] %s11450_s6 }
   0x8   :  { %11509 = sst [smem:[#allocation24_spill]] %s11451_s7 }
   0x9   :  { %11510 = sst [smem:[#allocation25_spill]] %s11452_s8 }
   0xa   :  { %11511 = sst [smem:[#allocation26_spill]] %s11453_s9 }
   0xb   :  { %11512 = sst [smem:[#allocation27_spill]] %s11454_s10 }
   0xc   :  { %11513 = sst [smem:[#allocation28_spill]] %s11455_s11 }
   0xd   :  { %11514 = sst [smem:[#allocation29_spill]] %s11461_s17 }
   0xe   :  { %11515 = sst [smem:[#allocation30_spill]] %s11462_s18 }
   0xf   :  { %11516 = sst [smem:[#allocation31_spill]] %s11463_s19 }
  0x10   :  { %11517 = sst [smem:[#allocation32_spill]] %s11465_s21 }
  0x11   :  { %11518 = sst [smem:[#allocation33_spill]] %s11466_s22 }
  0x12   :  { %11519 = sst [smem:[#allocation34_spill]] %s11468_s24 }
  0x13   :  { %32 = vsyncpa [#allocation3], 0 }
  0x14   :  { %33 = vsyncpa [#allocation5], 0 }
  0x15   :  { %34 = vsyncpa [#allocation8], 0 }
  0x16   :  { %35 = vsyncpa [#allocation11], 0  ;;  %s10222_s7 = smov 0  }
  0x17 LB: > { %11520 = sst [smem:[#allocation16_spill]] %s10057_s7  ;;  %s10228_s4 = sadd.s32 4294967295, %s10057_s7   ;;  %s10057_s7 = sphi %s10222_s7, %s41_s7  }
  0x18   : > { %p8651_p0 = scmp.ge.s32.totalorder %s10057_s7, 1  ;;  %p649_p1 = scmp.lt.s32.totalorder %s10057_s7, 3 }
  0x19   : > { %p9720_p2 = scmp.eq.s32.totalorder %s10228_s4, 0  ;;  %s10059_s30 = smov [#allocation4]  }
  0x1a   : > { %p10233_p3 = pnand %p8651_p0, %p649_p1  ;;  %s719_s9 = sshll.u32 %s10059_s30, 4  ;;  %s720_s9 = int_to_ptr.vmem [resolvable:$true] %s719_s9 }
  0x1b   : > { %s10060_s5 = smov [#allocation7]   ;;  %s10061_s10 = smov [#allocation2]  }
  0x1c   : > { %p9701_p4 = pneg %p10233_p3  ;;  %s748_s28 = sshll.u32 %s10060_s5, 4  ;;  %s10239_s28 = int_to_ptr.vmem [resolvable:$true] %s748_s28 }
  0x1d   : > { %s706_s29 = sshll.u32 %s10061_s10, 4  ;;  %s10062_s1 = smov [#allocation6]   ;;  %s10247_s29 = int_to_ptr.vmem [resolvable:$true] %s706_s29 }
  0x1e   : > { %p10243_p5 = pnand %p9720_p2, %p9701_p4  ;;  %s10249_s6 = sshll.u32 %s10062_s1, 4  ;;  %s733_s6 = int_to_ptr.vmem [resolvable:$true] %s10249_s6 }
  0x1f   : > { %s9890_s2 = scalar_lea.vmem %s720_s9, 1024  ;;  %p9898_p10 = scmp.lt.s32.totalorder %s720_s9, %s720_s9 }
  0x20   : > { %p10253_p6 = pneg %p10243_p5  ;;  %p9891_p7 = scmp.ne.s32.totalorder %s720_s9, %s9890_s2 }
  0x21   : > { %p9899_p11 = scmp.lt.s32.totalorder %s9890_s2, %s9890_s2 }
  0x22   : > { %p9893_p8 = pnand %p9891_p7, %p10253_p6 }
  0x23   : > { %p9900_p12 = por %p9899_p11, %p9898_p10 }
  0x24   : > { %p9894_p9 = pneg %p9893_p8 }
  0x26   : > { %p9901_p13 = pnand %p9900_p12, %p9894_p9 }
  0x28   : > { %9904 = shalt.err (!%p9901_p13)
}
  0x29   : > { %s10063_s3 = smov 128   ;;  %s10064_s30 = smov 8  }
  0x2a   : > { %s11524_s18 = sld [smem:[#allocation30_spill]]  ;;  %s9916_s1 = scalar_lea.vmem %s10239_s28, 1024 }
  0x2b   : > { %p9917_p0 = scmp.ne.s32.totalorder %s10239_s28, %s9916_s1  ;;  %p9924_p7 = scmp.lt.s32.totalorder %s10239_s28, %s10239_s28 }
  0x2c   : > { %p9925_p8 = scmp.lt.s32.totalorder %s9916_s1, %s9916_s1 }
  0x2d   : > { %p9919_p1 = pnand %p9917_p0, %p10253_p6 }
  0x2e   : > { %p9926_p9 = por %p9925_p8, %p9924_p7 }
  0x2f   : > { %p9920_p4 = pneg %p9919_p1 }
  0x30   : > { %9707 = dma.hbm_to_vmem [thread:$0]  (!%p10243_p5), %s11524_s18, 1024, %s720_s9, [#allocation5], %s10063_s3, %s10063_s3, %s10064_s30  }
  0x31   : > { %p9927_p10 = pnand %p9926_p9, %p9920_p4 }
  0x33   : > { %9930 = shalt.err (!%p9927_p10)
}
  0x34   : > { %s11525_s21 = sld [smem:[#allocation32_spill]]  ;;  %s9942_s9 = scalar_lea.vmem %s10247_s29, 1024 }
  0x35   : > { %p9943_p11 = scmp.ne.s32.totalorder %s10247_s29, %s9942_s9  ;;  %p9950_p0 = scmp.lt.s32.totalorder %s10247_s29, %s10247_s29 }
  0x36   : > { %p9951_p1 = scmp.lt.s32.totalorder %s9942_s9, %s9942_s9 }
  0x37   : > { %p9945_p12 = pnand %p9943_p11, %p10253_p6 }
  0x38   : > { %p9952_p4 = por %p9951_p1, %p9950_p0 }
  0x39   : > { %p9946_p13 = pneg %p9945_p12 }
  0x3a   : > { %9713 = dma.hbm_to_vmem [thread:$0]  (!%p10243_p5), %s11525_s21, 1024, %s10239_s28, [#allocation8], %s10063_s3, %s10063_s3, %s10064_s30  }
  0x3b   : > { %p9953_p7 = pnand %p9952_p4, %p9946_p13 }
  0x3d   : > { %9956 = shalt.err (!%p9953_p7)
}
  0x3e   : > { %s11526_s17 = sld [smem:[#allocation29_spill]]  ;;  %s9968_s28 = scalar_lea.vmem %s733_s6, 1024 }
  0x3f   : > { %p9969_p8 = scmp.ne.s32.totalorder %s733_s6, %s9968_s28  ;;  %p9976_p11 = scmp.lt.s32.totalorder %s733_s6, %s733_s6 }
  0x40   : > { %p9977_p12 = scmp.lt.s32.totalorder %s9968_s28, %s9968_s28 }
  0x41   : > { %p9971_p9 = pnand %p9969_p8, %p10253_p6 }
  0x42   : > { %p9978_p13 = por %p9977_p12, %p9976_p11 }
  0x43   : > { %p9972_p10 = pneg %p9971_p9 }
  0x44   : > { %9704 = dma.hbm_to_vmem [thread:$0]  (!%p10243_p5), %s11526_s17, 1024, %s10247_s29, [#allocation3], %s10063_s3, %s10063_s3, %s10064_s30  }
  0x45   : > { %p9979_p0 = pnand %p9978_p13, %p9972_p10 }
  0x47   : > { %9982 = shalt.err (!%p9979_p0)
}
  0x48   : > { %s11527_s19 = sld [smem:[#allocation31_spill]]  ;;  %s10065_s29 = smov [#allocation9]  }
  0x49   : > { %s761_s9 = sshll.u32 %s10065_s29, 4  ;;  %s762_s9 = int_to_ptr.vmem [resolvable:$true] %s761_s9 }
  0x4a   : > { %s9994_s10 = scalar_lea.vmem %s762_s9, 32  ;;  %p10002_p8 = scmp.lt.s32.totalorder %s762_s9, %s762_s9 }
  0x4b   : > { %p9995_p1 = scmp.ne.s32.totalorder %s762_s9, %s9994_s10  ;;  %p10003_p9 = scmp.lt.s32.totalorder %s9994_s10, %s9994_s10 }
  0x4d   : > { %p9997_p4 = pnand %p9995_p1, %p10253_p6  ;;  %p10004_p10 = por %p10003_p9, %p10002_p8 }
  0x4e   : > { %9710 = dma.hbm_to_vmem [thread:$0]  (!%p10243_p5), %s11527_s19, 1024, %s733_s6, [#allocation5], %s10063_s3, %s10063_s3, %s10064_s30  }
  0x4f   : > { %p9998_p7 = pneg %p9997_p4 }
  0x51   : > { %p10005_p11 = pnand %p10004_p10, %p9998_p7 }
  0x53   : > { %10008 = shalt.err (!%p10005_p11)
}
  0x54   : > { %s10066_s1 = smov 16   ;;  %s10067_s28 = smov 1  }
  0x55   : > { %s11528_s22 = sld [smem:[#allocation33_spill]]  ;;  %s10068_s3 = smov [#allocation10]  }
  0x56   : > { %s777_s30 = sshll.u32 %s10068_s3, 4  ;;  %s778_s30 = int_to_ptr.vmem [resolvable:$true] %s777_s30 }
  0x57   : > { %s10020_s5 = scalar_lea.vmem %s778_s30, 32  ;;  %p10028_p1 = scmp.lt.s32.totalorder %s778_s30, %s778_s30 }
  0x58   : > { %p10021_p12 = scmp.ne.s32.totalorder %s778_s30, %s10020_s5  ;;  %p10029_p4 = scmp.lt.s32.totalorder %s10020_s5, %s10020_s5 }
  0x5a   : > { %p10023_p13 = pnand %p10021_p12, %p10253_p6  ;;  %p10030_p7 = por %p10029_p4, %p10028_p1 }
  0x5b   : > { %9716 = dma.hbm_to_vmem [thread:$0]  (!%p10243_p5), %s11528_s22, 32, %s762_s9, [#allocation8], %s10066_s1, %s10066_s1, %s10067_s28  }
  0x5c   : > { %p10024_p0 = pneg %p10023_p13 }
  0x5e   : > { %p10031_p8 = pnand %p10030_p7, %p10024_p0 }
  0x60   : > { %10034 = shalt.err (!%p10031_p8)
}
  0x61   : > { %s11529_s24 = sld [smem:[#allocation34_spill]] }
  0x63   : > { %813 = sbr.rel (%p10233_p3) target bundleno = 17753 (0x4559), region = 128 }
  0x67   : > { %9719 = dma.hbm_to_vmem [thread:$0]  (!%p10243_p5), %s11529_s24, 32, %s778_s30, [#allocation11], %s10066_s1, %s10066_s1, %s10067_s28  }
  0x68   : > { %10040 = dma.done.wait (%p9720_p2), [#allocation3], 1024  }
  0x69   : > { %10042 = vsyncadd (%p9720_p2), [#allocation3], 4294966272 }
  0x6a   : > { %10044 = dma.done.wait (%p9720_p2), [#allocation5], 2048  }
  0x6b   : > { %10046 = vsyncadd (%p9720_p2), [#allocation5], 4294965248 }
  0x6c   : > { %10048 = dma.done.wait (%p9720_p2), [#allocation8], 1056  }
  0x6d   : > { %10050 = vsyncadd (%p9720_p2), [#allocation8], 4294966240 }
  0x6e   : > { %10052 = dma.done.wait (%p9720_p2), [#allocation11], 32  }
  0x6f   : > { %10054 = vsyncadd (%p9720_p2), [#allocation11], 4294967264  ;;  %p907_p3 = scmp.lt.s32.totalorder %s10228_s4, 1  ;;  %v10069_v0 = vmov 0.0   ;;  %vm10070_vm0 = vmmov 0   ;;  %vm937_vm1 = vcmask 1043456  }
  0x70   : > { %9088 = vmatprep.subr.mxu0 %v10069_v0  ;;  %9090 = vmatprep.mubr.msk.f32.mxu0 %vm10070_vm0, %v10069_v0  ;;  %s11530_s9 = sld [smem:[#allocation17_spill]]  ;;  %vm933_vm2 = vcmask 31744   ;;  %vm1108_vm3 = vcmask 261120   ;;  %s11494_s28 = smov 96   ;;  %vm1186_vm4 = vcmask 64512   ;;  %vm2265_vm5 = vcmask 523264  }
  0x71   : > { %s11555_s4 = smov (!%p907_p3, %s10228_s4), 1  ;;  %9093 = vmatprep.subr.mxu1 %v10069_v0  ;;  %9095 = vmatprep.mubr.msk.f32.mxu1 %vm10070_vm0, %v10069_v0  ;;  %s11531_s6 = sld [smem:[#allocation21_spill]] }
  0x72   : > { %s10348_s8 = sshll.u32 %s11555_s4, 3  ;;  %s11532_s5 = sld [smem:[#allocation25_spill]] }
  0x73   : > { %s11533_s2 = sld [smem:[#allocation22_spill]]  ;;  %s11490_s3 = smov 56  }
  0x74   : > { %s11534_s30 = sld [smem:[#allocation19_spill]]  ;;  %s11484_s4 = smov 80  }
  0x75   : > { %s11535_s10 = sld [smem:[#allocation23_spill]]  ;;  %s11488_s29 = smov 112  }
  0x76   : > { %s910_s1 = scalar_lea.vmem %s11530_s9, %s10348_s8  ;;  %s11536_s9 = sld [smem:[#allocation18_spill]] }
  0x77   : > { %v925_v1 = vld [vmem:[%s11531_s6] sm:$0xf]  ;;  %s11496_s6 = smov 88   ;;  %s11537_s11 = sld [smem:[#allocation26_spill]] }
  0x78   : > { %v923_v2 = vld [vmem:[%s910_s1] sm:$0xff]  ;;  %v1103_v3 = vld [vmem:[%s11532_s5 + $0x18] sm:$0xff]  ;;  %9089 = vmatpush3.msk.msra.mxu0 %vm937_vm1, %v925_v1  ;;  %v1102_v4 = vld [vmem:[%s11532_s5 + $0x10] sm:$0xff]  ;;  %s11478_s0 = smov 104   ;;  %s11549_s17 = smov 40  }
  0x79   : > { %9091 = vmatmul.mubr.msk.f32.vlgmr.msra.gmra.mxu0 %vm933_vm2, %v923_v2  ;;  %9098 = vmatprep.subr.mxu0 %v10069_v0  ;;  %v1101_v5 = vld [vmem:[%s11532_s5 + $0x8] sm:$0xff]  ;;  %v1100_v6 = vld [vmem:[%s11532_s5] sm:$0xff]  ;;  %s11550_s19 = sld [smem:[#allocation24_spill]]  ;;  %s11552_s18 = smov 88  }
  0x7a   : > { %9099 = vmatpush3.msra.mxu0 %v1103_v3  ;;  %9106 = vmatprep.mubr.msk.f32.mxu0 %vm10070_vm0, %v10069_v0  ;;  %v8669_v7 = vld [vmem:[%s11533_s2] ss:$0 sm:$0xff]  ;;  %s11492_s2 = smov 120  }
  0x7b   : > { %9100 = vmatprep.subr.mxu0 %v10069_v0  ;;  %v1011_v9 = vld [vmem:[%s11534_s30] sm:$0xff]  ;;  %s11486_s30 = smov 64  }
  0x7c   : > { %9101 = vmatpush3.msra.mxu0 %v1102_v4  ;;  %v1013_v13 = vld [vmem:[%s11535_s10] sm:$0xf]  ;;  %s914_s1 = scalar_lea.vmem %s11536_s9, %s10348_s8  ;;  %s11476_s10 = smov 72  }
  0x7d   : > { %9102 = vmatprep.subr.mxu0 %v10069_v0  ;;  %9094 = vmatpush3.msk.msra.mxu1 %vm937_vm1, %v1013_v13  ;;  %v924_v14 = vld [vmem:[%s914_s1] sm:$0xff]  ;;  %v1105_v48 = vld [vmem:[%s11537_s11 + $0x8] sm:$0xff]  ;;  %s11482_s9 = smov 48   ;;  %s11551_s1 = sld [smem:[#allocation20_spill]] }
  0x7e   : > { %9103 = vmatpush3.msra.mxu0 %v1101_v5  ;;  %9096 = vmatmul.mubr.msk.f32.vlgmr.msra.gmra.mxu1 %vm933_vm2, %v924_v14  ;;  %v1104_v47 = vld [vmem:[%s11537_s11] sm:$0xff] }
  0x7f   : > { %9104 = vmatprep.subr.mxu0 %v10069_v0  ;;  %9109 = vmatprep.subr.mxu1 %v10069_v0 }
  0x80   : > { %9105 = vmatpush3.msra.mxu0 %v1100_v6  ;;  %9111 = vmatprep.mubr.msk.f32.mxu1 %vm10070_vm0, %v10069_v0 }
  0x81   : > { %9119 = vmatprep.subr.mxu0 %v10069_v0 }
 0x139   : > { %v1007_v8 = vpop.f32.mrf.mxu0 }
 0x13a   : > { %v1008_v10 = vadd.f32 %v8669_v7, %v1007_v8 }
 0x13b   : > { %v9092_v11 = vpop.f32.mrf.mxu0 }
 0x13c   : > { %v10384_v12 = vadd.f32 %v1011_v9, %v1008_v10  ;;  %v1106_v11 = vld [vmem:[%s11537_s11 + $0x10] sm:$0xff] }
 0x13e   : > { %9107 = vmatmul.mubr.msk.f32.vlgmr.msra.gmra.mxu0 %vm1108_vm3, %v10384_v12  ;;  %v10413_v18 = vpop.f32.mrf.mxu1 }
 0x13f   : > { %9121 = vmatprep.mubr.msk.f32.mxu0 %vm10070_vm0, %v10069_v0 }
 0x140   : > { %v9097_v19 = vpop.f32.mrf.mxu1 }
 0x1fe   : > { %v10402_v15 = vpop.f32.mrf.mxu0 }
 0x1ff   : > { %1184 = vrot.lane.b32.xlu0 %v10402_v15, %s11494_s28  ;;  %v10407_v16 = vmul.f32 0.35355338, %v10402_v15  ;;  %s11540_s28 = smov 96  }
 0x200   : > { %v9108_v17 = vpop.f32.mrf.mxu0 }
 0x201   : > { %1349 = vrot.lane.b32.xlu1 %v10407_v16, %s11492_s2  ;;  %s11545_s2 = smov 80  }
 0x203   : > { %1351 = vrot.lane.b32.xlu0 %v10402_v15, %s11496_s6 }
 0x271   : > { %v1185_v20 = vpop.permute.xlu0 %1184 }
 0x272   : > { %9110 = vmatpush3.xpose.msk.msra.mxu1 %vm1186_vm4, %v1185_v20 }
 0x273   : > { %9114 = vmatprep.subr.mxu1 %v10069_v0  ;;  %v1350_v22 = vpop.permute.xlu1 %1349 }
 0x275   : > { %v1352_v21 = vpop.permute.xlu0 %1351  ;;  %9112 = vmatmul.mubr.msk.f32.vlgmr.msra.gmra.mxu1 %vm1186_vm4, %v10407_v16 }
 0x276   : > { %9120 = vmatpush3.xpose.msk.msra.mxu0 %vm1186_vm4, %v1352_v21  ;;  %9116 = vmatprep.mubr.msk.f32.mxu1 %vm10070_vm0, %v10069_v0 }
 0x277   : > { %9129 = vmatprep.subr.mxu0 %v10069_v0 }
 0x279   : > { %9122 = vmatmul.mubr.msk.f32.vlgmr.msra.gmra.mxu0 %vm1186_vm4, %v1350_v22 }
 0x27a   : > { %9131 = vmatprep.mubr.msk.f32.mxu0 %vm10070_vm0, %v10069_v0  ;;  %9130 = vmatpush3.msra.mxu0 %v1105_v48  ;;  %v2173_v48 = vld [vmem:[%s11457_s13 + $0x18] sm:$0xff] }
 0x27b   : > { %9139 = vmatprep.subr.mxu0 %v10069_v0 }
 0x335   : > { %v1258_v23 = vpop.f32.mrf.mxu1 }
 0x336   : > { %v1262_v24 = vsel %vm1186_vm4, %v1258_v23, -inf }
 0x337   : > { %1263 = vmax.xlane.f32.xlu1 %v1262_v24  ;;  %v9113_v25 = vpop.f32.mrf.mxu1 }
 0x339   : > { %v1423_v26 = vpop.f32.mrf.mxu0 }
 0x33a   : > { %v1427_v27 = vsel %vm1186_vm4, %v1423_v26, -inf }
 0x33b   : > { %1428 = vmax.xlane.f32.xlu0 %v1427_v27  ;;  %v9123_v28 = vpop.f32.mrf.mxu0 }
 0x3c0   : > { %v1264_v29 = vpop.xlane.xlu1 %1263 }
 0x3c1   : > { %v1265_v30 = vsub.f32 %v1258_v23, %v1264_v29 }
 0x3c3   : > { %v1266_v31 = vmul.f32 1.442695, %v1265_v30 }
 0x3c4   : > { %v1429_v32 = vpop.xlane.xlu0 %1428 }
 0x3c5   : > { %9763 = vpow2.f32 %v1266_v31  ;;  %v1430_v33 = vsub.f32 %v1423_v26, %v1429_v32  ;;  %v1107_v26 = vld [vmem:[%s11537_s11 + $0x18] sm:$0xff] }
 0x3c7   : > { %v1431_v34 = vmul.f32 1.442695, %v1430_v33 }
 0x3c9   : > { %9765 = vpow2.f32 %v1431_v34 }
 0x3d2   : > { %v9764_v35 = vpop.eup %9763 }
 0x3d3   : > { %v1268_v36 = vsel %vm1186_vm4, %v9764_v35, 0.0 }
 0x3d4   : > { %1269 = vadd.xlane.f32.xlu0 %v1268_v36 }
 0x3d6   : > { %v9766_v37 = vpop.eup %9765 }
 0x3d7   : > { %v1433_v38 = vsel %vm1186_vm4, %v9766_v37, 0.0 }
 0x3d8   : > { %1434 = vadd.xlane.f32.xlu1 %v1433_v38 }
 0x3e9   : > { %1438 = vrot.lane.b32.xlu1 %v10402_v15, %s11490_s3  ;;  %s11548_s3 = smov 72  }
 0x3ea   : > { %1273 = vrot.lane.b32.xlu0 %v10402_v15, %s11486_s30  ;;  %s11544_s30 = smov 64  }
 0x3ed   : > { %1662 = vrot.lane.b32.xlu1 %v10402_v15, %s11484_s4  ;;  %s11541_s4 = smov 120  }
 0x3ee   : > { %1660 = vrot.lane.b32.xlu0 %v10407_v16, %s11488_s29  ;;  %s11539_s29 = sld [smem:[#allocation27_spill]] }
 0x45d   : > { %v1270_v39 = vpop.xlane.xlu0 %1269 }
 0x45e   : > { %9767 = vrcp.f32 %v1270_v39 }
 0x461   : > { %v1435_v40 = vpop.xlane.xlu1 %1434  ;;  %v1274_v41 = vpop.permute.xlu0 %1273 }
 0x462   : > { %9769 = vrcp.f32 %v1435_v40  ;;  %9115 = vmatpush3.msra.mxu1 %v1274_v41 }
 0x463   : > { %9124 = vmatprep.subr.mxu1 %v10069_v0 }
 0x465   : > { %v1439_v44 = vpop.permute.xlu1 %1438  ;;  %v1661_v54 = vpop.permute.xlu0 %1660 }
 0x469   : > { %v1663_v52 = vpop.permute.xlu1 %1662 }
 0x46b   : > { %v9768_v42 = vpop.eup %9767 }
 0x46c   : > { %v1272_v43 = vmul.f32 %v9768_v42, %v9764_v35 }
 0x46e   : > { %9117 = vmatmul.mubr.msk.f32.vlgmr.msra.gmra.mxu1 %vm1186_vm4, %v1272_v43 }
 0x46f   : > { %v9770_v45 = vpop.eup %9769  ;;  %9125 = vmatpush3.msra.mxu1 %v1439_v44  ;;  %9126 = vmatprep.mubr.msk.f32.mxu1 %vm10070_vm0, %v10069_v0  ;;  %v2177_v44 = vld [vmem:[%s11457_s13 + $0x38] sm:$0xff] }
 0x470   : > { %v1437_v46 = vmul.f32 %v9770_v45, %v9766_v37  ;;  %9134 = vmatprep.subr.mxu1 %v10069_v0  ;;  %v2176_v45 = vld [vmem:[%s11457_s13 + $0x30] sm:$0xff] }
 0x472   : > { %9127 = vmatmul.mubr.msk.f32.vlgmr.msra.gmra.mxu1 %vm1186_vm4, %v1437_v46  ;;  %v2175_v46 = vld [vmem:[%s11457_s13 + $0x28] sm:$0xff] }
 0x473   : > { %9136 = vmatprep.mubr.msk.f32.mxu1 %vm10070_vm0, %v10069_v0  ;;  %9135 = vmatpush3.msra.mxu1 %v1104_v47  ;;  %v2174_v47 = vld [vmem:[%s11457_s13 + $0x20] sm:$0xff] }
 0x474   : > { %9144 = vmatprep.subr.mxu1 %v10069_v0 }
 0x52e   : > { %v1345_v49 = vpop.f32.mrf.mxu1 }
 0x52f   : > { %9137 = vmatmul.mubr.msk.f32.vlgmr.msra.gmra.mxu1 %vm1186_vm4, %v1345_v49 }
 0x530   : > { %v9118_v50 = vpop.f32.mrf.mxu1  ;;  %9146 = vmatprep.mubr.msk.f32.mxu1 %vm10070_vm0, %v10069_v0 }
 0x532   : > { %v1510_v51 = vpop.f32.mrf.mxu1 }
 0x533   : > { %9132 = vmatmul.mubr.msk.f32.vlgmr.msra.gmra.mxu0 %vm1186_vm4, %v1510_v51 }
 0x534   : > { %9140 = vmatpush3.xpose.msk.msra.mxu0 %vm1186_vm4, %v1663_v52  ;;  %v9128_v53 = vpop.f32.mrf.mxu1  ;;  %9141 = vmatprep.mubr.msk.f32.mxu0 %vm10070_vm0, %v10069_v0 }
 0x535   : > { %9149 = vmatprep.subr.mxu0 %v10069_v0 }
 0x537   : > { %9142 = vmatmul.mubr.msk.f32.vlgmr.msra.gmra.mxu0 %vm1186_vm4, %v1661_v54 }
 0x538   : > { %9151 = vmatprep.mubr.msk.f32.mxu0 %vm10070_vm0, %v10069_v0  ;;  %9150 = vmatpush3.msra.mxu0 %v1106_v11 }
 0x539   : > { %9159 = vmatprep.subr.mxu0 %v10069_v0 }
 0x5ef   : > { %v1656_v55 = vpop.f32.mrf.mxu1 }
 0x5f1   : > { %v9138_v56 = vpop.f32.mrf.mxu1 }
 0x5f2   : > { %v919_v56 = vlaneseq }
 0x5f3   : > { %v1583_v57 = vpop.f32.mrf.mxu0 }
 0x5f4   : > { %v1657_v58 = vadd.f32 %v1656_v55, %v1583_v57  ;;  %v10544_v57 = vshrl.u32 %v919_v56, 7 }
 0x5f5   : > { %v9133_v59 = vpop.f32.mrf.mxu0 }
 0x5f6   : > { %v10552_v59 = vld [vmem:[%s11539_s29] sm:$0xf] }
 0x5f7   : > { %v1734_v60 = vpop.f32.mrf.mxu0 }
 0x5f8   : > { %v1738_v61 = vsel %vm1186_vm4, %v1734_v60, -inf }
 0x5f9   : > { %1739 = vmax.xlane.f32.xlu1 %v1738_v61  ;;  %v9143_v62 = vpop.f32.mrf.mxu0 }
 0x60a   : > { %1901 = vrot.lane.b32.xlu1 %v10402_v15, %s11476_s10  ;;  %s11543_s10 = smov 112  }
 0x60e   : > { %1899 = vrot.lane.b32.xlu1 %v10407_v16, %s11478_s0  ;;  %s11480_s0 = smov 40  }
 0x682   : > { %v1740_v63 = vpop.xlane.xlu1 %1739 }
 0x683   : > { %v1741_v1 = vsub.f32 %v1734_v60, %v1740_v63  ;;  %v10555_v60 = vsub.s32 1, %v10544_v57 }
 0x685   : > { %v1742_v2 = vmul.f32 1.442695, %v1741_v1 }
 0x686   : > { %v1902_v8 = vpop.permute.xlu1 %1901 }
 0x687   : > { %9771 = vpow2.f32 %v1742_v2  ;;  %v2163_v2 = vrot.slane %v10552_v59, %v10555_v60 }
 0x68a   : > { %v1900_v10 = vpop.permute.xlu1 %1899 }
 0x694   : > { %v9772_v3 = vpop.eup %9771 }
 0x695   : > { %v1744_v4 = vsel %vm1186_vm4, %v9772_v3, 0.0 }
 0x696   : > { %1745 = vadd.xlane.f32.xlu0 %v1744_v4 }
 0x6ac   : > { %1749 = vrot.lane.b32.xlu0 %v10402_v15, %s11482_s9  ;;  %s11542_s9 = smov 56  }
 0x71f   : > { %v1746_v5 = vpop.xlane.xlu0 %1745 }
 0x720   : > { %9773 = vrcp.f32 %v1746_v5  ;;  %v2172_v5 = vld [vmem:[%s11457_s13 + $0x10] sm:$0xff] }
 0x723   : > { %v1750_v6 = vpop.permute.xlu0 %1749 }
 0x724   : > { %9145 = vmatpush3.msra.mxu1 %v1750_v6  ;;  %v2171_v6 = vld [vmem:[%s11457_s13 + $0x8] sm:$0xff] }
 0x725   : > { %9154 = vmatprep.subr.mxu1 %v10069_v0 }
 0x72d   : > { %v9774_v7 = vpop.eup %9773 }
 0x72e   : > { %v1748_v9 = vmul.f32 %v9774_v7, %v9772_v3  ;;  %v2170_v7 = vld [vmem:[%s11457_s13] sm:$0xff] }
 0x730   : > { %9147 = vmatmul.mubr.msk.f32.vlgmr.msra.gmra.mxu1 %vm1186_vm4, %v1748_v9 }
 0x731   : > { %9155 = vmatpush3.xpose.msk.msra.mxu1 %vm1186_vm4, %v1902_v8  ;;  %9156 = vmatprep.mubr.msk.f32.mxu1 %vm10070_vm0, %v10069_v0  ;;  %v8692_v8 = vld [vmem:[%s11456_s12] ss:$0 sm:$0xff] }
 0x732   : > { %9164 = vmatprep.subr.mxu1 %v10069_v0 }
 0x734   : > { %9157 = vmatmul.mubr.msk.f32.vlgmr.msra.gmra.mxu1 %vm1186_vm4, %v1900_v10 }
 0x735   : > { %9166 = vmatprep.mubr.msk.f32.mxu1 %vm10070_vm0, %v10069_v0  ;;  %9165 = vmatpush3.msra.mxu1 %v1107_v26  ;;  %v8698_v26 = vld [vmem:[%s11532_s5 + $0x28] sm:$0xff] }
 0x736   : > { %9180 = vmatprep.subr.mxu1 %v10069_v0 }
 0x7f0   : > { %v1821_v13 = vpop.f32.mrf.mxu1 }
 0x7f1   : > { %9152 = vmatmul.mubr.msk.f32.vlgmr.msra.gmra.mxu0 %vm1186_vm4, %v1821_v13 }
 0x7f2   : > { %v9148_v14 = vpop.f32.mrf.mxu1  ;;  %9161 = vmatprep.mubr.msk.f32.mxu0 %vm10070_vm0, %v10069_v0 }
 0x7f3   : > { %v8694_v14 = vld [vmem:[%s11458_s14] ss:$0 sm:$0xff] }
 0x7f4   : > { %v1973_v16 = vpop.f32.mrf.mxu1 }
 0x7f5   : > { %v1977_v17 = vsel %vm1186_vm4, %v1973_v16, -inf }
 0x7f6   : > { %1978 = vmax.xlane.f32.xlu0 %v1977_v17  ;;  %v9158_v19 = vpop.f32.mrf.mxu1 }
 0x80c   : > { %1988 = vrot.lane.b32.xlu0 %v10402_v15, %s11480_s0  ;;  %s11538_s0 = sld [smem:[#allocation28_spill]] }
 0x812   : > { %v2168_v41 = vld [vmem:[%s11538_s0 + $0x18] sm:$0xff]  ;;  %v2167_v42 = vld [vmem:[%s11538_s0 + $0x10] sm:$0xff]  ;;  %v2165_v43 = vld [vmem:[%s11538_s0] sm:$0xff] }
 0x87f   : > { %v1979_v20 = vpop.xlane.xlu0 %1978 }
 0x880   : > { %v1980_v21 = vsub.f32 %v1973_v16, %v1979_v20 }
 0x882   : > { %v1981_v22 = vmul.f32 1.442695, %v1980_v21 }
 0x883   : > { %v1989_v23 = vpop.permute.xlu0 %1988 }
 0x884   : > { %9775 = vpow2.f32 %v1981_v22  ;;  %9160 = vmatpush3.msra.mxu0 %v1989_v23 }
 0x885   : > { %9169 = vmatprep.subr.mxu0 %v10069_v0 }
 0x891   : > { %v9776_v24 = vpop.eup %9775 }
 0x892   : > { %v1983_v25 = vsel %vm1186_vm4, %v9776_v24, 0.0 }
 0x893   : > { %1984 = vadd.xlane.f32.xlu1 %v1983_v25  ;;  %v8699_v25 = vld [vmem:[%s11532_s5 + $0x30] sm:$0xff] }
 0x8b1   : > { %v1894_v15 = vpop.f32.mrf.mxu0 }
 0x8b2   : > { %v1898_v27 = vadd.f32 %v1894_v15, %v1657_v58  ;;  %v10547_v58 = vsub.s32 0, %v10544_v57  ;;  %v8697_v15 = vld [vmem:[%s11532_s5 + $0x20] sm:$0xff] }
 0x8b3   : > { %v9153_v28 = vpop.f32.mrf.mxu0 }
 0x8b4   : > { %v2158_v62 = vrot.slane %v10552_v59, %v10547_v58 }
 0x91c   : > { %v1985_v29 = vpop.xlane.xlu1 %1984 }
 0x91d   : > { %9777 = vrcp.f32 %v1985_v29 }
 0x92a   : > { %v9778_v30 = vpop.eup %9777 }
 0x92b   : > { %v1987_v31 = vmul.f32 %v9778_v30, %v9776_v24  ;;  %v8700_v24 = vld [vmem:[%s11532_s5 + $0x38] sm:$0xff]  ;;  %s11546_s5 = smov 48  }
 0x92d   : > { %9162 = vmatmul.mubr.msk.f32.vlgmr.msra.gmra.mxu0 %vm1186_vm4, %v1987_v31 }
 0x92e   : > { %9177 = vmatprep.mubr.msk.f32.mxu0 %vm10070_vm0, %v10069_v0  ;;  %9170 = vmatpush3.msra.mxu0 %v2168_v41 }
 0x92f   : > { %9171 = vmatprep.subr.mxu0 %v10069_v0 }
 0x930   : > { %9172 = vmatpush3.msra.mxu0 %v2167_v42 }
 0x931   : > { %9173 = vmatprep.subr.mxu0 %v10069_v0 }
 0x9ed   : > { %v2060_v32 = vpop.f32.mrf.mxu0 }
 0x9ee   : > { %9167 = vmatmul.mubr.msk.f32.vlgmr.msra.gmra.mxu1 %vm1186_vm4, %v2060_v32 }
 0x9ef   : > { %v9163_v33 = vpop.f32.mrf.mxu0  ;;  %9196 = vmatprep.mubr.msk.f32.mxu1 %vm10070_vm0, %v10069_v0  ;;  %9181 = vmatpush3.msra.mxu1 %v2177_v44 }
 0x9f0   : > { %9182 = vmatprep.subr.mxu1 %v10069_v0 }
 0x9f1   : > { %9183 = vmatpush3.msra.mxu1 %v2176_v45 }
 0x9f2   : > { %9184 = vmatprep.subr.mxu1 %v10069_v0 }
 0x9f3   : > { %9185 = vmatpush3.msra.mxu1 %v2175_v46 }
 0x9f4   : > { %9186 = vmatprep.subr.mxu1 %v10069_v0 }
 0x9f5   : > { %9187 = vmatpush3.msra.mxu1 %v2174_v47 }
 0x9f6   : > { %9188 = vmatprep.subr.mxu1 %v10069_v0 }
 0x9f7   : > { %9189 = vmatpush3.msra.mxu1 %v2173_v48 }
 0x9f8   : > { %9190 = vmatprep.subr.mxu1 %v10069_v0 }
 0x9f9   : > { %9191 = vmatpush3.msra.mxu1 %v2172_v5 }
 0x9fa   : > { %9192 = vmatprep.subr.mxu1 %v10069_v0 }
 0x9fb   : > { %9193 = vmatpush3.msra.mxu1 %v2171_v6 }
 0x9fc   : > { %9194 = vmatprep.subr.mxu1 %v10069_v0 }
 0x9fd   : > { %9195 = vmatpush3.msra.mxu1 %v2170_v7 }
 0x9fe   : > { %9215 = vmatprep.subr.mxu1 %v10069_v0 }
 0xaae   : > { %v2133_v34 = vpop.f32.mrf.mxu1 }
 0xaaf   : > { %v2137_v35 = vadd.f32 %v2133_v34, %v1898_v27  ;;  %v10604_v34 = vsub.s32 2, %v10544_v57 }
 0xab0   : > { %v9168_v36 = vpop.f32.mrf.mxu1 }
 0xab1   : > { %v2138_v37 = vadd.f32 %v2137_v35, %v10384_v12  ;;  %v2166_v12 = vld [vmem:[%s11538_s0 + $0x8] sm:$0xff]  ;;  %v10607_v35 = vsub.s32 3, %v10544_v57 }
 0xab2   : > { %9174 = vmatpush3.msra.mxu0 %v2166_v12 }
 0xab3   : > { %v2139_v38 = vsel %vm1108_vm3, %v2138_v37, 0.0  ;;  %v2144_v39 = vmul.f32 %v2138_v37, %v2138_v37  ;;  %9175 = vmatprep.subr.mxu0 %v10069_v0 }
 0xab4   : > { %2140 = vadd.xlane.f32.xlu1 %v2139_v38  ;;  %9176 = vmatpush3.msra.mxu0 %v2165_v43 }
 0xab5   : > { %v2145_v40 = vsel %vm1108_vm3, %v2144_v39, 0.0  ;;  %9199 = vmatprep.subr.mxu0 %v10069_v0 }
 0xab8   : > { %2146 = vadd.xlane.f32.xlu1 %v2145_v40  ;;  %v2363_v40 = vrot.slane %v10552_v59, %v10607_v35 }
 0xb3d   : > { %v2141_v49 = vpop.xlane.xlu1 %2140 }
 0xb3e   : > { %v2143_v50 = vmul.f32 0.03125, %v2141_v49 }
 0xb40   : > { %v2149_v52 = vmul.f32 %v2143_v50, %v2143_v50  ;;  %v2151_v61 = vsub.f32 %v2138_v37, %v2143_v50  ;;  %v2358_v37 = vrot.slane %v10552_v59, %v10604_v34 }
 0xb41   : > { %v2147_v51 = vpop.xlane.xlu1 %2146 }
 0xb42   : > { %v2148_v53 = vmul.f32 0.03125, %v2147_v51 }
 0xb44   : > { %v2150_v54 = vsub.f32 %v2148_v53, %v2149_v52 }
 0xb46   : > { %v2152_v55 = vadd.f32 1e-05, %v2150_v54 }
 0xb48   : > { %9779 = vrsqrt.f32 %v2152_v55 }
 0xb55   : > { %v9780_v63 = vpop.eup %9779 }
 0xb56   : > { %v2154_v1 = vmul.f32 %v9780_v63, %v2151_v61 }
 0xb58   : > { %v2159_v3 = vmul.f32 %v2158_v62, %v2154_v1 }
 0xb5a   : > { %v2164_v4 = vadd.f32 %v2163_v2, %v2159_v3 }
 0xb5c   : > { %9178 = vmatmul.mubr.msk.f32.vlgmr.msra.gmra.mxu0 %vm1108_vm3, %v2164_v4 }
 0xb5d   : > { %9207 = vmatprep.mubr.msk.f32.mxu0 %vm10070_vm0, %v10069_v0  ;;  %9200 = vmatpush3.msra.mxu0 %v8700_v24 }
 0xb5e   : > { %9201 = vmatprep.subr.mxu0 %v10069_v0 }
 0xb5f   : > { %9202 = vmatpush3.msra.mxu0 %v8699_v25 }
 0xb60   : > { %9203 = vmatprep.subr.mxu0 %v10069_v0 }
 0xb61   : > { %9204 = vmatpush3.msra.mxu0 %v8698_v26 }
 0xb62   : > { %9205 = vmatprep.subr.mxu0 %v10069_v0 }
 0xb63   : > { %9206 = vmatpush3.msra.mxu0 %v8697_v15 }
 0xb64   : > { %9210 = vmatprep.subr.mxu0 %v10069_v0 }
 0xc1c   : > { %v2254_v9 = vpop.f32.mrf.mxu0 }
 0xc1d   : > { %v2255_v10 = vadd.f32 %v8692_v8, %v2254_v9 }
 0xc1e   : > { %v9179_v11 = vpop.f32.mrf.mxu0 }
 0xc1f   : > { %v2258_v13 = vmax.f32 %v2255_v10, 0.0 }
 0xc21   : > { %9197 = vmatmul.mubr.msk.f32.vlgmr.msra.gmra.mxu1 %vm2265_vm5, %v2258_v13 }
 0xc22   : > { %9217 = vmatprep.mubr.msk.f32.mxu1 %vm10070_vm0, %v10069_v0 }
 0xce1   : > { %v2335_v16 = vpop.f32.mrf.mxu1 }
 0xce2   : > { %v2336_v17 = vadd.f32 %v8694_v14, %v2335_v16  ;;  %v8701_v14 = vld [vmem:[%s11537_s11 + $0x20] sm:$0xff]  ;;  %v8702_v16 = vld [vmem:[%s11537_s11 + $0x28] sm:$0xff] }
 0xce3   : > { %v9198_v19 = vpop.f32.mrf.mxu1 }
 0xce4   : > { %v2339_v20 = vadd.f32 %v2336_v17, %v2164_v4 }
 0xce6   : > { %v2340_v21 = vsel %vm1108_vm3, %v2339_v20, 0.0  ;;  %v2344_v22 = vmul.f32 %v2339_v20, %v2339_v20 }
 0xce7   : > { %2341 = vadd.xlane.f32.xlu1 %v2340_v21 }
 0xce8   : > { %v2345_v23 = vsel %vm1108_vm3, %v2344_v22, 0.0 }
 0xceb   : > { %2346 = vadd.xlane.f32.xlu1 %v2345_v23 }
 0xd70   : > { %v2342_v27 = vpop.xlane.xlu1 %2341 }
 0xd71   : > { %v2343_v28 = vmul.f32 0.03125, %v2342_v27 }
 0xd73   : > { %v2349_v30 = vmul.f32 %v2343_v28, %v2343_v28  ;;  %v2351_v36 = vsub.f32 %v2339_v20, %v2343_v28 }
 0xd74   : > { %v2347_v29 = vpop.xlane.xlu1 %2346 }
 0xd75   : > { %v2348_v31 = vmul.f32 0.03125, %v2347_v29 }
 0xd77   : > { %v2350_v32 = vsub.f32 %v2348_v31, %v2349_v30 }
 0xd79   : > { %v2352_v33 = vadd.f32 1e-05, %v2350_v32 }
 0xd7b   : > { %9781 = vrsqrt.f32 %v2352_v33 }
 0xd88   : > { %v9782_v38 = vpop.eup %9781 }
 0xd89   : > { %v2354_v39 = vmul.f32 %v9782_v38, %v2351_v36 }
 0xd8b   : > { %v2359_v41 = vmul.f32 %v2358_v37, %v2354_v39 }
 0xd8d   : > { %v10613_v42 = vadd.f32 %v2363_v40, %v2359_v41 }
 0xd8f   : > { %9208 = vmatmul.mubr.msk.f32.vlgmr.msra.gmra.mxu0 %vm1108_vm3, %v10613_v42 }
 0xd90   : > { %9212 = vmatprep.mubr.msk.f32.mxu0 %vm10070_vm0, %v10069_v0 }
 0xe4f   : > { %v10619_v12 = vpop.f32.mrf.mxu0 }
 0xe50   : > { %2618 = vrot.lane.b32.xlu0 %v10619_v12, %s11496_s6  ;;  %2452 = vrot.lane.b32.xlu1 %v10619_v12, %s11540_s28  ;;  %v10626_v44 = vmul.f32 0.35355338, %v10619_v12  ;;  %s11547_s6 = smov 104  }
 0xe51   : > { %v9209_v43 = vpop.f32.mrf.mxu0 }
 0xe54   : > { %2616 = vrot.lane.b32.xlu0 %v10626_v44, %s11541_s4 }
 0xec2   : > { %v2453_v45 = vpop.permute.xlu1 %2452  ;;  %v2619_v46 = vpop.permute.xlu0 %2618 }
 0xec3   : > { %9211 = vmatpush3.xpose.msk.msra.mxu0 %vm1186_vm4, %v2453_v45  ;;  %v8703_v45 = vld [vmem:[%s11537_s11 + $0x30] sm:$0xff] }
 0xec4   : > { %9220 = vmatprep.subr.mxu0 %v10069_v0 }
 0xec6   : > { %9213 = vmatmul.mubr.msk.f32.vlgmr.msra.gmra.mxu0 %vm1186_vm4, %v10626_v44  ;;  %v2617_v47 = vpop.permute.xlu0 %2616 }
 0xec7   : > { %9221 = vmatpush3.xpose.msk.msra.mxu0 %vm1186_vm4, %v2619_v46  ;;  %9222 = vmatprep.mubr.msk.f32.mxu0 %vm10070_vm0, %v10069_v0 }
 0xec8   : > { %9230 = vmatprep.subr.mxu0 %v10069_v0 }
 0xeca   : > { %9223 = vmatmul.mubr.msk.f32.vlgmr.msra.gmra.mxu0 %vm1186_vm4, %v2617_v47 }
 0xecb   : > { %9232 = vmatprep.mubr.msk.f32.mxu0 %vm10070_vm0, %v10069_v0  ;;  %9231 = vmatpush3.msra.mxu0 %v8702_v16  ;;  %v8724_v16 = vld [vmem:[%s11538_s0 + $0x30] sm:$0xff] }
 0xecc   : > { %9240 = vmatprep.subr.mxu0 %v10069_v0 }
 0xf86   : > { %v2525_v48 = vpop.f32.mrf.mxu0 }
 0xf87   : > { %v2529_v49 = vsel %vm1186_vm4, %v2525_v48, -inf }
 0xf88   : > { %2530 = vmax.xlane.f32.xlu0 %v2529_v49  ;;  %v9214_v50 = vpop.f32.mrf.mxu0 }
 0xf8a   : > { %v2690_v51 = vpop.f32.mrf.mxu0 }
 0xf8b   : > { %v2694_v52 = vsel %vm1186_vm4, %v2690_v51, -inf }
 0xf8c   : > { %2695 = vmax.xlane.f32.xlu1 %v2694_v52  ;;  %v9224_v53 = vpop.f32.mrf.mxu0 }
 0xf9d   : > { %2705 = vrot.lane.b32.xlu1 %v10619_v12, %s11542_s9 }
 0xfa1   : > { %2927 = vrot.lane.b32.xlu1 %v10626_v44, %s11543_s10 }
0x1011   : > { %v2531_v54 = vpop.xlane.xlu0 %2530 }
0x1012   : > { %v2532_v55 = vsub.f32 %v2525_v48, %v2531_v54 }
0x1014   : > { %v2533_v59 = vmul.f32 1.442695, %v2532_v55 }
0x1015   : > { %v2696_v61 = vpop.xlane.xlu1 %2695 }
0x1016   : > { %9783 = vpow2.f32 %v2533_v59  ;;  %v2697_v62 = vsub.f32 %v2690_v51, %v2696_v61  ;;  %v8704_v59 = vld [vmem:[%s11537_s11 + $0x38] sm:$0xff] }
0x1018   : > { %v2698_v63 = vmul.f32 1.442695, %v2697_v62 }
0x1019   : > { %v2706_v10 = vpop.permute.xlu1 %2705 }
0x101a   : > { %9785 = vpow2.f32 %v2698_v63 }
0x101d   : > { %v2928_v23 = vpop.permute.xlu1 %2927 }
0x1023   : > { %v9784_v1 = vpop.eup %9783 }
0x1024   : > { %v2535_v2 = vsel %vm1186_vm4, %v9784_v1, 0.0 }
0x1025   : > { %2536 = vadd.xlane.f32.xlu0 %v2535_v2 }
0x1027   : > { %v9786_v3 = vpop.eup %9785 }
0x1028   : > { %v2700_v4 = vsel %vm1186_vm4, %v9786_v3, 0.0 }
0x1029   : > { %2701 = vadd.xlane.f32.xlu0 %v2700_v4 }
0x103f   : > { %2540 = vrot.lane.b32.xlu0 %v10619_v12, %s11544_s30 }
0x1043   : > { %2929 = vrot.lane.b32.xlu0 %v10619_v12, %s11545_s2 }
0x10ae   : > { %v2537_v5 = vpop.xlane.xlu0 %2536 }
0x10af   : > { %9787 = vrcp.f32 %v2537_v5 }
0x10b2   : > { %v2702_v6 = vpop.xlane.xlu0 %2701 }
0x10b3   : > { %9789 = vrcp.f32 %v2702_v6 }
0x10b6   : > { %v2541_v7 = vpop.permute.xlu0 %2540 }
0x10b7   : > { %9216 = vmatpush3.msra.mxu1 %v2541_v7 }
0x10b8   : > { %9225 = vmatprep.subr.mxu1 %v10069_v0 }
0x10ba   : > { %v2930_v21 = vpop.permute.xlu0 %2929 }
0x10bc   : > { %v9788_v8 = vpop.eup %9787 }
0x10bd   : > { %v2539_v9 = vmul.f32 %v9788_v8, %v9784_v1 }
0x10bf   : > { %9218 = vmatmul.mubr.msk.f32.vlgmr.msra.gmra.mxu1 %vm1186_vm4, %v2539_v9 }
0x10c0   : > { %v9790_v11 = vpop.eup %9789  ;;  %9226 = vmatpush3.msra.mxu1 %v2706_v10  ;;  %9227 = vmatprep.mubr.msk.f32.mxu1 %vm10070_vm0, %v10069_v0 }
0x10c1   : > { %v2704_v13 = vmul.f32 %v9790_v11, %v9786_v3  ;;  %9235 = vmatprep.subr.mxu1 %v10069_v0 }
0x10c3   : > { %9228 = vmatmul.mubr.msk.f32.vlgmr.msra.gmra.mxu1 %vm1186_vm4, %v2704_v13 }
0x10c4   : > { %9237 = vmatprep.mubr.msk.f32.mxu1 %vm10070_vm0, %v10069_v0  ;;  %9236 = vmatpush3.msra.mxu1 %v8701_v14  ;;  %v8725_v14 = vld [vmem:[%s11538_s0 + $0x38] sm:$0xff] }
0x10c5   : > { %9245 = vmatprep.subr.mxu1 %v10069_v0 }
0x117f   : > { %v2612_v17 = vpop.f32.mrf.mxu1 }
0x1180   : > { %9238 = vmatmul.mubr.msk.f32.vlgmr.msra.gmra.mxu1 %vm1186_vm4, %v2612_v17  ;;  %v8722_v17 = vld [vmem:[%s11538_s0 + $0x20] sm:$0xff] }
0x1181   : > { %v9219_v19 = vpop.f32.mrf.mxu1  ;;  %9247 = vmatprep.mubr.msk.f32.mxu1 %vm10070_vm0, %v10069_v0 }
0x1182   : > { %v8734_v19 = vld [vmem:[%s11457_s13 + $0x78] sm:$0xff] }
0x1183   : > { %v2777_v20 = vpop.f32.mrf.mxu1 }
0x1184   : > { %9233 = vmatmul.mubr.msk.f32.vlgmr.msra.gmra.mxu0 %vm1186_vm4, %v2777_v20  ;;  %v8733_v20 = vld [vmem:[%s11457_s13 + $0x70] sm:$0xff] }
0x1185   : > { %9241 = vmatpush3.xpose.msk.msra.mxu0 %vm1186_vm4, %v2930_v21  ;;  %v9229_v22 = vpop.f32.mrf.mxu1  ;;  %9242 = vmatprep.mubr.msk.f32.mxu0 %vm10070_vm0, %v10069_v0  ;;  %v8732_v21 = vld [vmem:[%s11457_s13 + $0x68] sm:$0xff] }
0x1186   : > { %9250 = vmatprep.subr.mxu0 %v10069_v0  ;;  %v8731_v22 = vld [vmem:[%s11457_s13 + $0x60] sm:$0xff] }
0x1188   : > { %9243 = vmatmul.mubr.msk.f32.vlgmr.msra.gmra.mxu0 %vm1186_vm4, %v2928_v23  ;;  %v8730_v23 = vld [vmem:[%s11457_s13 + $0x58] sm:$0xff] }
0x1189   : > { %9252 = vmatprep.mubr.msk.f32.mxu0 %vm10070_vm0, %v10069_v0  ;;  %9251 = vmatpush3.msra.mxu0 %v8703_v45  ;;  %v3636_v45 = vld [vmem:[%s11459_s15 + $0x8] sm:$0xff] }
0x118a   : > { %9260 = vmatprep.subr.mxu0 %v10069_v0 }
0x1240   : > { %v2923_v24 = vpop.f32.mrf.mxu1 }
0x1242   : > { %v9239_v25 = vpop.f32.mrf.mxu1 }
0x1244   : > { %v2850_v26 = vpop.f32.mrf.mxu0 }
0x1245   : > { %v2924_v15 = vadd.f32 %v2923_v24, %v2850_v26 }
0x1246   : > { %v9234_v27 = vpop.f32.mrf.mxu0 }
0x1248   : > { %v3001_v28 = vpop.f32.mrf.mxu0 }
0x1249   : > { %v3005_v29 = vsel %vm1186_vm4, %v3001_v28, -inf }
0x124a   : > { %3006 = vmax.xlane.f32.xlu0 %v3005_v29  ;;  %v9244_v30 = vpop.f32.mrf.mxu0 }
0x124b   : > { %v10761_v30 = vld [vmem:[%s11539_s29 + $0x4] sm:$0xf] }
0x1260   : > { %3016 = vrot.lane.b32.xlu0 %v10619_v12, %s11546_s5 }
0x1264   : > { %3166 = vrot.lane.b32.xlu0 %v10626_v44, %s11547_s6 }
0x12d3   : > { %v3007_v31 = vpop.xlane.xlu0 %3006 }
0x12d4   : > { %v3008_v32 = vsub.f32 %v3001_v28, %v3007_v31 }
0x12d6   : > { %v3009_v33 = vmul.f32 1.442695, %v3008_v32  ;;  %v3424_v32 = vrot.slane %v10761_v30, %v10547_v58 }
0x12d7   : > { %v3017_v36 = vpop.permute.xlu0 %3016 }
0x12d8   : > { %9791 = vpow2.f32 %v3009_v33  ;;  %9246 = vmatpush3.msra.mxu1 %v3017_v36 }
0x12d9   : > { %9255 = vmatprep.subr.mxu1 %v10069_v0 }
0x12db   : > { %v3167_v44 = vpop.permute.xlu0 %3166 }
0x12e5   : > { %v9792_v37 = vpop.eup %9791 }
0x12e6   : > { %v3011_v38 = vsel %vm1186_vm4, %v9792_v37, 0.0 }
0x12e7   : > { %3012 = vadd.xlane.f32.xlu1 %v3011_v38 }
0x12f8   : > { %3168 = vrot.lane.b32.xlu1 %v10619_v12, %s11548_s3 }
0x1370   : > { %v3013_v39 = vpop.xlane.xlu1 %3012 }
0x1371   : > { %9793 = vrcp.f32 %v3013_v39 }
0x1374   : > { %v3169_v43 = vpop.permute.xlu1 %3168 }
0x137e   : > { %v9794_v40 = vpop.eup %9793 }
0x137f   : > { %v3015_v41 = vmul.f32 %v9794_v40, %v9792_v37  ;;  %v3429_v37 = vrot.slane %v10761_v30, %v10555_v60  ;;  %v3638_v40 = vld [vmem:[%s11459_s15 + $0x18] sm:$0xff] }
0x1381   : > { %9248 = vmatmul.mubr.msk.f32.vlgmr.msra.gmra.mxu1 %vm1186_vm4, %v3015_v41  ;;  %v8672_v41 = vld [vmem:[%s11550_s19] ss:$0 sm:$0xff] }
0x1382   : > { %9256 = vmatpush3.xpose.msk.msra.mxu1 %vm1186_vm4, %v3169_v43  ;;  %9257 = vmatprep.mubr.msk.f32.mxu1 %vm10070_vm0, %v10069_v0  ;;  %v3637_v43 = vld [vmem:[%s11459_s15 + $0x10] sm:$0xff] }
0x1383   : > { %9265 = vmatprep.subr.mxu1 %v10069_v0 }
0x1385   : > { %9258 = vmatmul.mubr.msk.f32.vlgmr.msra.gmra.mxu1 %vm1186_vm4, %v3167_v44  ;;  %v1094_v44 = vadd.f32 %v8672_v41, %v10413_v18  ;;  %v8729_v18 = vld [vmem:[%s11457_s13 + $0x50] sm:$0xff] }
0x1386   : > { %9267 = vmatprep.mubr.msk.f32.mxu1 %vm10070_vm0, %v10069_v0  ;;  %9266 = vmatpush3.msra.mxu1 %v8704_v59 }
0x1387   : > { %9281 = vmatprep.subr.mxu1 %v10069_v0 }
0x1441   : > { %v3088_v46 = vpop.f32.mrf.mxu1 }
0x1442   : > { %9253 = vmatmul.mubr.msk.f32.vlgmr.msra.gmra.mxu0 %vm1186_vm4, %v3088_v46  ;;  %v1097_v46 = vld [vmem:[%s11551_s1] sm:$0xff] }
0x1443   : > { %v9249_v47 = vpop.f32.mrf.mxu1  ;;  %9262 = vmatprep.mubr.msk.f32.mxu0 %vm10070_vm0, %v10069_v0 }
0x1444   : > { %v3635_v47 = vld [vmem:[%s11459_s15] sm:$0xff] }
0x1445   : > { %v3240_v48 = vpop.f32.mrf.mxu1 }
0x1446   : > { %v3244_v49 = vsel %vm1186_vm4, %v3240_v48, -inf }
0x1447   : > { %3245 = vmax.xlane.f32.xlu1 %v3244_v49  ;;  %v9259_v50 = vpop.f32.mrf.mxu1  ;;  %v8728_v49 = vld [vmem:[%s11457_s13 + $0x48] sm:$0xff] }
0x1448   : > { %v8727_v50 = vld [vmem:[%s11457_s13 + $0x40] sm:$0xff] }
0x14d0   : > { %v3246_v51 = vpop.xlane.xlu1 %3245 }
0x14d1   : > { %v3247_v52 = vsub.f32 %v3240_v48, %v3246_v51  ;;  %v10794_v48 = vadd.f32 %v1097_v46, %v1094_v44  ;;  %v8736_v51 = vld [vmem:[%s11456_s12 + $0x1] ss:$0 sm:$0xff] }
0x14d3   : > { %v3248_v53 = vmul.f32 1.442695, %v3247_v52 }
0x14d5   : > { %9795 = vpow2.f32 %v3248_v53 }
0x14e2   : > { %v9796_v54 = vpop.eup %9795 }
0x14e3   : > { %v3250_v55 = vsel %vm1186_vm4, %v9796_v54, 0.0 }
0x14e4   : > { %3251 = vadd.xlane.f32.xlu0 %v3250_v55 }
0x14fa   : > { %3255 = vrot.lane.b32.xlu0 %v10619_v12, %s11549_s17 }
0x1502   : > { %v3161_v61 = vpop.f32.mrf.mxu0 }
0x1503   : > { %v3165_v62 = vadd.f32 %v3161_v61, %v2924_v15 }
0x1504   : > { %v9254_v63 = vpop.f32.mrf.mxu0 }
0x156d   : > { %v3252_v1 = vpop.xlane.xlu0 %3251 }
0x156e   : > { %9797 = vrcp.f32 %v3252_v1 }
0x1571   : > { %v3256_v2 = vpop.permute.xlu0 %3255 }
0x1572   : > { %9261 = vmatpush3.msra.mxu0 %v3256_v2 }
0x1573   : > { %9270 = vmatprep.subr.mxu0 %v10069_v0 }
0x157b   : > { %v9798_v3 = vpop.eup %9797 }
0x157c   : > { %v3254_v4 = vmul.f32 %v9798_v3, %v9796_v54 }
0x157e   : > { %9263 = vmatmul.mubr.msk.f32.vlgmr.msra.gmra.mxu0 %vm1186_vm4, %v3254_v4 }
0x157f   : > { %9278 = vmatprep.mubr.msk.f32.mxu0 %vm10070_vm0, %v10069_v0  ;;  %9271 = vmatpush3.msra.mxu0 %v8725_v14 }
0x1580   : > { %9272 = vmatprep.subr.mxu0 %v10069_v0 }
0x1581   : > { %9273 = vmatpush3.msra.mxu0 %v8724_v16 }
0x1582   : > { %9274 = vmatprep.subr.mxu0 %v10069_v0 }
0x163e   : > { %v3327_v12 = vpop.f32.mrf.mxu0 }
0x163f   : > { %9268 = vmatmul.mubr.msk.f32.vlgmr.msra.gmra.mxu1 %vm1186_vm4, %v3327_v12  ;;  %v920_v12 = vand.u32 127, %v919_v56 }
0x1640   : > { %v9264_v5 = vpop.f32.mrf.mxu0  ;;  %9297 = vmatprep.mubr.msk.f32.mxu1 %vm10070_vm0, %v10069_v0  ;;  %9282 = vmatpush3.msra.mxu1 %v8734_v19 }
0x1641   : > { %9283 = vmatprep.subr.mxu1 %v10069_v0  ;;  %vm921_vm6 = vcmp.ge.s32.totalorder %v920_v12, 6 }
0x1642   : > { %9284 = vmatpush3.msra.mxu1 %v8733_v20  ;;  %v10846_v5 = vsel %vm921_vm6, -1e+30, %v10069_v0 }
0x1643   : > { %9285 = vmatprep.subr.mxu1 %v10069_v0 }
0x1644   : > { %9286 = vmatpush3.msra.mxu1 %v8732_v21 }
0x1645   : > { %9287 = vmatprep.subr.mxu1 %v10069_v0 }
0x1646   : > { %9288 = vmatpush3.msra.mxu1 %v8731_v22 }
0x1647   : > { %9289 = vmatprep.subr.mxu1 %v10069_v0 }
0x1648   : > { %9290 = vmatpush3.msra.mxu1 %v8730_v23 }
0x1649   : > { %9291 = vmatprep.subr.mxu1 %v10069_v0 }
0x164a   : > { %9292 = vmatpush3.msra.mxu1 %v8729_v18 }
0x164b   : > { %9293 = vmatprep.subr.mxu1 %v10069_v0 }
0x164c   : > { %9294 = vmatpush3.msra.mxu1 %v8728_v49 }
0x164d   : > { %9295 = vmatprep.subr.mxu1 %v10069_v0 }
0x164e   : > { %9296 = vmatpush3.msra.mxu1 %v8727_v50 }
0x164f   : > { %9316 = vmatprep.subr.mxu1 %v10069_v0 }
0x16ff   : > { %v3400_v6 = vpop.f32.mrf.mxu1 }
0x1700   : > { %v3404_v7 = vadd.f32 %v3400_v6, %v3165_v62 }
0x1701   : > { %v9269_v8 = vpop.f32.mrf.mxu1 }
0x1702   : > { %v3405_v9 = vadd.f32 %v3404_v7, %v10613_v42  ;;  %v8723_v42 = vld [vmem:[%s11538_s0 + $0x28] sm:$0xff] }
0x1703   : > { %9275 = vmatpush3.msra.mxu0 %v8723_v42 }
0x1704   : > { %v3406_v10 = vsel %vm1108_vm3, %v3405_v9, 0.0  ;;  %v3410_v11 = vmul.f32 %v3405_v9, %v3405_v9  ;;  %9276 = vmatprep.subr.mxu0 %v10069_v0 }
0x1705   : > { %3407 = vadd.xlane.f32.xlu1 %v3406_v10  ;;  %9277 = vmatpush3.msra.mxu0 %v8722_v17 }
0x1706   : > { %v3411_v13 = vsel %vm1108_vm3, %v3410_v11, 0.0  ;;  %9300 = vmatprep.subr.mxu0 %v10069_v0 }
0x1709   : > { %3412 = vadd.xlane.f32.xlu1 %v3411_v13 }
0x178e   : > { %v3408_v24 = vpop.xlane.xlu1 %3407 }
0x178f   : > { %v3409_v25 = vmul.f32 0.03125, %v3408_v24 }
0x1791   : > { %v3415_v15 = vmul.f32 %v3409_v25, %v3409_v25  ;;  %v3417_v31 = vsub.f32 %v3405_v9, %v3409_v25 }
0x1792   : > { %v3413_v26 = vpop.xlane.xlu1 %3412 }
0x1793   : > { %v3414_v27 = vmul.f32 0.03125, %v3413_v26 }
0x1795   : > { %v3416_v28 = vsub.f32 %v3414_v27, %v3415_v15 }
0x1797   : > { %v3418_v29 = vadd.f32 1e-05, %v3416_v28 }
0x1799   : > { %9799 = vrsqrt.f32 %v3418_v29 }
0x17a6   : > { %v9800_v33 = vpop.eup %9799 }
0x17a7   : > { %v3420_v36 = vmul.f32 %v9800_v33, %v3417_v31  ;;  %v3639_v33 = vld [vmem:[%s11460_s16] sm:$0xff] }
0x17a9   : > { %v3425_v38 = vmul.f32 %v3424_v32, %v3420_v36  ;;  %v3640_v36 = vld [vmem:[%s11460_s16 + $0x8] sm:$0xff] }
0x17ab   : > { %v10767_v39 = vadd.f32 %v3429_v37, %v3425_v38 }
0x17ad   : > { %9279 = vmatmul.mubr.msk.f32.vlgmr.msra.gmra.mxu0 %vm1108_vm3, %v10767_v39 }
0x17ae   : > { %9301 = vmatpush3.msra.mxu0 %v3638_v40  ;;  %9308 = vmatprep.mubr.msk.f32.mxu0 %vm10070_vm0, %v10069_v0 }
0x17af   : > { %9302 = vmatprep.subr.mxu0 %v10069_v0 }
0x17b0   : > { %9303 = vmatpush3.msra.mxu0 %v3637_v43 }
0x17b1   : > { %9304 = vmatprep.subr.mxu0 %v10069_v0 }
0x17b2   : > { %9305 = vmatpush3.msra.mxu0 %v3636_v45 }
0x17b3   : > { %9306 = vmatprep.subr.mxu0 %v10069_v0 }
0x17b4   : > { %9307 = vmatpush3.msra.mxu0 %v3635_v47 }
0x17b5   : > { %9309 = vmatmul.mubr.msk.f32.vlgmr.msra.gmra.mxu0 %vm1108_vm3, %v10794_v48  ;;  %9311 = vmatprep.subr.mxu0 %v10069_v0 }
0x17b6   : > { %9313 = vmatprep.mubr.msk.f32.mxu0 %vm10070_vm0, %v10069_v0 }
0x186d   : > { %v3524_v52 = vpop.f32.mrf.mxu0 }
0x186e   : > { %v3525_v53 = vadd.f32 %v8736_v51, %v3524_v52 }
0x186f   : > { %v9280_v54 = vpop.f32.mrf.mxu0 }
0x1870   : > { %v3528_v55 = vmax.f32 %v3525_v53, 0.0 }
0x1872   : > { %9298 = vmatmul.mubr.msk.f32.vlgmr.msra.gmra.mxu1 %vm2265_vm5, %v3528_v55 }
0x1873   : > { %9318 = vmatprep.mubr.msk.f32.mxu1 %vm10070_vm0, %v10069_v0 }
0x1875   : > { %v10820_v59 = vpop.f32.mrf.mxu0 }
0x1876   : > { %3884 = vrot.lane.b32.xlu0 %v10820_v59, %s11552_s18  ;;  %3718 = vrot.lane.b32.xlu1 %v10820_v59, %s11540_s28  ;;  %v10827_v62 = vmul.f32 0.35355338, %v10820_v59 }
0x1877   : > { %v9310_v61 = vpop.f32.mrf.mxu0 }
0x187a   : > { %3882 = vrot.lane.b32.xlu0 %v10827_v62, %s11541_s4 }
0x18e8   : > { %v3719_v63 = vpop.permute.xlu1 %3718  ;;  %v3885_v1 = vpop.permute.xlu0 %3884 }
0x18e9   : > { %9312 = vmatpush3.xpose.msk.msra.mxu0 %vm1186_vm4, %v3719_v63 }
0x18ea   : > { %9321 = vmatprep.subr.mxu0 %v10069_v0 }
0x18ec   : > { %9314 = vmatmul.mubr.msk.f32.vlgmr.msra.gmra.mxu0 %vm1186_vm4, %v10827_v62  ;;  %v3883_v2 = vpop.permute.xlu0 %3882 }
0x18ed   : > { %9322 = vmatpush3.xpose.msk.msra.mxu0 %vm1186_vm4, %v3885_v1  ;;  %9323 = vmatprep.mubr.msk.f32.mxu0 %vm10070_vm0, %v10069_v0 }
0x18ee   : > { %9331 = vmatprep.subr.mxu0 %v10069_v0 }
0x18f0   : > { %9324 = vmatmul.mubr.msk.f32.vlgmr.msra.gmra.mxu0 %vm1186_vm4, %v3883_v2 }
0x18f1   : > { %9333 = vmatprep.mubr.msk.f32.mxu0 %vm10070_vm0, %v10069_v0  ;;  %9332 = vmatpush3.msra.mxu0 %v3640_v36 }
0x18f2   : > { %9341 = vmatprep.subr.mxu0 %v10069_v0 }
0x1932   : > { %v10842_v3 = vpop.f32.mrf.mxu1 }
0x1934   : > { %v9299_v4 = vpop.f32.mrf.mxu1 }
0x19ac   : > { %v3791_v6 = vpop.f32.mrf.mxu0 }
0x19ad   : > { %v3792_v7 = vadd.f32 %v3791_v6, %v10846_v5 }
0x19ae   : > { %v9315_v8 = vpop.f32.mrf.mxu0 }
0x19af   : > { %v3795_v9 = vsel %vm1186_vm4, %v3792_v7, -inf  ;;  %v3641_v8 = vld [vmem:[%s11460_s16 + $0x10] sm:$0xff] }
0x19b0   : > { %3796 = vmax.xlane.f32.xlu1 %v3795_v9  ;;  %v3956_v10 = vpop.f32.mrf.mxu0 }
0x19b1   : > { %v3957_v11 = vadd.f32 %v3956_v10, %v10846_v5 }
0x19b2   : > { %v9325_v13 = vpop.f32.mrf.mxu0 }
0x19b3   : > { %v3960_v14 = vsel %vm1186_vm4, %v3957_v11, -inf }
0x19b4   : > { %3961 = vmax.xlane.f32.xlu0 %v3960_v14 }
0x1a39   : > { %v3797_v16 = vpop.xlane.xlu1 %3796 }
0x1a3a   : > { %v3798_v56 = vsub.f32 %v3792_v7, %v3797_v16 }
0x1a3c   : > { %v3799_v42 = vmul.f32 1.442695, %v3798_v56 }
0x1a3d   : > { %v3962_v17 = vpop.xlane.xlu0 %3961 }
0x1a3e   : > { %9801 = vpow2.f32 %v3799_v42  ;;  %v3963_v19 = vsub.f32 %v3957_v11, %v3962_v17 }
0x1a40   : > { %v3964_v20 = vmul.f32 1.442695, %v3963_v19 }
0x1a42   : > { %9803 = vpow2.f32 %v3964_v20  ;;  %v8738_v20 = vld [vmem:[%s11458_s14 + $0x1] ss:$0 sm:$0xff] }
0x1a4b   : > { %v9802_v21 = vpop.eup %9801 }
0x1a4c   : > { %v3801_v22 = vsel %vm1186_vm4, %v9802_v21, 0.0 }
0x1a4d   : > { %3802 = vadd.xlane.f32.xlu0 %v3801_v22 }
0x1a4f   : > { %v9804_v23 = vpop.eup %9803 }
0x1a50   : > { %v3966_v24 = vsel %vm1186_vm4, %v9804_v23, 0.0 }
0x1a51   : > { %3967 = vadd.xlane.f32.xlu1 %v3966_v24 }
0x1a62   : > { %3971 = vrot.lane.b32.xlu1 %v10820_v59, %s11542_s9 }
0x1a63   : > { %3806 = vrot.lane.b32.xlu0 %v10820_v59, %s11544_s30 }
0x1a66   : > { %4195 = vrot.lane.b32.xlu1 %v10820_v59, %s11545_s2 }
0x1a67   : > { %4193 = vrot.lane.b32.xlu0 %v10827_v62, %s11543_s10 }
0x1ad6   : > { %v3803_v25 = vpop.xlane.xlu0 %3802 }
0x1ad7   : > { %9805 = vrcp.f32 %v3803_v25 }
0x1ada   : > { %v3968_v26 = vpop.xlane.xlu1 %3967  ;;  %v3807_v15 = vpop.permute.xlu0 %3806 }
0x1adb   : > { %9807 = vrcp.f32 %v3968_v26  ;;  %9317 = vmatpush3.msra.mxu1 %v3807_v15  ;;  %v3642_v15 = vld [vmem:[%s11460_s16 + $0x18] sm:$0xff] }
0x1adc   : > { %9326 = vmatprep.subr.mxu1 %v10069_v0 }
0x1ade   : > { %v3972_v29 = vpop.permute.xlu1 %3971  ;;  %v4194_v44 = vpop.permute.xlu0 %4193 }
0x1ae2   : > { %v4196_v41 = vpop.permute.xlu1 %4195 }
0x1ae4   : > { %v9806_v27 = vpop.eup %9805 }
0x1ae5   : > { %v3805_v28 = vmul.f32 %v9806_v27, %v9802_v21  ;;  %v3605_v21 = vadd.f32 %v8738_v20, %v10842_v3 }
0x1ae7   : > { %9319 = vmatmul.mubr.msk.f32.vlgmr.msra.gmra.mxu1 %vm1186_vm4, %v3805_v28 }
0x1ae8   : > { %v9808_v31 = vpop.eup %9807  ;;  %9327 = vmatpush3.msra.mxu1 %v3972_v29  ;;  %9328 = vmatprep.mubr.msk.f32.mxu1 %vm10070_vm0, %v10069_v0 }
0x1ae9   : > { %v3970_v32 = vmul.f32 %v9808_v31, %v9804_v23  ;;  %9336 = vmatprep.subr.mxu1 %v10069_v0  ;;  %v3608_v23 = vadd.f32 %v3605_v21, %v10767_v39 }
0x1aeb   : > { %9329 = vmatmul.mubr.msk.f32.vlgmr.msra.gmra.mxu1 %vm1186_vm4, %v3970_v32  ;;  %v3613_v25 = vmul.f32 %v3608_v23, %v3608_v23 }
0x1aec   : > { %9338 = vmatprep.mubr.msk.f32.mxu1 %vm10070_vm0, %v10069_v0  ;;  %9337 = vmatpush3.msra.mxu1 %v3639_v33 }
0x1aed   : > { %9346 = vmatprep.subr.mxu1 %v10069_v0  ;;  %v3614_v26 = vsel %vm1108_vm3, %v3613_v25, 0.0 }
0x1ba7   : > { %v3878_v37 = vpop.f32.mrf.mxu1 }
0x1ba8   : > { %9339 = vmatmul.mubr.msk.f32.vlgmr.msra.gmra.mxu1 %vm1186_vm4, %v3878_v37 }
0x1ba9   : > { %v9320_v38 = vpop.f32.mrf.mxu1  ;;  %9348 = vmatprep.mubr.msk.f32.mxu1 %vm10070_vm0, %v10069_v0 }
0x1bab   : > { %v4043_v40 = vpop.f32.mrf.mxu1 }
0x1bac   : > { %9334 = vmatmul.mubr.msk.f32.vlgmr.msra.gmra.mxu0 %vm1186_vm4, %v4043_v40 }
0x1bad   : > { %9342 = vmatpush3.xpose.msk.msra.mxu0 %vm1186_vm4, %v4196_v41  ;;  %v9330_v43 = vpop.f32.mrf.mxu1  ;;  %9343 = vmatprep.mubr.msk.f32.mxu0 %vm10070_vm0, %v10069_v0 }
0x1bae   : > { %9351 = vmatprep.subr.mxu0 %v10069_v0 }
0x1bb0   : > { %9344 = vmatmul.mubr.msk.f32.vlgmr.msra.gmra.mxu0 %vm1186_vm4, %v4194_v44 }
0x1bb1   : > { %9353 = vmatprep.mubr.msk.f32.mxu0 %vm10070_vm0, %v10069_v0  ;;  %9352 = vmatpush3.msra.mxu0 %v3641_v8  ;;  %v4699_v8 = vld [vmem:[#allocation2 + $0x10] sm:$0xff] }
0x1bb2   : > { %9361 = vmatprep.subr.mxu0 %v10069_v0 }
0x1c68   : > { %v4189_v45 = vpop.f32.mrf.mxu1 }
0x1c6a   : > { %v9340_v46 = vpop.f32.mrf.mxu1 }
0x1c6c   : > { %v4116_v47 = vpop.f32.mrf.mxu0 }
0x1c6d   : > { %v10889_v18 = vadd.f32 %v4189_v45, %v4116_v47  ;;  %v4704_v45 = vld [vmem:[#allocation4 + $0x18] sm:$0xff]  ;;  %v3627_v47 = vrot.slane %v10761_v30, %v10604_v34 }
0x1c6e   : > { %v9335_v49 = vpop.f32.mrf.mxu0 }
0x1c6f   : > { %v4703_v49 = vld [vmem:[#allocation4 + $0x10] sm:$0xff] }
0x1c70   : > { %v4267_v50 = vpop.f32.mrf.mxu0 }
0x1c71   : > { %v4268_v51 = vadd.f32 %v4267_v50, %v10846_v5 }
0x1c72   : > { %v9345_v52 = vpop.f32.mrf.mxu0 }
0x1c73   : > { %v4271_v53 = vsel %vm1186_vm4, %v4268_v51, -inf }
0x1c74   : > { %4272 = vmax.xlane.f32.xlu1 %v4271_v53  ;;  %v3632_v53 = vrot.slane %v10761_v30, %v10607_v35 }
0x1c85   : > { %4434 = vrot.lane.b32.xlu1 %v10820_v59, %s11548_s3 }
0x1c89   : > { %4432 = vrot.lane.b32.xlu1 %v10827_v62, %s11547_s6 }
0x1cfd   : > { %v4273_v54 = vpop.xlane.xlu1 %4272 }
0x1cfe   : > { %v4274_v55 = vsub.f32 %v4268_v51, %v4273_v54  ;;  %v4702_v51 = vld [vmem:[#allocation4 + $0x8] sm:$0xff]  ;;  %v4701_v54 = vld [vmem:[#allocation4] sm:$0xff] }
0x1d00   : > { %v4275_v61 = vmul.f32 1.442695, %v4274_v55 }
0x1d01   : > { %v4435_v6 = vpop.permute.xlu1 %4434 }
0x1d02   : > { %9809 = vpow2.f32 %v4275_v61 }
0x1d05   : > { %v4433_v7 = vpop.permute.xlu1 %4432 }
0x1d0f   : > { %v9810_v63 = vpop.eup %9809 }
0x1d10   : > { %v4277_v1 = vsel %vm1186_vm4, %v9810_v63, 0.0 }
0x1d11   : > { %4278 = vadd.xlane.f32.xlu0 %v4277_v1 }
0x1d27   : > { %4282 = vrot.lane.b32.xlu0 %v10820_v59, %s11546_s5 }
0x1d9a   : > { %v4279_v2 = vpop.xlane.xlu0 %4278 }
0x1d9b   : > { %9811 = vrcp.f32 %v4279_v2 }
0x1d9e   : > { %v4283_v4 = vpop.permute.xlu0 %4282 }
0x1d9f   : > { %9347 = vmatpush3.msra.mxu1 %v4283_v4 }
0x1da0   : > { %9356 = vmatprep.subr.mxu1 %v10069_v0 }
0x1da8   : > { %v9812_v12 = vpop.eup %9811 }
0x1da9   : > { %v4281_v62 = vmul.f32 %v9812_v12, %v9810_v63 }
0x1dab   : > { %9349 = vmatmul.mubr.msk.f32.vlgmr.msra.gmra.mxu1 %vm1186_vm4, %v4281_v62 }
0x1dac   : > { %9357 = vmatpush3.xpose.msk.msra.mxu1 %vm1186_vm4, %v4435_v6  ;;  %9358 = vmatprep.mubr.msk.f32.mxu1 %vm10070_vm0, %v10069_v0 }
0x1dad   : > { %9366 = vmatprep.subr.mxu1 %v10069_v0 }
0x1daf   : > { %9359 = vmatmul.mubr.msk.f32.vlgmr.msra.gmra.mxu1 %vm1186_vm4, %v4433_v7  ;;  %v4700_v7 = vld [vmem:[#allocation2 + $0x18] sm:$0xff] }
0x1db0   : > { %9368 = vmatprep.mubr.msk.f32.mxu1 %vm10070_vm0, %v10069_v0  ;;  %9367 = vmatpush3.msra.mxu1 %v3642_v15 }
0x1db1   : > { %9382 = vmatprep.subr.mxu1 %v10069_v0 }
0x1e6b   : > { %v4354_v9 = vpop.f32.mrf.mxu1 }
0x1e6c   : > { %9354 = vmatmul.mubr.msk.f32.vlgmr.msra.gmra.mxu0 %vm1186_vm4, %v4354_v9  ;;  %v4698_v9 = vld [vmem:[#allocation2 + $0x8] sm:$0xff] }
0x1e6d   : > { %v9350_v10 = vpop.f32.mrf.mxu1  ;;  %9363 = vmatprep.mubr.msk.f32.mxu0 %vm10070_vm0, %v10069_v0 }
0x1e6f   : > { %v4506_v11 = vpop.f32.mrf.mxu1 }
0x1e70   : > { %v4507_v13 = vadd.f32 %v4506_v11, %v10846_v5 }
0x1e71   : > { %v9360_v14 = vpop.f32.mrf.mxu1 }
0x1e72   : > { %v4510_v16 = vsel %vm1186_vm4, %v4507_v13, -inf }
0x1e73   : > { %4511 = vmax.xlane.f32.xlu0 %v4510_v16 }
0x1e89   : > { %4521 = vrot.lane.b32.xlu0 %v10820_v59, %s11549_s17  ;;  %v3609_v59 = vsel %vm1108_vm3, %v3608_v23, 0.0 }
0x1efc   : > { %v4512_v56 = vpop.xlane.xlu0 %4511 }
0x1efd   : > { %v4513_v42 = vsub.f32 %v4507_v13, %v4512_v56 }
0x1eff   : > { %v4514_v17 = vmul.f32 1.442695, %v4513_v42 }
0x1f00   : > { %v4522_v19 = vpop.permute.xlu0 %4521 }
0x1f01   : > { %9813 = vpow2.f32 %v4514_v17  ;;  %9362 = vmatpush3.msra.mxu0 %v4522_v19  ;;  %v10968_v17 = vld [vmem:[%s11464_s20] sm:$0x3f] }
0x1f02   : > { %9371 = vmatprep.subr.mxu0 %v10069_v0  ;;  %v4690_v20 = vrot.slane %v10968_v17, %v10547_v58 }
0x1f0e   : > { %v9814_v22 = vpop.eup %9813 }
0x1f0f   : > { %v4516_v24 = vsel %vm1186_vm4, %v9814_v22, 0.0 }
0x1f10   : > { %4517 = vadd.xlane.f32.xlu1 %v4516_v24 }
0x1f14   : > { %3610 = vadd.xlane.f32.xlu1 %v3609_v59 }
0x1f18   : > { %3615 = vadd.xlane.f32.xlu1 %v3614_v26 }
0x1f2c   : > { %v4427_v27 = vpop.f32.mrf.mxu0 }
0x1f2d   : > { %v4431_v39 = vadd.f32 %v4427_v27, %v10889_v18 }
0x1f2e   : > { %v9355_v3 = vpop.f32.mrf.mxu0 }
0x1f99   : > { %v4518_v28 = vpop.xlane.xlu1 %4517 }
0x1f9a   : > { %9815 = vrcp.f32 %v4518_v28 }
0x1f9d   : > { %v3611_v32 = vpop.xlane.xlu1 %3610 }
0x1f9e   : > { %v3612_v36 = vmul.f32 0.03125, %v3611_v32 }
0x1fa0   : > { %v3618_v38 = vmul.f32 %v3612_v36, %v3612_v36  ;;  %v3620_v44 = vsub.f32 %v3608_v23, %v3612_v36  ;;  %v4695_v23 = vrot.slane %v10968_v17, %v10555_v60 }
0x1fa1   : > { %v3616_v33 = vpop.xlane.xlu1 %3615 }
0x1fa2   : > { %v3617_v37 = vmul.f32 0.03125, %v3616_v33 }
0x1fa4   : > { %v3619_v40 = vsub.f32 %v3617_v37, %v3618_v38 }
0x1fa6   : > { %v3621_v41 = vadd.f32 1e-05, %v3619_v40 }
0x1fa7   : > { %v9816_v29 = vpop.eup %9815 }
0x1fa8   : > { %v4520_v31 = vmul.f32 %v9816_v29, %v9814_v22  ;;  %9817 = vrsqrt.f32 %v3621_v41 }
0x1faa   : > { %9364 = vmatmul.mubr.msk.f32.vlgmr.msra.gmra.mxu0 %vm1186_vm4, %v4520_v31 }
0x1fab   : > { %9379 = vmatprep.mubr.msk.f32.mxu0 %vm10070_vm0, %v10069_v0  ;;  %9372 = vmatpush3.msra.mxu0 %v4700_v7 }
0x1fac   : > { %9373 = vmatprep.subr.mxu0 %v10069_v0 }
0x1fad   : > { %9374 = vmatpush3.msra.mxu0 %v4699_v8 }
0x1fae   : > { %9375 = vmatprep.subr.mxu0 %v10069_v0 }
0x1faf   : > { %9376 = vmatpush3.msra.mxu0 %v4698_v9 }
0x1fb0   : > { %9377 = vmatprep.subr.mxu0 %v10069_v0 }
0x1fb5   : > { %v9818_v43 = vpop.eup %9817 }
0x1fb6   : > { %v3623_v46 = vmul.f32 %v9818_v43, %v3620_v44 }
0x1fb8   : > { %v3628_v52 = vmul.f32 %v3627_v47, %v3623_v46 }
0x1fba   : > { %v10947_v55 = vadd.f32 %v3632_v53, %v3628_v52 }
0x206a   : > { %v4593_v18 = vpop.f32.mrf.mxu0 }
0x206b   : > { %9369 = vmatmul.mubr.msk.f32.vlgmr.msra.gmra.mxu1 %vm1186_vm4, %v4593_v18 }
0x206c   : > { %9383 = vmatpush3.msra.mxu1 %v4704_v45  ;;  %v9365_v50 = vpop.f32.mrf.mxu0  ;;  %9390 = vmatprep.mubr.msk.f32.mxu1 %vm10070_vm0, %v10069_v0 }
0x206d   : > { %9384 = vmatprep.subr.mxu1 %v10069_v0 }
0x206e   : > { %9385 = vmatpush3.msra.mxu1 %v4703_v49 }
0x206f   : > { %9386 = vmatprep.subr.mxu1 %v10069_v0 }
0x2070   : > { %9387 = vmatpush3.msra.mxu1 %v4702_v51 }
0x2071   : > { %9388 = vmatprep.subr.mxu1 %v10069_v0 }
0x2072   : > { %9389 = vmatpush3.msra.mxu1 %v4701_v54 }
0x2073   : > { %9391 = vmatmul.mubr.msk.f32.vlgmr.msra.gmra.mxu1 %vm1108_vm3, %v10947_v55  ;;  %9398 = vmatprep.subr.mxu1 %v10069_v0 }
0x2074   : > { %9400 = vmatprep.mubr.msk.f32.mxu1 %vm10070_vm0, %v10069_v0 }
0x212b   : > { %v4666_v61 = vpop.f32.mrf.mxu1 }
0x212c   : > { %v4670_v30 = vadd.f32 %v4666_v61, %v4431_v39 }
0x212d   : > { %v9370_v63 = vpop.f32.mrf.mxu1 }
0x212e   : > { %v4671_v1 = vadd.f32 %v4670_v30, %v10794_v48  ;;  %v4697_v48 = vld [vmem:[#allocation2] sm:$0xff]  ;;  %v4706_v63 = vld [vmem:[#allocation6 + $0x8] sm:$0xff] }
0x212f   : > { %9378 = vmatpush3.msra.mxu0 %v4697_v48  ;;  %v4705_v30 = vld [vmem:[#allocation6] sm:$0xff] }
0x2130   : > { %v4672_v2 = vsel %vm1108_vm3, %v4671_v1, 0.0  ;;  %v4676_v4 = vmul.f32 %v4671_v1, %v4671_v1  ;;  %9393 = vmatprep.subr.mxu0 %v10069_v0 }
0x2131   : > { %4673 = vadd.xlane.f32.xlu1 %v4672_v2 }
0x2132   : > { %v4677_v6 = vsel %vm1108_vm3, %v4676_v4, 0.0 }
0x2133   : > { %v10956_v12 = vpop.f32.mrf.mxu1 }
0x2135   : > { %v9392_v62 = vpop.f32.mrf.mxu1  ;;  %4678 = vadd.xlane.f32.xlu1 %v4677_v6 }
0x2146   : > { %5021 = vrot.lane.b32.xlu1 %v10956_v12, %s11541_s4 }
0x21ba   : > { %v4674_v10 = vpop.xlane.xlu1 %4673 }
0x21bb   : > { %v4675_v11 = vmul.f32 0.03125, %v4674_v10 }
0x21bd   : > { %v4681_v14 = vmul.f32 %v4675_v11, %v4675_v11  ;;  %v4683_v19 = vsub.f32 %v4671_v1, %v4675_v11 }
0x21be   : > { %v4679_v13 = vpop.xlane.xlu1 %4678 }
0x21bf   : > { %v4680_v16 = vmul.f32 0.03125, %v4679_v13 }
0x21c1   : > { %v4682_v56 = vsub.f32 %v4680_v16, %v4681_v14 }
0x21c2   : > { %v5022_v27 = vpop.permute.xlu1 %5021 }
0x21c3   : > { %v4684_v42 = vadd.f32 1e-05, %v4682_v56 }
0x21c5   : > { %9819 = vrsqrt.f32 %v4684_v42 }
0x21d2   : > { %v9820_v21 = vpop.eup %9819 }
0x21d3   : > { %v4686_v22 = vmul.f32 %v9820_v21, %v4683_v19 }
0x21d5   : > { %v4691_v24 = vmul.f32 %v4690_v20, %v4686_v22 }
0x21d7   : > { %v10974_v59 = vadd.f32 %v4695_v23, %v4691_v24 }
0x21d9   : > { %9380 = vmatmul.mubr.msk.f32.vlgmr.msra.gmra.mxu0 %vm1108_vm3, %v10974_v59 }
0x21da   : > { %9394 = vmatpush3.xpose.msk.msra.mxu0 %vm1186_vm4, %v10956_v12  ;;  %9395 = vmatprep.mubr.msk.f32.mxu0 %vm10070_vm0, %v10069_v0 }
0x21db   : > { %9403 = vmatprep.subr.mxu0 %v10069_v0 }
0x2299   : > { %v4778_v25 = vpop.f32.mrf.mxu0 }
0x229a   : > { %v10983_v26 = vmul.f32 0.35355338, %v4778_v25 }
0x229b   : > { %v9381_v15 = vpop.f32.mrf.mxu0 }
0x229c   : > { %5019 = vrot.lane.b32.xlu0 %v10983_v26, %s11541_s4  ;;  %9396 = vmatmul.mubr.msk.f32.vlgmr.msra.gmra.mxu0 %vm1186_vm4, %v10983_v26 }
0x229d   : > { %9404 = vmatpush3.xpose.msk.msra.mxu0 %vm1186_vm4, %v5022_v27  ;;  %9405 = vmatprep.mubr.msk.f32.mxu0 %vm10070_vm0, %v10069_v0  ;;  %v4707_v27 = vld [vmem:[#allocation6 + $0x10] sm:$0xff] }
0x229e   : > { %9413 = vmatprep.subr.mxu0 %v10069_v0 }
0x230e   : > { %v5020_v39 = vpop.permute.xlu0 %5019 }
0x230f   : > { %9406 = vmatmul.mubr.msk.f32.vlgmr.msra.gmra.mxu0 %vm1186_vm4, %v5020_v39 }
0x2310   : > { %9415 = vmatprep.mubr.msk.f32.mxu0 %vm10070_vm0, %v10069_v0  ;;  %9414 = vmatpush3.msra.mxu0 %v4706_v63  ;;  %v5837_v63 = vld [vmem:[#allocation7 + $0x18] sm:$0xff] }
0x2311   : > { %9423 = vmatprep.subr.mxu0 %v10069_v0 }
0x235c   : > { %v4928_v3 = vpop.f32.mrf.mxu0 }
0x235d   : > { %v4932_v28 = vsel %vm1186_vm4, %v4928_v3, -inf }
0x235e   : > { %4933 = vmax.xlane.f32.xlu0 %v4932_v28  ;;  %v9397_v29 = vpop.f32.mrf.mxu0 }
0x23cf   : > { %v5093_v31 = vpop.f32.mrf.mxu0 }
0x23d0   : > { %v5097_v32 = vsel %vm1186_vm4, %v5093_v31, -inf }
0x23d1   : > { %5098 = vmax.xlane.f32.xlu1 %v5097_v32  ;;  %v9407_v33 = vpop.f32.mrf.mxu0 }
0x23e2   : > { %5108 = vrot.lane.b32.xlu1 %v10956_v12, %s11552_s18 }
0x23e7   : > { %v4934_v36 = vpop.xlane.xlu0 %4933 }
0x23e8   : > { %v4935_v37 = vsub.f32 %v4928_v3, %v4934_v36 }
0x23ea   : > { %v4936_v38 = vmul.f32 1.442695, %v4935_v37 }
0x23ec   : > { %9821 = vpow2.f32 %v4936_v38 }
0x23f9   : > { %v9822_v40 = vpop.eup %9821 }
0x23fa   : > { %v4938_v41 = vsel %vm1186_vm4, %v9822_v40, 0.0 }
0x23fb   : > { %4939 = vadd.xlane.f32.xlu0 %v4938_v41  ;;  %v4708_v41 = vld [vmem:[#allocation6 + $0x18] sm:$0xff] }
0x245a   : > { %v5099_v43 = vpop.xlane.xlu1 %5098 }
0x245b   : > { %v5100_v44 = vsub.f32 %v5093_v31, %v5099_v43 }
0x245d   : > { %v5101_v45 = vmul.f32 1.442695, %v5100_v44 }
0x245e   : > { %v5109_v53 = vpop.permute.xlu1 %5108 }
0x245f   : > { %9823 = vpow2.f32 %v5101_v45 }
0x246c   : > { %v9824_v46 = vpop.eup %9823 }
0x246d   : > { %v5103_v47 = vsel %vm1186_vm4, %v9824_v46, 0.0 }
0x246e   : > { %5104 = vadd.xlane.f32.xlu0 %v5103_v47 }
0x2484   : > { %4943 = vrot.lane.b32.xlu0 %v10956_v12, %s11540_s28  ;;  %v4940_v18 = vpop.xlane.xlu0 %4939 }
0x2485   : > { %9825 = vrcp.f32 %v4940_v18 }
0x2488   : > { %5332 = vrot.lane.b32.xlu0 %v10956_v12, %s11543_s10 }
0x248c   : > { %5330 = vrot.lane.b32.xlu0 %v10983_v26, %s11543_s10 }
0x2492   : > { %v9826_v50 = vpop.eup %9825 }
0x2493   : > { %v4942_v52 = vmul.f32 %v9826_v50, %v9822_v40 }
0x24f7   : > { %v5105_v49 = vpop.xlane.xlu0 %5104 }
0x24f8   : > { %9827 = vrcp.f32 %v5105_v49 }
0x24fb   : > { %v4944_v51 = vpop.permute.xlu0 %4943 }
0x24fc   : > { %9399 = vmatpush3.msra.mxu1 %v4944_v51 }
0x24fd   : > { %9401 = vmatmul.mubr.msk.f32.vlgmr.msra.gmra.mxu1 %vm1186_vm4, %v4942_v52  ;;  %9408 = vmatprep.subr.mxu1 %v10069_v0 }
0x24fe   : > { %9409 = vmatpush3.msra.mxu1 %v5109_v53  ;;  %9410 = vmatprep.mubr.msk.f32.mxu1 %vm10070_vm0, %v10069_v0 }
0x24ff   : > { %9418 = vmatprep.subr.mxu1 %v10069_v0  ;;  %v5333_v4 = vpop.permute.xlu0 %5332 }
0x2503   : > { %v5331_v7 = vpop.permute.xlu0 %5330 }
0x2505   : > { %v9828_v54 = vpop.eup %9827 }
0x2506   : > { %v5107_v61 = vmul.f32 %v9828_v54, %v9824_v46 }
0x2508   : > { %9411 = vmatmul.mubr.msk.f32.vlgmr.msra.gmra.mxu1 %vm1186_vm4, %v5107_v61 }
0x2509   : > { %9420 = vmatprep.mubr.msk.f32.mxu1 %vm10070_vm0, %v10069_v0  ;;  %9419 = vmatpush3.msra.mxu1 %v4705_v30 }
0x250a   : > { %9428 = vmatprep.subr.mxu1 %v10069_v0 }
0x25bd   : > { %v5015_v1 = vpop.f32.mrf.mxu1 }
0x25be   : > { %9421 = vmatmul.mubr.msk.f32.vlgmr.msra.gmra.mxu1 %vm1186_vm4, %v5015_v1  ;;  %v5836_v1 = vld [vmem:[#allocation7 + $0x10] sm:$0xff] }
0x25bf   : > { %v9402_v2 = vpop.f32.mrf.mxu1  ;;  %9430 = vmatprep.mubr.msk.f32.mxu1 %vm10070_vm0, %v10069_v0 }
0x25c0   : > { %v5835_v2 = vld [vmem:[#allocation7 + $0x8] sm:$0xff] }
0x25c8   : > { %v5180_v6 = vpop.f32.mrf.mxu1 }
0x25c9   : > { %9416 = vmatmul.mubr.msk.f32.vlgmr.msra.gmra.mxu0 %vm1186_vm4, %v5180_v6  ;;  %v5845_v6 = vld [vmem:[%s11467_s23 + $0x30] sm:$0xff] }
0x25ca   : > { %9424 = vmatpush3.xpose.msk.msra.mxu0 %vm1186_vm4, %v5333_v4  ;;  %v9412_v62 = vpop.f32.mrf.mxu1  ;;  %9425 = vmatprep.mubr.msk.f32.mxu0 %vm10070_vm0, %v10069_v0  ;;  %v5834_v4 = vld [vmem:[#allocation7] sm:$0xff] }
0x25cb   : > { %9433 = vmatprep.subr.mxu0 %v10069_v0  ;;  %v5844_v62 = vld [vmem:[%s11467_s23 + $0x28] sm:$0xff] }
0x25cd   : > { %9426 = vmatmul.mubr.msk.f32.vlgmr.msra.gmra.mxu0 %vm1186_vm4, %v5331_v7  ;;  %v5843_v7 = vld [vmem:[%s11467_s23 + $0x20] sm:$0xff] }
0x25ce   : > { %9435 = vmatprep.mubr.msk.f32.mxu0 %vm10070_vm0, %v10069_v0  ;;  %9434 = vmatpush3.msra.mxu0 %v4707_v27 }
0x25cf   : > { %9443 = vmatprep.subr.mxu0 %v10069_v0 }
0x267e   : > { %v5326_v8 = vpop.f32.mrf.mxu1 }
0x2680   : > { %v9422_v9 = vpop.f32.mrf.mxu1 }
0x2689   : > { %v5253_v48 = vpop.f32.mrf.mxu0 }
0x268a   : > { %v5327_v10 = vadd.f32 %v5326_v8, %v5253_v48  ;;  %v5842_v8 = vld [vmem:[%s11467_s23 + $0x18] sm:$0xff] }
0x268b   : > { %v9417_v11 = vpop.f32.mrf.mxu0 }
0x268d   : > { %v5404_v13 = vpop.f32.mrf.mxu0 }
0x268e   : > { %v5408_v14 = vsel %vm1186_vm4, %v5404_v13, -inf }
0x268f   : > { %5409 = vmax.xlane.f32.xlu1 %v5408_v14  ;;  %v9427_v16 = vpop.f32.mrf.mxu0 }
0x26a0   : > { %5571 = vrot.lane.b32.xlu1 %v10956_v12, %s11547_s6 }
0x26a4   : > { %5569 = vrot.lane.b32.xlu1 %v10983_v26, %s11547_s6 }
0x2718   : > { %v5410_v56 = vpop.xlane.xlu1 %5409 }
0x2719   : > { %v5411_v42 = vsub.f32 %v5404_v13, %v5410_v56 }
0x271b   : > { %v5412_v19 = vmul.f32 1.442695, %v5411_v42  ;;  %v5827_v42 = vrot.slane %v10968_v17, %v10604_v34 }
0x271c   : > { %v5572_v25 = vpop.permute.xlu1 %5571 }
0x271d   : > { %9829 = vpow2.f32 %v5412_v19 }
0x2720   : > { %v5570_v15 = vpop.permute.xlu1 %5569 }
0x272a   : > { %v9830_v20 = vpop.eup %9829 }
0x272b   : > { %v5414_v21 = vsel %vm1186_vm4, %v9830_v20, 0.0 }
0x272c   : > { %5415 = vadd.xlane.f32.xlu0 %v5414_v21  ;;  %v5832_v21 = vrot.slane %v10968_v17, %v10607_v35 }
0x2742   : > { %5419 = vrot.lane.b32.xlu0 %v10956_v12, %s11545_s2 }
0x27b5   : > { %v5416_v22 = vpop.xlane.xlu0 %5415 }
0x27b6   : > { %9831 = vrcp.f32 %v5416_v22 }
0x27b9   : > { %v5420_v23 = vpop.permute.xlu0 %5419 }
0x27ba   : > { %9429 = vmatpush3.msra.mxu1 %v5420_v23 }
0x27bb   : > { %9438 = vmatprep.subr.mxu1 %v10069_v0 }
0x27c3   : > { %v9832_v24 = vpop.eup %9831 }
0x27c4   : > { %v5418_v26 = vmul.f32 %v9832_v24, %v9830_v20  ;;  %v5841_v24 = vld [vmem:[%s11467_s23 + $0x10] sm:$0xff] }
0x27c6   : > { %9431 = vmatmul.mubr.msk.f32.vlgmr.msra.gmra.mxu1 %vm1186_vm4, %v5418_v26  ;;  %v5839_v26 = vld [vmem:[%s11467_s23] sm:$0xff] }
0x27c7   : > { %9439 = vmatpush3.xpose.msk.msra.mxu1 %vm1186_vm4, %v5572_v25  ;;  %9440 = vmatprep.mubr.msk.f32.mxu1 %vm10070_vm0, %v10069_v0  ;;  %v5840_v25 = vld [vmem:[%s11467_s23 + $0x8] sm:$0xff] }
0x27c8   : > { %9448 = vmatprep.subr.mxu1 %v10069_v0 }
0x27ca   : > { %9441 = vmatmul.mubr.msk.f32.vlgmr.msra.gmra.mxu1 %vm1186_vm4, %v5570_v15  ;;  %v8775_v15 = vld [vmem:[#allocation9] ss:$0 sm:$0xff] }
0x27cb   : > { %9450 = vmatprep.mubr.msk.f32.mxu1 %vm10070_vm0, %v10069_v0  ;;  %9449 = vmatpush3.msra.mxu1 %v4708_v41  ;;  %v8783_v41 = vld [vmem:[%s11459_s15 + $0x38] sm:$0xff] }
0x27cc   : > { %9464 = vmatprep.subr.mxu1 %v10069_v0 }
0x2886   : > { %v5491_v39 = vpop.f32.mrf.mxu1 }
0x2887   : > { %9436 = vmatmul.mubr.msk.f32.vlgmr.msra.gmra.mxu0 %vm1186_vm4, %v5491_v39 }
0x2888   : > { %v9432_v3 = vpop.f32.mrf.mxu1  ;;  %9445 = vmatprep.mubr.msk.f32.mxu0 %vm10070_vm0, %v10069_v0 }
0x288a   : > { %v5643_v28 = vpop.f32.mrf.mxu1 }
0x288b   : > { %v5647_v29 = vsel %vm1186_vm4, %v5643_v28, -inf }
0x288c   : > { %5648 = vmax.xlane.f32.xlu0 %v5647_v29  ;;  %v9442_v31 = vpop.f32.mrf.mxu1  ;;  %v8777_v29 = vld [vmem:[#allocation10] ss:$0 sm:$0xff] }
0x28a2   : > { %5658 = vrot.lane.b32.xlu0 %v10956_v12, %s11548_s3 }
0x2915   : > { %v5649_v32 = vpop.xlane.xlu0 %5648 }
0x2916   : > { %v5650_v33 = vsub.f32 %v5643_v28, %v5649_v32 }
0x2918   : > { %v5651_v36 = vmul.f32 1.442695, %v5650_v33 }
0x2919   : > { %v5659_v37 = vpop.permute.xlu0 %5658 }
0x291a   : > { %9833 = vpow2.f32 %v5651_v36  ;;  %9444 = vmatpush3.msra.mxu0 %v5659_v37 }
0x291b   : > { %9453 = vmatprep.subr.mxu0 %v10069_v0 }
0x2927   : > { %v9834_v38 = vpop.eup %9833 }
0x2928   : > { %v5653_v40 = vsel %vm1186_vm4, %v9834_v38, 0.0 }
0x2929   : > { %5654 = vadd.xlane.f32.xlu1 %v5653_v40 }
0x2947   : > { %v5564_v43 = vpop.f32.mrf.mxu0 }
0x2948   : > { %v5568_v44 = vadd.f32 %v5564_v43, %v5327_v10  ;;  %v8782_v43 = vld [vmem:[%s11459_s15 + $0x30] sm:$0xff] }
0x2949   : > { %v9437_v45 = vpop.f32.mrf.mxu0 }
0x294a   : > { %v8780_v45 = vld [vmem:[%s11459_s15 + $0x20] sm:$0xff] }
0x29b2   : > { %v5655_v12 = vpop.xlane.xlu1 %5654 }
0x29b3   : > { %9835 = vrcp.f32 %v5655_v12 }
0x29c0   : > { %v9836_v46 = vpop.eup %9835 }
0x29c1   : > { %v5657_v47 = vmul.f32 %v9836_v46, %v9834_v38 }
0x29c3   : > { %9446 = vmatmul.mubr.msk.f32.vlgmr.msra.gmra.mxu0 %vm1186_vm4, %v5657_v47 }
0x29c4   : > { %9461 = vmatprep.mubr.msk.f32.mxu0 %vm10070_vm0, %v10069_v0  ;;  %9454 = vmatpush3.msra.mxu0 %v5837_v63 }
0x29c5   : > { %9455 = vmatprep.subr.mxu0 %v10069_v0 }
0x29c6   : > { %9456 = vmatpush3.msra.mxu0 %v5836_v1 }
0x29c7   : > { %9457 = vmatprep.subr.mxu0 %v10069_v0 }
0x29c8   : > { %9458 = vmatpush3.msra.mxu0 %v5835_v2 }
0x29c9   : > { %9459 = vmatprep.subr.mxu0 %v10069_v0 }
0x29ca   : > { %9460 = vmatpush3.msra.mxu0 %v5834_v4 }
0x29cb   : > { %9483 = vmatprep.subr.mxu0 %v10069_v0 }
0x2a83   : > { %v5730_v18 = vpop.f32.mrf.mxu0 }
0x2a84   : > { %9451 = vmatmul.mubr.msk.f32.vlgmr.msra.gmra.mxu1 %vm1186_vm4, %v5730_v18 }
0x2a85   : > { %v9447_v49 = vpop.f32.mrf.mxu0  ;;  %9480 = vmatprep.mubr.msk.f32.mxu1 %vm10070_vm0, %v10069_v0 }
0x2b44   : > { %v5803_v50 = vpop.f32.mrf.mxu1 }
0x2b45   : > { %v5807_v51 = vadd.f32 %v5803_v50, %v5568_v44  ;;  %v8781_v44 = vld [vmem:[%s11459_s15 + $0x28] sm:$0xff] }
0x2b46   : > { %v9452_v52 = vpop.f32.mrf.mxu1 }
0x2b47   : > { %v5808_v53 = vadd.f32 %v5807_v51, %v10974_v59  ;;  %v5846_v59 = vld [vmem:[%s11467_s23 + $0x38] sm:$0xff]  ;;  %v6025_v52 = vsub.s32 4, %v10544_v57 }
0x2b48   : > { %9465 = vmatpush3.msra.mxu1 %v5846_v59 }
0x2b49   : > { %v5809_v54 = vsel %vm1108_vm3, %v5808_v53, 0.0  ;;  %v5813_v61 = vmul.f32 %v5808_v53, %v5808_v53  ;;  %9466 = vmatprep.subr.mxu1 %v10069_v0 }
0x2b4a   : > { %5810 = vadd.xlane.f32.xlu1 %v5809_v54  ;;  %9467 = vmatpush3.msra.mxu1 %v5845_v6 }
0x2b4b   : > { %v5814_v30 = vsel %vm1108_vm3, %v5813_v61, 0.0  ;;  %9468 = vmatprep.subr.mxu1 %v10069_v0  ;;  %v6026_v61 = vrot.slane %v10968_v17, %v6025_v52 }
0x2b4c   : > { %9469 = vmatpush3.msra.mxu1 %v5844_v62 }
0x2b4d   : > { %9470 = vmatprep.subr.mxu1 %v10069_v0 }
0x2b4e   : > { %5815 = vadd.xlane.f32.xlu1 %v5814_v30  ;;  %9471 = vmatpush3.msra.mxu1 %v5843_v7 }
0x2b4f   : > { %9472 = vmatprep.subr.mxu1 %v10069_v0 }
0x2b50   : > { %9473 = vmatpush3.msra.mxu1 %v5842_v8 }
0x2b51   : > { %9474 = vmatprep.subr.mxu1 %v10069_v0 }
0x2b52   : > { %9475 = vmatpush3.msra.mxu1 %v5841_v24 }
0x2b53   : > { %9476 = vmatprep.subr.mxu1 %v10069_v0 }
0x2b54   : > { %9477 = vmatpush3.msra.mxu1 %v5840_v25 }
0x2b55   : > { %9478 = vmatprep.subr.mxu1 %v10069_v0 }
0x2b56   : > { %9479 = vmatpush3.msra.mxu1 %v5839_v26 }
0x2b57   : > { %9499 = vmatprep.subr.mxu1 %v10069_v0 }
0x2bd3   : > { %v5811_v9 = vpop.xlane.xlu1 %5810 }
0x2bd4   : > { %v5812_v48 = vmul.f32 0.03125, %v5811_v9 }
0x2bd6   : > { %v5818_v11 = vmul.f32 %v5812_v48, %v5812_v48  ;;  %v5820_v56 = vsub.f32 %v5808_v53, %v5812_v48  ;;  %v6030_v53 = vsub.s32 5, %v10544_v57 }
0x2bd7   : > { %v5816_v10 = vpop.xlane.xlu1 %5815 }
0x2bd8   : > { %v5817_v13 = vmul.f32 0.03125, %v5816_v10  ;;  %v6031_v1 = vrot.slane %v10968_v17, %v6030_v53 }
0x2bda   : > { %v5819_v14 = vsub.f32 %v5817_v13, %v5818_v11 }
0x2bdc   : > { %v5821_v16 = vadd.f32 1e-05, %v5819_v14 }
0x2bde   : > { %9837 = vrsqrt.f32 %v5821_v16 }
0x2beb   : > { %v9838_v19 = vpop.eup %9837 }
0x2bec   : > { %v5823_v20 = vmul.f32 %v9838_v19, %v5820_v56 }
0x2bee   : > { %v5828_v22 = vmul.f32 %v5827_v42, %v5823_v20 }
0x2bf0   : > { %v5833_v23 = vadd.f32 %v5832_v21, %v5828_v22 }
0x2bf2   : > { %9462 = vmatmul.mubr.msk.f32.vlgmr.msra.gmra.mxu0 %vm1108_vm3, %v5833_v23 }
0x2bf3   : > { %9491 = vmatprep.mubr.msk.f32.mxu0 %vm10070_vm0, %v10069_v0  ;;  %9484 = vmatpush3.msra.mxu0 %v8783_v41 }
0x2bf4   : > { %9485 = vmatprep.subr.mxu0 %v10069_v0 }
0x2bf5   : > { %9486 = vmatpush3.msra.mxu0 %v8782_v43 }
0x2bf6   : > { %9487 = vmatprep.subr.mxu0 %v10069_v0 }
0x2bf7   : > { %9488 = vmatpush3.msra.mxu0 %v8781_v44 }
0x2bf8   : > { %9489 = vmatprep.subr.mxu0 %v10069_v0 }
0x2bf9   : > { %9490 = vmatpush3.msra.mxu0 %v8780_v45 }
0x2bfa   : > { %9494 = vmatprep.subr.mxu0 %v10069_v0 }
0x2cb2   : > { %v5923_v27 = vpop.f32.mrf.mxu0 }
0x2cb3   : > { %v5924_v39 = vadd.f32 %v8775_v15, %v5923_v27 }
0x2cb4   : > { %v9463_v3 = vpop.f32.mrf.mxu0 }
0x2cb5   : > { %v5927_v28 = vmax.f32 %v5924_v39, 0.0 }
0x2cb7   : > { %9481 = vmatmul.mubr.msk.f32.vlgmr.msra.gmra.mxu1 %vm2265_vm5, %v5927_v28 }
0x2cb8   : > { %9501 = vmatprep.mubr.msk.f32.mxu1 %vm10070_vm0, %v10069_v0 }
0x2d77   : > { %v6003_v31 = vpop.f32.mrf.mxu1 }
0x2d78   : > { %v6004_v32 = vadd.f32 %v8777_v29, %v6003_v31 }
0x2d79   : > { %v9482_v33 = vpop.f32.mrf.mxu1 }
0x2d7a   : > { %v6007_v36 = vadd.f32 %v6004_v32, %v5833_v23 }
0x2d7c   : > { %v6008_v37 = vsel %vm1108_vm3, %v6007_v36, 0.0  ;;  %v6012_v38 = vmul.f32 %v6007_v36, %v6007_v36 }
0x2d7d   : > { %6009 = vadd.xlane.f32.xlu1 %v6008_v37  ;;  %v8785_v37 = vld [vmem:[%s11460_s16 + $0x28] sm:$0xff] }
0x2d7e   : > { %v6013_v40 = vsel %vm1108_vm3, %v6012_v38, 0.0 }
0x2d81   : > { %6014 = vadd.xlane.f32.xlu1 %v6013_v40 }
0x2e06   : > { %v6010_v12 = vpop.xlane.xlu1 %6009 }
0x2e07   : > { %v6011_v46 = vmul.f32 0.03125, %v6010_v12 }
0x2e09   : > { %v6017_v18 = vmul.f32 %v6011_v46, %v6011_v46  ;;  %v6019_v54 = vsub.f32 %v6007_v36, %v6011_v46  ;;  %v8784_v36 = vld [vmem:[%s11460_s16 + $0x20] sm:$0xff] }
0x2e0a   : > { %v6015_v47 = vpop.xlane.xlu1 %6014 }
0x2e0b   : > { %v6016_v49 = vmul.f32 0.03125, %v6015_v47 }
0x2e0d   : > { %v6018_v50 = vsub.f32 %v6016_v49, %v6017_v18 }
0x2e0f   : > { %v6020_v51 = vadd.f32 1e-05, %v6018_v50 }
0x2e11   : > { %9839 = vrsqrt.f32 %v6020_v51 }
0x2e1e   : > { %v9840_v30 = vpop.eup %9839 }
0x2e1f   : > { %v6022_v63 = vmul.f32 %v9840_v30, %v6019_v54 }
0x2e21   : > { %v6027_v2 = vmul.f32 %v6026_v61, %v6022_v63 }
0x2e23   : > { %v11137_v4 = vadd.f32 %v6031_v1, %v6027_v2 }
0x2e25   : > { %9492 = vmatmul.mubr.msk.f32.vlgmr.msra.gmra.mxu0 %vm1108_vm3, %v11137_v4 }
0x2e26   : > { %9496 = vmatprep.mubr.msk.f32.mxu0 %vm10070_vm0, %v10069_v0 }
0x2ee5   : > { %v11143_v59 = vpop.f32.mrf.mxu0 }
0x2ee6   : > { %6286 = vrot.lane.b32.xlu0 %v11143_v59, %s11552_s18  ;;  %6120 = vrot.lane.b32.xlu1 %v11143_v59, %s11540_s28  ;;  %v11150_v17 = vmul.f32 0.35355338, %v11143_v59 }
0x2ee7   : > { %v9493_v6 = vpop.f32.mrf.mxu0 }
0x2eea   : > { %6284 = vrot.lane.b32.xlu0 %v11150_v17, %s11541_s4 }
0x2f58   : > { %v6121_v62 = vpop.permute.xlu1 %6120  ;;  %v6287_v7 = vpop.permute.xlu0 %6286 }
0x2f59   : > { %9495 = vmatpush3.xpose.msk.msra.mxu0 %vm1186_vm4, %v6121_v62 }
0x2f5a   : > { %9504 = vmatprep.subr.mxu0 %v10069_v0 }
0x2f5c   : > { %9497 = vmatmul.mubr.msk.f32.vlgmr.msra.gmra.mxu0 %vm1186_vm4, %v11150_v17  ;;  %v6285_v8 = vpop.permute.xlu0 %6284 }
0x2f5d   : > { %9505 = vmatpush3.xpose.msk.msra.mxu0 %vm1186_vm4, %v6287_v7  ;;  %9506 = vmatprep.mubr.msk.f32.mxu0 %vm10070_vm0, %v10069_v0 }
0x2f5e   : > { %9514 = vmatprep.subr.mxu0 %v10069_v0 }
0x2f60   : > { %9507 = vmatmul.mubr.msk.f32.vlgmr.msra.gmra.mxu0 %vm1186_vm4, %v6285_v8 }
0x2f61   : > { %9516 = vmatprep.mubr.msk.f32.mxu0 %vm10070_vm0, %v10069_v0  ;;  %9515 = vmatpush3.msra.mxu0 %v8785_v37 }
0x2f62   : > { %9524 = vmatprep.subr.mxu0 %v10069_v0 }
0x301c   : > { %v6193_v9 = vpop.f32.mrf.mxu0 }
0x301d   : > { %v6194_v48 = vadd.f32 %v6193_v9, %v10846_v5 }
0x301e   : > { %v9498_v10 = vpop.f32.mrf.mxu0 }
0x301f   : > { %v6197_v11 = vsel %vm1186_vm4, %v6194_v48, -inf  ;;  %v8786_v10 = vld [vmem:[%s11460_s16 + $0x30] sm:$0xff] }
0x3020   : > { %6198 = vmax.xlane.f32.xlu0 %v6197_v11  ;;  %v6358_v13 = vpop.f32.mrf.mxu0 }
0x3021   : > { %v6359_v14 = vadd.f32 %v6358_v13, %v10846_v5 }
0x3022   : > { %v9508_v16 = vpop.f32.mrf.mxu0 }
0x3023   : > { %v6362_v56 = vsel %vm1186_vm4, %v6359_v14, -inf }
0x3024   : > { %6363 = vmax.xlane.f32.xlu1 %v6362_v56 }
0x3035   : > { %6373 = vrot.lane.b32.xlu1 %v11143_v59, %s11542_s9  ;;  %s918_s9 = scalar_lea.vmem %s11471_s27, %s10348_s8 }
0x3039   : > { %6595 = vrot.lane.b32.xlu1 %v11150_v17, %s11543_s10 }
0x30a9   : > { %v6199_v42 = vpop.xlane.xlu0 %6198 }
0x30aa   : > { %v6200_v19 = vsub.f32 %v6194_v48, %v6199_v42 }
0x30ac   : > { %v6201_v20 = vmul.f32 1.442695, %v6200_v19 }
0x30ad   : > { %v6364_v21 = vpop.xlane.xlu1 %6363 }
0x30ae   : > { %9841 = vpow2.f32 %v6201_v20  ;;  %v6365_v22 = vsub.f32 %v6359_v14, %v6364_v21 }
0x30b0   : > { %v6366_v23 = vmul.f32 1.442695, %v6365_v22 }
0x30b1   : > { %v6374_v31 = vpop.permute.xlu1 %6373 }
0x30b2   : > { %9843 = vpow2.f32 %v6366_v23 }
0x30b5   : > { %v6596_v45 = vpop.permute.xlu1 %6595 }
0x30bb   : > { %v9842_v24 = vpop.eup %9841 }
0x30bc   : > { %v6203_v25 = vsel %vm1186_vm4, %v9842_v24, 0.0 }
0x30bd   : > { %6204 = vadd.xlane.f32.xlu0 %v6203_v25 }
0x30bf   : > { %v9844_v26 = vpop.eup %9843 }
0x30c0   : > { %v6368_v15 = vsel %vm1186_vm4, %v9844_v26, 0.0 }
0x30c1   : > { %6369 = vadd.xlane.f32.xlu0 %v6368_v15 }
0x30d7   : > { %6208 = vrot.lane.b32.xlu0 %v11143_v59, %s11544_s30 }
0x30db   : > { %6597 = vrot.lane.b32.xlu0 %v11143_v59, %s11545_s2 }
0x3146   : > { %v6205_v27 = vpop.xlane.xlu0 %6204 }
0x3147   : > { %9845 = vrcp.f32 %v6205_v27 }
0x314a   : > { %v6370_v39 = vpop.xlane.xlu0 %6369 }
0x314b   : > { %9847 = vrcp.f32 %v6370_v39 }
0x314e   : > { %v6209_v3 = vpop.permute.xlu0 %6208 }
0x314f   : > { %9500 = vmatpush3.msra.mxu1 %v6209_v3 }
0x3150   : > { %9509 = vmatprep.subr.mxu1 %v10069_v0 }
0x3152   : > { %v6598_v43 = vpop.permute.xlu0 %6597 }
0x3154   : > { %v9846_v28 = vpop.eup %9845 }
0x3155   : > { %v6207_v29 = vmul.f32 %v9846_v28, %v9842_v24  ;;  %v8787_v24 = vld [vmem:[%s11460_s16 + $0x38] sm:$0xff] }
0x3157   : > { %9502 = vmatmul.mubr.msk.f32.vlgmr.msra.gmra.mxu1 %vm1186_vm4, %v6207_v29  ;;  %v7107_v29 = vld [vmem:[#allocation4 + $0x30] sm:$0xff] }
0x3158   : > { %v9848_v32 = vpop.eup %9847  ;;  %9510 = vmatpush3.msra.mxu1 %v6374_v31  ;;  %9511 = vmatprep.mubr.msk.f32.mxu1 %vm10070_vm0, %v10069_v0 }
0x3159   : > { %v6372_v33 = vmul.f32 %v9848_v32, %v9844_v26  ;;  %9519 = vmatprep.subr.mxu1 %v10069_v0  ;;  %v7106_v32 = vld [vmem:[#allocation4 + $0x28] sm:$0xff] }
0x315b   : > { %9512 = vmatmul.mubr.msk.f32.vlgmr.msra.gmra.mxu1 %vm1186_vm4, %v6372_v33  ;;  %v7105_v33 = vld [vmem:[#allocation4 + $0x20] sm:$0xff] }
0x315c   : > { %9521 = vmatprep.mubr.msk.f32.mxu1 %vm10070_vm0, %v10069_v0  ;;  %9520 = vmatpush3.msra.mxu1 %v8784_v36 }
0x315d   : > { %9529 = vmatprep.subr.mxu1 %v10069_v0 }
0x3217   : > { %v6280_v38 = vpop.f32.mrf.mxu1 }
0x3218   : > { %9522 = vmatmul.mubr.msk.f32.vlgmr.msra.gmra.mxu1 %vm1186_vm4, %v6280_v38 }
0x3219   : > { %v9503_v40 = vpop.f32.mrf.mxu1  ;;  %9531 = vmatprep.mubr.msk.f32.mxu1 %vm10070_vm0, %v10069_v0 }
0x321b   : > { %v6445_v41 = vpop.f32.mrf.mxu1 }
0x321c   : > { %9517 = vmatmul.mubr.msk.f32.vlgmr.msra.gmra.mxu0 %vm1186_vm4, %v6445_v41 }
0x321d   : > { %9525 = vmatpush3.xpose.msk.msra.mxu0 %vm1186_vm4, %v6598_v43  ;;  %v9513_v44 = vpop.f32.mrf.mxu1  ;;  %9526 = vmatprep.mubr.msk.f32.mxu0 %vm10070_vm0, %v10069_v0 }
0x321e   : > { %9534 = vmatprep.subr.mxu0 %v10069_v0 }
0x3220   : > { %9527 = vmatmul.mubr.msk.f32.vlgmr.msra.gmra.mxu0 %vm1186_vm4, %v6596_v45 }
0x3221   : > { %9536 = vmatprep.mubr.msk.f32.mxu0 %vm10070_vm0, %v10069_v0  ;;  %9535 = vmatpush3.msra.mxu0 %v8786_v10 }
0x3222   : > { %9544 = vmatprep.subr.mxu0 %v10069_v0 }
0x32d8   : > { %v6591_v12 = vpop.f32.mrf.mxu1 }
0x32da   : > { %v9523_v46 = vpop.f32.mrf.mxu1 }
0x32db   : > { %v7102_v46 = vld [vmem:[#allocation2 + $0x30] sm:$0xff] }
0x32dc   : > { %v6518_v47 = vpop.f32.mrf.mxu0 }
0x32dd   : > { %v6592_v18 = vadd.f32 %v6591_v12, %v6518_v47  ;;  %v7101_v47 = vld [vmem:[#allocation2 + $0x28] sm:$0xff] }
0x32de   : > { %v9518_v49 = vpop.f32.mrf.mxu0 }
0x32e0   : > { %v6669_v50 = vpop.f32.mrf.mxu0 }
0x32e1   : > { %v6670_v51 = vadd.f32 %v6669_v50, %v10846_v5 }
0x32e2   : > { %v9528_v54 = vpop.f32.mrf.mxu0 }
0x32e3   : > { %v6673_v61 = vsel %vm1186_vm4, %v6670_v51, -inf }
0x32e4   : > { %6674 = vmax.xlane.f32.xlu0 %v6673_v61 }
0x32fa   : > { %6684 = vrot.lane.b32.xlu0 %v11143_v59, %s11546_s5 }
0x32fe   : > { %6834 = vrot.lane.b32.xlu0 %v11150_v17, %s11547_s6 }
0x336d   : > { %v6675_v30 = vpop.xlane.xlu0 %6674 }
0x336e   : > { %v6676_v63 = vsub.f32 %v6670_v51, %v6675_v30 }
0x3370   : > { %v6677_v1 = vmul.f32 1.442695, %v6676_v63  ;;  %v11269_v63 = vld [vmem:[%s11464_s20 + $0x8] sm:$0x3f] }
0x3371   : > { %v6685_v2 = vpop.permute.xlu0 %6684 }
0x3372   : > { %9849 = vpow2.f32 %v6677_v1  ;;  %9530 = vmatpush3.msra.mxu1 %v6685_v2  ;;  %v7092_v2 = vrot.slane %v11269_v63, %v10547_v58 }
0x3373   : > { %9539 = vmatprep.subr.mxu1 %v10069_v0 }
0x3375   : > { %v6835_v48 = vpop.permute.xlu0 %6834 }
0x337f   : > { %v9850_v6 = vpop.eup %9849 }
0x3380   : > { %v6679_v62 = vsel %vm1186_vm4, %v9850_v6, 0.0 }
0x3381   : > { %6680 = vadd.xlane.f32.xlu1 %v6679_v62 }
0x3392   : > { %6836 = vrot.lane.b32.xlu1 %v11143_v59, %s11548_s3 }
0x340a   : > { %v6681_v7 = vpop.xlane.xlu1 %6680 }
0x340b   : > { %9851 = vrcp.f32 %v6681_v7  ;;  %v7097_v7 = vrot.slane %v11269_v63, %v10555_v60 }
0x340e   : > { %v6837_v17 = vpop.permute.xlu1 %6836 }
0x3418   : > { %v9852_v8 = vpop.eup %9851 }
0x3419   : > { %v6683_v9 = vmul.f32 %v9852_v8, %v9850_v6 }
0x341b   : > { %9532 = vmatmul.mubr.msk.f32.vlgmr.msra.gmra.mxu1 %vm1186_vm4, %v6683_v9 }
0x341c   : > { %9540 = vmatpush3.xpose.msk.msra.mxu1 %vm1186_vm4, %v6837_v17  ;;  %9541 = vmatprep.mubr.msk.f32.mxu1 %vm10070_vm0, %v10069_v0 }
0x341d   : > { %9549 = vmatprep.subr.mxu1 %v10069_v0 }
0x341f   : > { %9542 = vmatmul.mubr.msk.f32.vlgmr.msra.gmra.mxu1 %vm1186_vm4, %v6835_v48 }
0x3420   : > { %9551 = vmatprep.mubr.msk.f32.mxu1 %vm10070_vm0, %v10069_v0  ;;  %9550 = vmatpush3.msra.mxu1 %v8787_v24 }
0x3421   : > { %9565 = vmatprep.subr.mxu1 %v10069_v0 }
0x34db   : > { %v6756_v11 = vpop.f32.mrf.mxu1 }
0x34dc   : > { %9537 = vmatmul.mubr.msk.f32.vlgmr.msra.gmra.mxu0 %vm1186_vm4, %v6756_v11 }
0x34dd   : > { %v9533_v13 = vpop.f32.mrf.mxu1  ;;  %9546 = vmatprep.mubr.msk.f32.mxu0 %vm10070_vm0, %v10069_v0 }
0x34df   : > { %v6908_v14 = vpop.f32.mrf.mxu1 }
0x34e0   : > { %v6909_v16 = vadd.f32 %v6908_v14, %v10846_v5 }
0x34e1   : > { %v9543_v56 = vpop.f32.mrf.mxu1 }
0x34e2   : > { %v6912_v42 = vsel %vm1186_vm4, %v6909_v16, -inf }
0x34e3   : > { %6913 = vmax.xlane.f32.xlu1 %v6912_v42 }
0x356c   : > { %v6914_v19 = vpop.xlane.xlu1 %6913 }
0x356d   : > { %v6915_v20 = vsub.f32 %v6909_v16, %v6914_v19 }
0x356f   : > { %v6916_v21 = vmul.f32 1.442695, %v6915_v20 }
0x3571   : > { %9853 = vpow2.f32 %v6916_v21 }
0x357e   : > { %v9854_v22 = vpop.eup %9853 }
0x357f   : > { %v6918_v23 = vsel %vm1186_vm4, %v9854_v22, 0.0 }
0x3580   : > { %6919 = vadd.xlane.f32.xlu0 %v6918_v23 }
0x3596   : > { %6923 = vrot.lane.b32.xlu0 %v11143_v59, %s11549_s17  ;;  %v7108_v59 = vld [vmem:[#allocation4 + $0x38] sm:$0xff] }
0x359c   : > { %v6829_v5 = vpop.f32.mrf.mxu0 }
0x359d   : > { %v6833_v25 = vadd.f32 %v6829_v5, %v6592_v18 }
0x359e   : > { %v9538_v26 = vpop.f32.mrf.mxu0 }
0x3609   : > { %v6920_v15 = vpop.xlane.xlu0 %6919 }
0x360a   : > { %9855 = vrcp.f32 %v6920_v15 }
0x360d   : > { %v6924_v27 = vpop.permute.xlu0 %6923 }
0x360e   : > { %9545 = vmatpush3.msra.mxu0 %v6924_v27 }
0x360f   : > { %9554 = vmatprep.subr.mxu0 %v10069_v0 }
0x3617   : > { %v9856_v39 = vpop.eup %9855 }
0x3618   : > { %v6922_v3 = vmul.f32 %v9856_v39, %v9854_v22 }
0x361a   : > { %9547 = vmatmul.mubr.msk.f32.vlgmr.msra.gmra.mxu0 %vm1186_vm4, %v6922_v3 }
0x361b   : > { %9562 = vmatprep.mubr.msk.f32.mxu0 %vm10070_vm0, %v10069_v0 }
0x36da   : > { %v6995_v28 = vpop.f32.mrf.mxu0 }
0x36db   : > { %9552 = vmatmul.mubr.msk.f32.vlgmr.msra.gmra.mxu1 %vm1186_vm4, %v6995_v28  ;;  %v7111_v28 = vld [vmem:[#allocation6 + $0x28] sm:$0xff] }
0x36dc   : > { %9566 = vmatpush3.msra.mxu1 %v7108_v59  ;;  %v9548_v31 = vpop.f32.mrf.mxu0  ;;  %9573 = vmatprep.mubr.msk.f32.mxu1 %vm10070_vm0, %v10069_v0 }
0x36dd   : > { %9567 = vmatprep.subr.mxu1 %v10069_v0 }
0x36de   : > { %9568 = vmatpush3.msra.mxu1 %v7107_v29 }
0x36df   : > { %9569 = vmatprep.subr.mxu1 %v10069_v0 }
0x36e0   : > { %9570 = vmatpush3.msra.mxu1 %v7106_v32 }
0x36e1   : > { %9571 = vmatprep.subr.mxu1 %v10069_v0 }
0x36e2   : > { %9572 = vmatpush3.msra.mxu1 %v7105_v33 }
0x36e3   : > { %9574 = vmatmul.mubr.msk.f32.vlgmr.msra.gmra.mxu1 %vm1108_vm3, %v10947_v55  ;;  %9581 = vmatprep.subr.mxu1 %v10069_v0  ;;  %v7103_v55 = vld [vmem:[#allocation2 + $0x38] sm:$0xff] }
0x36e4   : > { %9583 = vmatprep.mubr.msk.f32.mxu1 %vm10070_vm0, %v10069_v0  ;;  %9555 = vmatpush3.msra.mxu0 %v7103_v55 }
0x36e5   : > { %9556 = vmatprep.subr.mxu0 %v10069_v0 }
0x36e6   : > { %9557 = vmatpush3.msra.mxu0 %v7102_v46 }
0x36e7   : > { %9558 = vmatprep.subr.mxu0 %v10069_v0 }
0x36e8   : > { %9559 = vmatpush3.msra.mxu0 %v7101_v47 }
0x36e9   : > { %9560 = vmatprep.subr.mxu0 %v10069_v0 }
0x379b   : > { %v7068_v36 = vpop.f32.mrf.mxu1 }
0x379c   : > { %v7072_v37 = vadd.f32 %v7068_v36, %v6833_v25  ;;  %v7110_v36 = vld [vmem:[#allocation6 + $0x20] sm:$0xff] }
0x379d   : > { %v9553_v38 = vpop.f32.mrf.mxu1 }
0x379e   : > { %v7073_v40 = vadd.f32 %v7072_v37, %v11137_v4  ;;  %v7100_v4 = vld [vmem:[#allocation2 + $0x20] sm:$0xff] }
0x379f   : > { %9561 = vmatpush3.msra.mxu0 %v7100_v4 }
0x37a0   : > { %v7074_v41 = vsel %vm1108_vm3, %v7073_v40, 0.0  ;;  %v7078_v43 = vmul.f32 %v7073_v40, %v7073_v40  ;;  %9576 = vmatprep.subr.mxu0 %v10069_v0 }
0x37a1   : > { %7075 = vadd.xlane.f32.xlu1 %v7074_v41 }
0x37a2   : > { %v7079_v45 = vsel %vm1108_vm3, %v7078_v43, 0.0 }
0x37a3   : > { %v11257_v44 = vpop.f32.mrf.mxu1 }
0x37a5   : > { %v9575_v12 = vpop.f32.mrf.mxu1  ;;  %7080 = vadd.xlane.f32.xlu1 %v7079_v45 }
0x37b6   : > { %7423 = vrot.lane.b32.xlu1 %v11257_v44, %s11541_s4 }
0x382a   : > { %v7076_v18 = vpop.xlane.xlu1 %7075 }
0x382b   : > { %v7077_v49 = vmul.f32 0.03125, %v7076_v18 }
0x382d   : > { %v7083_v51 = vmul.f32 %v7077_v49, %v7077_v49  ;;  %v7085_v1 = vsub.f32 %v7073_v40, %v7077_v49 }
0x382e   : > { %v7081_v50 = vpop.xlane.xlu1 %7080 }
0x382f   : > { %v7082_v54 = vmul.f32 0.03125, %v7081_v50 }
0x3831   : > { %v7084_v61 = vsub.f32 %v7082_v54, %v7083_v51 }
0x3832   : > { %v7424_v10 = vpop.permute.xlu1 %7423 }
0x3833   : > { %v7086_v30 = vadd.f32 1e-05, %v7084_v61 }
0x3835   : > { %9857 = vrsqrt.f32 %v7086_v30 }
0x3842   : > { %v9858_v6 = vpop.eup %9857 }
0x3843   : > { %v7088_v62 = vmul.f32 %v9858_v6, %v7085_v1 }
0x3845   : > { %v7093_v8 = vmul.f32 %v7092_v2, %v7088_v62 }
0x3847   : > { %v11275_v9 = vadd.f32 %v7097_v7, %v7093_v8 }
0x3849   : > { %9563 = vmatmul.mubr.msk.f32.vlgmr.msra.gmra.mxu0 %vm1108_vm3, %v11275_v9 }
0x384a   : > { %9577 = vmatpush3.xpose.msk.msra.mxu0 %vm1186_vm4, %v11257_v44  ;;  %9578 = vmatprep.mubr.msk.f32.mxu0 %vm10070_vm0, %v10069_v0 }
0x384b   : > { %9586 = vmatprep.subr.mxu0 %v10069_v0 }
0x3909   : > { %v7183_v58 = vpop.f32.mrf.mxu0 }
0x390a   : > { %v11284_v17 = vmul.f32 0.35355338, %v7183_v58  ;;  %v7112_v58 = vld [vmem:[#allocation6 + $0x30] sm:$0xff] }
0x390b   : > { %v9564_v48 = vpop.f32.mrf.mxu0 }
0x390c   : > { %7421 = vrot.lane.b32.xlu0 %v11284_v17, %s11541_s4  ;;  %9579 = vmatmul.mubr.msk.f32.vlgmr.msra.gmra.mxu0 %vm1186_vm4, %v11284_v17 }
0x390d   : > { %9587 = vmatpush3.xpose.msk.msra.mxu0 %vm1186_vm4, %v7424_v10  ;;  %9588 = vmatprep.mubr.msk.f32.mxu0 %vm10070_vm0, %v10069_v0 }
0x390e   : > { %9596 = vmatprep.subr.mxu0 %v10069_v0 }
0x397e   : > { %v7422_v60 = vpop.permute.xlu0 %7421 }
0x397f   : > { %9589 = vmatmul.mubr.msk.f32.vlgmr.msra.gmra.mxu0 %vm1186_vm4, %v7422_v60 }
0x3980   : > { %9598 = vmatprep.mubr.msk.f32.mxu0 %vm10070_vm0, %v10069_v0  ;;  %9597 = vmatpush3.msra.mxu0 %v7111_v28 }
0x3981   : > { %9606 = vmatprep.subr.mxu0 %v10069_v0 }
0x39cc   : > { %v7330_v11 = vpop.f32.mrf.mxu0 }
0x39cd   : > { %v7334_v13 = vsel %vm1186_vm4, %v7330_v11, -inf }
0x39ce   : > { %7335 = vmax.xlane.f32.xlu0 %v7334_v13  ;;  %v9580_v14 = vpop.f32.mrf.mxu0 }
0x3a3f   : > { %v7495_v16 = vpop.f32.mrf.mxu0 }
0x3a40   : > { %v7499_v56 = vsel %vm1186_vm4, %v7495_v16, -inf }
0x3a41   : > { %7500 = vmax.xlane.f32.xlu1 %v7499_v56  ;;  %v9590_v42 = vpop.f32.mrf.mxu0 }
0x3a52   : > { %7345 = vrot.lane.b32.xlu1 %v11257_v44, %s11540_s28 }
0x3a56   : > { %7734 = vrot.lane.b32.xlu1 %v11257_v44, %s11543_s10 }
0x3a57   : > { %v7336_v19 = vpop.xlane.xlu0 %7335 }
0x3a58   : > { %v7337_v20 = vsub.f32 %v7330_v11, %v7336_v19  ;;  %v7113_v19 = vld [vmem:[#allocation6 + $0x38] sm:$0xff] }
0x3a5a   : > { %v7338_v21 = vmul.f32 1.442695, %v7337_v20  ;;  %7732 = vrot.lane.b32.xlu1 %v11284_v17, %s11543_s10 }
0x3a5c   : > { %9859 = vpow2.f32 %v7338_v21 }
0x3a69   : > { %v9860_v22 = vpop.eup %9859 }
0x3a6a   : > { %v7340_v23 = vsel %vm1186_vm4, %v9860_v22, 0.0 }
0x3a6b   : > { %7341 = vadd.xlane.f32.xlu0 %v7340_v23 }
0x3aca   : > { %v7501_v24 = vpop.xlane.xlu1 %7500 }
0x3acb   : > { %v7502_v5 = vsub.f32 %v7495_v16, %v7501_v24 }
0x3acd   : > { %v7503_v25 = vmul.f32 1.442695, %v7502_v5 }
0x3ace   : > { %v7346_v26 = vpop.permute.xlu1 %7345 }
0x3acf   : > { %9861 = vpow2.f32 %v7503_v25  ;;  %9582 = vmatpush3.msra.mxu1 %v7346_v26 }
0x3ad0   : > { %9591 = vmatprep.subr.mxu1 %v10069_v0 }
0x3ad2   : > { %v7735_v40 = vpop.permute.xlu1 %7734 }
0x3ad6   : > { %v7733_v45 = vpop.permute.xlu1 %7732 }
0x3adc   : > { %v9862_v15 = vpop.eup %9861 }
0x3add   : > { %v7505_v27 = vsel %vm1186_vm4, %v9862_v15, 0.0 }
0x3ade   : > { %7506 = vadd.xlane.f32.xlu0 %v7505_v27 }
0x3af4   : > { %v7342_v39 = vpop.xlane.xlu0 %7341  ;;  %7510 = vrot.lane.b32.xlu0 %v11257_v44, %s11552_s18 }
0x3af5   : > { %9863 = vrcp.f32 %v7342_v39 }
0x3b02   : > { %v9864_v3 = vpop.eup %9863 }
0x3b03   : > { %v7344_v59 = vmul.f32 %v9864_v3, %v9860_v22 }
0x3b05   : > { %9584 = vmatmul.mubr.msk.f32.vlgmr.msra.gmra.mxu1 %vm1186_vm4, %v7344_v59 }
0x3b06   : > { %9593 = vmatprep.mubr.msk.f32.mxu1 %vm10070_vm0, %v10069_v0 }
0x3b67   : > { %v7507_v29 = vpop.xlane.xlu0 %7506 }
0x3b68   : > { %9865 = vrcp.f32 %v7507_v29 }
0x3b6b   : > { %v7511_v31 = vpop.permute.xlu0 %7510 }
0x3b6c   : > { %9592 = vmatpush3.msra.mxu1 %v7511_v31 }
0x3b6d   : > { %9601 = vmatprep.subr.mxu1 %v10069_v0 }
0x3b75   : > { %v9866_v32 = vpop.eup %9865 }
0x3b76   : > { %v7509_v33 = vmul.f32 %v9866_v32, %v9862_v15  ;;  %v8240_v32 = vld [vmem:[#allocation7 + $0x38] sm:$0xff] }
0x3b78   : > { %9594 = vmatmul.mubr.msk.f32.vlgmr.msra.gmra.mxu1 %vm1186_vm4, %v7509_v33  ;;  %v8239_v33 = vld [vmem:[#allocation7 + $0x30] sm:$0xff] }
0x3b79   : > { %9602 = vmatpush3.msra.mxu1 %v7110_v36  ;;  %9603 = vmatprep.mubr.msk.f32.mxu1 %vm10070_vm0, %v10069_v0  ;;  %v8238_v36 = vld [vmem:[#allocation7 + $0x28] sm:$0xff] }
0x3b7a   : > { %9611 = vmatprep.subr.mxu1 %v10069_v0 }
0x3bc5   : > { %v7417_v37 = vpop.f32.mrf.mxu1 }
0x3bc6   : > { %9604 = vmatmul.mubr.msk.f32.vlgmr.msra.gmra.mxu1 %vm1186_vm4, %v7417_v37  ;;  %v8237_v37 = vld [vmem:[#allocation7 + $0x20] sm:$0xff] }
0x3bc7   : > { %v9585_v38 = vpop.f32.mrf.mxu1  ;;  %9613 = vmatprep.mubr.msk.f32.mxu1 %vm10070_vm0, %v10069_v0 }
0x3bc8   : > { %v8829_v38 = vld [vmem:[%s11467_s23 + $0x70] sm:$0xff] }
0x3c38   : > { %v7582_v41 = vpop.f32.mrf.mxu1 }
0x3c39   : > { %9599 = vmatmul.mubr.msk.f32.vlgmr.msra.gmra.mxu0 %vm1186_vm4, %v7582_v41  ;;  %v8827_v41 = vld [vmem:[%s11467_s23 + $0x60] sm:$0xff] }
0x3c3a   : > { %9607 = vmatpush3.xpose.msk.msra.mxu0 %vm1186_vm4, %v7735_v40  ;;  %v9595_v43 = vpop.f32.mrf.mxu1  ;;  %9608 = vmatprep.mubr.msk.f32.mxu0 %vm10070_vm0, %v10069_v0  ;;  %v8828_v40 = vld [vmem:[%s11467_s23 + $0x68] sm:$0xff] }
0x3c3b   : > { %9616 = vmatprep.subr.mxu0 %v10069_v0  ;;  %v8826_v43 = vld [vmem:[%s11467_s23 + $0x58] sm:$0xff] }
0x3c3d   : > { %9609 = vmatmul.mubr.msk.f32.vlgmr.msra.gmra.mxu0 %vm1186_vm4, %v7733_v45 }
0x3c3e   : > { %9618 = vmatprep.mubr.msk.f32.mxu0 %vm10070_vm0, %v10069_v0  ;;  %9617 = vmatpush3.msra.mxu0 %v7112_v58 }
0x3c3f   : > { %9626 = vmatprep.subr.mxu0 %v10069_v0 }
0x3c86   : > { %v7728_v12 = vpop.f32.mrf.mxu1 }
0x3c88   : > { %v9605_v55 = vpop.f32.mrf.mxu1 }
0x3cf9   : > { %v7655_v46 = vpop.f32.mrf.mxu0 }
0x3cfa   : > { %v7729_v20 = vadd.f32 %v7728_v12, %v7655_v46 }
0x3cfb   : > { %v9600_v47 = vpop.f32.mrf.mxu0 }
0x3cfd   : > { %v7806_v4 = vpop.f32.mrf.mxu0 }
0x3cfe   : > { %v7810_v18 = vsel %vm1186_vm4, %v7806_v4, -inf }
0x3cff   : > { %7811 = vmax.xlane.f32.xlu0 %v7810_v18  ;;  %v9610_v49 = vpop.f32.mrf.mxu0 }
0x3d15   : > { %7821 = vrot.lane.b32.xlu0 %v11257_v44, %s11545_s2 }
0x3d19   : > { %7971 = vrot.lane.b32.xlu0 %v11284_v17, %s11547_s6 }
0x3d88   : > { %v7812_v50 = vpop.xlane.xlu0 %7811 }
0x3d89   : > { %v7813_v51 = vsub.f32 %v7806_v4, %v7812_v50  ;;  %v8229_v50 = vrot.slane %v11269_v63, %v10604_v34  ;;  %v8824_v34 = vld [vmem:[%s11467_s23 + $0x48] sm:$0xff] }
0x3d8b   : > { %v7814_v54 = vmul.f32 1.442695, %v7813_v51 }
0x3d8c   : > { %v7822_v61 = vpop.permute.xlu0 %7821 }
0x3d8d   : > { %9867 = vpow2.f32 %v7814_v54  ;;  %9612 = vmatpush3.msra.mxu1 %v7822_v61  ;;  %v8234_v61 = vrot.slane %v11269_v63, %v10607_v35  ;;  %v8823_v35 = vld [vmem:[%s11467_s23 + $0x40] sm:$0xff] }
0x3d8e   : > { %9621 = vmatprep.subr.mxu1 %v10069_v0 }
0x3d90   : > { %v7972_v8 = vpop.permute.xlu0 %7971 }
0x3d9a   : > { %v9868_v30 = vpop.eup %9867 }
0x3d9b   : > { %v7816_v1 = vsel %vm1186_vm4, %v9868_v30, 0.0 }
0x3d9c   : > { %7817 = vadd.xlane.f32.xlu1 %v7816_v1 }
0x3dad   : > { %7973 = vrot.lane.b32.xlu1 %v11257_v44, %s11547_s6 }
0x3e25   : > { %v7818_v2 = vpop.xlane.xlu1 %7817 }
0x3e26   : > { %9869 = vrcp.f32 %v7818_v2  ;;  %v8825_v2 = vld [vmem:[%s11467_s23 + $0x50] sm:$0xff] }
0x3e29   : > { %v7974_v7 = vpop.permute.xlu1 %7973 }
0x3e33   : > { %v9870_v6 = vpop.eup %9869 }
0x3e34   : > { %v7820_v62 = vmul.f32 %v9870_v6, %v9868_v30  ;;  %v8831_v6 = vld [vmem:[#allocation9 + $0x1] ss:$0 sm:$0xff] }
0x3e36   : > { %9614 = vmatmul.mubr.msk.f32.vlgmr.msra.gmra.mxu1 %vm1186_vm4, %v7820_v62 }
0x3e37   : > { %9622 = vmatpush3.xpose.msk.msra.mxu1 %vm1186_vm4, %v7974_v7  ;;  %9623 = vmatprep.mubr.msk.f32.mxu1 %vm10070_vm0, %v10069_v0 }
0x3e38   : > { %9631 = vmatprep.subr.mxu1 %v10069_v0 }
0x3e3a   : > { %9624 = vmatmul.mubr.msk.f32.vlgmr.msra.gmra.mxu1 %vm1186_vm4, %v7972_v8 }
0x3e3b   : > { %9633 = vmatprep.mubr.msk.f32.mxu1 %vm10070_vm0, %v10069_v0  ;;  %9632 = vmatpush3.msra.mxu1 %v7113_v19  ;;  %v8440_v19 = vld [vmem:[%s11469_s25 + $0x8] sm:$0xff] }
0x3e3c   : > { %9647 = vmatprep.subr.mxu1 %v10069_v0 }
0x3ef6   : > { %v7893_v17 = vpop.f32.mrf.mxu1 }
0x3ef7   : > { %9619 = vmatmul.mubr.msk.f32.vlgmr.msra.gmra.mxu0 %vm1186_vm4, %v7893_v17  ;;  %v8833_v17 = vld [vmem:[#allocation10 + $0x1] ss:$0 sm:$0xff] }
0x3ef8   : > { %v9615_v48 = vpop.f32.mrf.mxu1  ;;  %9628 = vmatprep.mubr.msk.f32.mxu0 %vm10070_vm0, %v10069_v0 }
0x3efa   : > { %v8045_v10 = vpop.f32.mrf.mxu1 }
0x3efb   : > { %v8049_v60 = vsel %vm1186_vm4, %v8045_v10, -inf }
0x3efc   : > { %8050 = vmax.xlane.f32.xlu1 %v8049_v60  ;;  %v9625_v11 = vpop.f32.mrf.mxu1 }
0x3f85   : > { %v8051_v13 = vpop.xlane.xlu1 %8050 }
0x3f86   : > { %v8052_v14 = vsub.f32 %v8045_v10, %v8051_v13 }
0x3f88   : > { %v8053_v16 = vmul.f32 1.442695, %v8052_v14 }
0x3f8a   : > { %9871 = vpow2.f32 %v8053_v16 }
0x3f97   : > { %v9872_v56 = vpop.eup %9871 }
0x3f98   : > { %v8055_v42 = vsel %vm1186_vm4, %v9872_v56, 0.0 }
0x3f99   : > { %8056 = vadd.xlane.f32.xlu0 %v8055_v42  ;;  %v8441_v42 = vld [vmem:[%s11469_s25 + $0x10] sm:$0xff] }
0x3faf   : > { %8060 = vrot.lane.b32.xlu0 %v11257_v44, %s11548_s3 }
0x3fb7   : > { %v7966_v21 = vpop.f32.mrf.mxu0 }
0x3fb8   : > { %v7970_v22 = vadd.f32 %v7966_v21, %v7729_v20  ;;  %v8439_v20 = vld [vmem:[%s11469_s25] sm:$0xff] }
0x3fb9   : > { %v9620_v23 = vpop.f32.mrf.mxu0 }
0x4022   : > { %v8057_v24 = vpop.xlane.xlu0 %8056 }
0x4023   : > { %9873 = vrcp.f32 %v8057_v24 }
0x4026   : > { %v8061_v5 = vpop.permute.xlu0 %8060 }
0x4027   : > { %9627 = vmatpush3.msra.mxu0 %v8061_v5 }
0x4028   : > { %9636 = vmatprep.subr.mxu0 %v10069_v0 }
0x4030   : > { %v9874_v25 = vpop.eup %9873 }
0x4031   : > { %v8059_v26 = vmul.f32 %v9874_v25, %v9872_v56  ;;  %v8442_v56 = vld [vmem:[%s11469_s25 + $0x18] sm:$0xff] }
0x4033   : > { %9629 = vmatmul.mubr.msk.f32.vlgmr.msra.gmra.mxu0 %vm1186_vm4, %v8059_v26 }
0x4034   : > { %9644 = vmatprep.mubr.msk.f32.mxu0 %vm10070_vm0, %v10069_v0  ;;  %9637 = vmatpush3.msra.mxu0 %v8240_v32 }
0x4035   : > { %9638 = vmatprep.subr.mxu0 %v10069_v0 }
0x4036   : > { %9639 = vmatpush3.msra.mxu0 %v8239_v33 }
0x4037   : > { %9640 = vmatprep.subr.mxu0 %v10069_v0 }
0x4038   : > { %9641 = vmatpush3.msra.mxu0 %v8238_v36 }
0x4039   : > { %9642 = vmatprep.subr.mxu0 %v10069_v0 }
0x403a   : > { %9643 = vmatpush3.msra.mxu0 %v8237_v37 }
0x403b   : > { %9666 = vmatprep.subr.mxu0 %v10069_v0 }
0x40f3   : > { %v8132_v44 = vpop.f32.mrf.mxu0 }
0x40f4   : > { %9634 = vmatmul.mubr.msk.f32.vlgmr.msra.gmra.mxu1 %vm1186_vm4, %v8132_v44 }
0x40f5   : > { %v9630_v15 = vpop.f32.mrf.mxu0  ;;  %9663 = vmatprep.mubr.msk.f32.mxu1 %vm10070_vm0, %v10069_v0 }
0x40f6   : > { %v8432_v15 = vrot.slane %v11269_v63, %v6025_v52 }
0x41b4   : > { %v8205_v27 = vpop.f32.mrf.mxu1 }
0x41b5   : > { %v8209_v39 = vadd.f32 %v8205_v27, %v7970_v22 }
0x41b6   : > { %v9635_v3 = vpop.f32.mrf.mxu1 }
0x41b7   : > { %v8210_v59 = vadd.f32 %v8209_v39, %v11275_v9  ;;  %v8830_v9 = vld [vmem:[%s11467_s23 + $0x78] sm:$0xff] }
0x41b8   : > { %9648 = vmatpush3.msra.mxu1 %v8830_v9 }
0x41b9   : > { %v8211_v28 = vsel %vm1108_vm3, %v8210_v59, 0.0  ;;  %v8215_v29 = vmul.f32 %v8210_v59, %v8210_v59  ;;  %9649 = vmatprep.subr.mxu1 %v10069_v0 }
0x41ba   : > { %8212 = vadd.xlane.f32.xlu1 %v8211_v28  ;;  %9650 = vmatpush3.msra.mxu1 %v8829_v38  ;;  %v8835_v28 = vld [vmem:[%s11470_s26] ss:$0 sm:$0xff] }
0x41bb   : > { %v8216_v31 = vsel %vm1108_vm3, %v8215_v29, 0.0  ;;  %9651 = vmatprep.subr.mxu1 %v10069_v0 }
0x41bc   : > { %9652 = vmatpush3.msra.mxu1 %v8828_v40 }
0x41bd   : > { %9653 = vmatprep.subr.mxu1 %v10069_v0 }
0x41be   : > { %8217 = vadd.xlane.f32.xlu1 %v8216_v31  ;;  %9654 = vmatpush3.msra.mxu1 %v8827_v41 }
0x41bf   : > { %9655 = vmatprep.subr.mxu1 %v10069_v0 }
0x41c0   : > { %9656 = vmatpush3.msra.mxu1 %v8826_v43 }
0x41c1   : > { %9657 = vmatprep.subr.mxu1 %v10069_v0 }
0x41c2   : > { %9658 = vmatpush3.msra.mxu1 %v8825_v2 }
0x41c3   : > { %9659 = vmatprep.subr.mxu1 %v10069_v0 }
0x41c4   : > { %9660 = vmatpush3.msra.mxu1 %v8824_v34 }
0x41c5   : > { %9661 = vmatprep.subr.mxu1 %v10069_v0 }
0x41c6   : > { %9662 = vmatpush3.msra.mxu1 %v8823_v35 }
0x4243   : > { %v8213_v45 = vpop.xlane.xlu1 %8212 }
0x4244   : > { %v8214_v12 = vmul.f32 0.03125, %v8213_v45 }
0x4246   : > { %v8220_v46 = vmul.f32 %v8214_v12, %v8214_v12  ;;  %v8222_v49 = vsub.f32 %v8210_v59, %v8214_v12 }
0x4247   : > { %v8218_v55 = vpop.xlane.xlu1 %8217 }
0x4248   : > { %v8219_v47 = vmul.f32 0.03125, %v8218_v55 }
0x424a   : > { %v8221_v4 = vsub.f32 %v8219_v47, %v8220_v46 }
0x424c   : > { %v8223_v18 = vadd.f32 1e-05, %v8221_v4 }
0x424e   : > { %9875 = vrsqrt.f32 %v8223_v18 }
0x425b   : > { %v9876_v51 = vpop.eup %9875 }
0x425c   : > { %v8225_v54 = vmul.f32 %v9876_v51, %v8222_v49 }
0x425e   : > { %v8230_v30 = vmul.f32 %v8229_v50, %v8225_v54 }
0x4260   : > { %v8235_v1 = vadd.f32 %v8234_v61, %v8230_v30 }
0x4262   : > { %9645 = vmatmul.mubr.msk.f32.vlgmr.msra.gmra.mxu0 %vm1108_vm3, %v8235_v1 }
0x4263   : > { %9674 = vmatprep.mubr.msk.f32.mxu0 %vm10070_vm0, %v10069_v0  ;;  %9667 = vmatpush3.msra.mxu0 %v8442_v56 }
0x4264   : > { %9668 = vmatprep.subr.mxu0 %v10069_v0 }
0x4265   : > { %9669 = vmatpush3.msra.mxu0 %v8441_v42 }
0x4266   : > { %9670 = vmatprep.subr.mxu0 %v10069_v0 }
0x4267   : > { %9671 = vmatpush3.msra.mxu0 %v8440_v19 }
0x4268   : > { %9672 = vmatprep.subr.mxu0 %v10069_v0  ;;  %v8437_v0 = vrot.slane %v11269_v63, %v6030_v53 }
0x4269   : > { %9673 = vmatpush3.msra.mxu0 %v8439_v20 }
0x4322   : > { %v8329_v62 = vpop.f32.mrf.mxu0 }
0x4323   : > { %v8330_v7 = vadd.f32 %v8831_v6, %v8329_v62 }
0x4324   : > { %v9646_v8 = vpop.f32.mrf.mxu0 }
0x4325   : > { %v8333_v58 = vmax.f32 %v8330_v7, 0.0 }
0x4327   : > { %9664 = vmatmul.mubr.msk.f32.vlgmr.msra.gmra.mxu1 %vm2265_vm5, %v8333_v58 }
0x43e7   : > { %v8409_v48 = vpop.f32.mrf.mxu1 }
0x43e8   : > { %v8410_v10 = vadd.f32 %v8833_v17, %v8409_v48 }
0x43e9   : > { %v9665_v60 = vpop.f32.mrf.mxu1 }
0x43ea   : > { %v8413_v11 = vadd.f32 %v8410_v10, %v8235_v1 }
0x43ec   : > { %v8414_v13 = vsel %vm1108_vm3, %v8413_v11, 0.0  ;;  %v8418_v14 = vmul.f32 %v8413_v11, %v8413_v11 }
0x43ed   : > { %8415 = vadd.xlane.f32.xlu1 %v8414_v13 }
0x43ee   : > { %v8419_v16 = vsel %vm1108_vm3, %v8418_v14, 0.0 }
0x43f1   : > { %8420 = vadd.xlane.f32.xlu1 %v8419_v16 }
0x4476   : > { %v8416_v21 = vpop.xlane.xlu1 %8415 }
0x4477   : > { %v8417_v22 = vmul.f32 0.03125, %v8416_v21 }
0x4479   : > { %v8423_v24 = vmul.f32 %v8417_v22, %v8417_v22  ;;  %v8425_v44 = vsub.f32 %v8413_v11, %v8417_v22 }
0x447a   : > { %v8421_v23 = vpop.xlane.xlu1 %8420 }
0x447b   : > { %v8422_v5 = vmul.f32 0.03125, %v8421_v23 }
0x447d   : > { %v8424_v25 = vsub.f32 %v8422_v5, %v8423_v24 }
0x447f   : > { %v8426_v26 = vadd.f32 1e-05, %v8424_v25 }
0x4481   : > { %9877 = vrsqrt.f32 %v8426_v26 }
0x448e   : > { %v9878_v27 = vpop.eup %9877 }
0x448f   : > { %v8428_v39 = vmul.f32 %v9878_v27, %v8425_v44 }
0x4491   : > { %v8433_v3 = vmul.f32 %v8432_v15, %v8428_v39 }
0x4493   : > { %v8438_v59 = vadd.f32 %v8437_v0, %v8433_v3 }
0x4495   : > { %9675 = vmatmul.mubr.msk.f32.vlgmr.msra.gmra.mxu0 %vm1108_vm3, %v8438_v59 }
0x4555   : > { %v8519_v29 = vpop.f32.mrf.mxu0 }
0x4556   : > { %v8520_v52 = vadd.f32 %v8835_v28, %v8519_v29 }
0x4557   : > { %v9676_v31 = vpop.f32.mrf.mxu0 }
0x4558   : > { %8523 = vst.msk [vmem:[%s918_s9] sm:$0xff] %vm933_vm2, %v8520_v52 }
0x4559 PF: > { %s11553_s30 = sld [smem:[#allocation16_spill]] }
0x455f   : > { %s41_s7 = sadd.s32 1, %s11553_s30  }
0x4560   : > { %p38_p2 = scmp.ge.s32.totalorder %s41_s7, 4  }
0x4562   :  { %40 = sbr.rel (!%p38_p2) target bundleno = 23 (0x17), region = 203 }
0x4567   :  { %8543 = vsyncpa [#allocation3], 1 }
0x4568   :  { %8545 = vsyncpa [#allocation3 + $0x1], 1 }
0x4569   :  { %8546 = vsyncpa [#allocation5], 1 }
0x456a   :  { %8547 = vsyncpa [#allocation8], 1 }
0x456b   :  { %8548 = vsyncpa [#allocation11], 1 }

</bundles_post_ra>
